<compile_context>
chip_gen: v5e
topology: v5e:2x2
jax: 0.10.0
libtpu: 0.0.40
codegen_flags: <defaults>
</compile_context>

<pallas_src>
import jax
import jax.numpy as jnp
from jax.experimental import pallas as pl
from jax.experimental.pallas import tpu as pltpu

EMB_DIM = 480      # ESM hidden size (peptide_linear input)
GEN_DIM = 340      # genome feature size
GEN_PAD = 384      # 340 zero-padded up to a multiple of 128 lanes
HIDDEN_FEAT = 32   # hidden_feat argument of RegressionModel


def mic_regression_kernel(emb_ref, mask_ref, gen_ref,
                          pep_w_ref, pep_b_ref,
                          gw1_ref, gb1_ref, gw2_ref, gb2_ref,
                          lw1p_ref, lw1g_ref, lb1_ref,
                          lw2_ref, lb2_ref,
                          lw3_ref, lb3_ref,
                          out_ref):
    # ---- masked mean pooling over the sequence axis -------------------------
    # Embedding may arrive bf16 (halved HBM bytes); accumulate in f32.
    emb = emb_ref[...].astype(jnp.float32)                # (TB, S, 480)
    mask = mask_ref[...].astype(jnp.float32)               # (TB, S)
    summed = jnp.sum(emb * mask[:, :, None], axis=1)       # (TB, 480)
    denom = jnp.sum(mask, axis=1, keepdims=True)            # (TB, 1)
    # Guard all-zero mask rows (incl. garbage rows of a partial last batch
    # tile); PyTorch would produce NaN there -- those rows are never exposed.
    denom = jnp.maximum(denom, 1.0)
    # EUP approx reciprocal + one Newton step (~f32 accurate; denom is an
    # integer token count).
    inv = pl.reciprocal(denom, approx=True)
    inv = inv * (2.0 - denom * inv)
    hidden = summed * inv                                   # (TB, 480)

    # ---- peptide_linear: Linear(480, 256) ----------------------------------
    pep = jnp.dot(hidden, pep_w_ref[...],
                  preferred_element_type=jnp.float32) + pep_b_ref[...]   # (TB,256)

    # ---- genome_linear: Linear(340->384pad, 256) -> ReLU -> Linear(256,128) -
    g = gen_ref[...]                                                      # (TB,384)
    g1 = jnp.dot(g, gw1_ref[...],
                 preferred_element_type=jnp.float32) + gb1_ref[...]       # (TB,256)
    g1 = jnp.maximum(g1, 0.0)
    g2 = jnp.dot(g1, gw2_ref[...],
                 preferred_element_type=jnp.float32) + gb2_ref[...]       # (TB,128)

    # ---- final MLP on cat([pep, g2], dim=1) (concat realized by W1 split) ---
    h1 = (jnp.dot(pep, lw1p_ref[...], preferred_element_type=jnp.float32)
          + jnp.dot(g2, lw1g_ref[...], preferred_element_type=jnp.float32)
          + lb1_ref[...])                                                 # (TB,H)
    h1 = jnp.maximum(h1, 0.0)
    h2 = jnp.dot(h1, lw2_ref[...],
                 preferred_element_type=jnp.float32) + lb2_ref[...]       # (TB,H)
    h2 = jnp.maximum(h2, 0.0)
    # Linear(H, 1): N=1 wastes the MXU -> VPU multiply + lane reduce.
    out_ref[...] = (jnp.sum(h2 * lw3_ref[...], axis=-1, keepdims=True)
                    + lb3_ref[...])                                       # (TB,1)


def init_params(key, hidden_feat=HIDDEN_FEAT):
    """Deterministic synthetic parameters; weights stored (in, out).

    One-time layout prep (hoisted out of the per-call path):
      * genome_linear[0] weight zero-padded 340 -> 384 rows (`gw1_pad`)
      * final-MLP first weight split into peptide/genome halves (== concat)
      * last Linear(H, 1) weight stored as a (1, H) row (`lw3_row`)
    """
    def linear(k, fan_in, fan_out):
        kw, kb = jax.random.split(k)
        w = jax.random.normal(kw, (fan_in, fan_out), jnp.float32) / jnp.sqrt(
            jnp.float32(fan_in))
        b = 0.01 * jax.random.normal(kb, (1, fan_out), jnp.float32)
        return w, b

    keys = jax.random.split(key, 6)
    pep_w, pep_b = linear(keys[0], EMB_DIM, 256)          # peptide_linear
    gw1, gb1 = linear(keys[1], GEN_DIM, 256)              # genome_linear[0]
    gw2, gb2 = linear(keys[2], 256, 128)                  # genome_linear[2]
    lw1, lb1 = linear(keys[3], 384, hidden_feat)          # linear[0]
    lw2, lb2 = linear(keys[4], hidden_feat, hidden_feat)  # linear[2]
    lw3, lb3 = linear(keys[5], hidden_feat, 1)            # linear[4]
    gw1_pad = jnp.pad(gw1, ((0, GEN_PAD - GEN_DIM), (0, 0)))
    return dict(pep_w=pep_w, pep_b=pep_b,
                gw1=gw1, gw1_pad=gw1_pad, gb1=gb1, gw2=gw2, gb2=gb2,
                lw1p=lw1[:256], lw1g=lw1[256:], lb1=lb1,
                lw2=lw2, lb2=lb2,
                lw3_row=lw3.reshape(1, hidden_feat), lb3=lb3)


def _vmem_limit_bytes():
    """Generation-aware scoped VMEM: 64 MiB on v5e/v6e (128 MiB physical),
    48 MiB on v7x / unknown (64 MiB physical)."""
    try:
        cap = int(pltpu.get_tpu_info().vmem_capacity_bytes)
    except Exception:  # emulator / unknown target
        cap = 0
    return (64 << 20) if cap >= (128 << 20) else (48 << 20)


def _batch_tile(B, S, emb_itemsize, vmem_limit):
    """Batch rows per grid step.

    Per-row budget: two pipeline buffers of the embedding tile (2*itemsize
    bytes/elem) + the in-kernel f32 upcast and the emb*mask product should
    Mosaic materialize it (2*4 bytes/elem), plus ~8 KiB/row for the pooled
    intermediates; ~4 MiB is reserved for the (single-buffered) weights.
    """
    per_row = S * EMB_DIM * (2 * emb_itemsize + 2 * 4) + 8 * 1024
    rows = max(1, int((vmem_limit - (4 << 20)) // per_row))
    # diminishing returns past ~16 MiB per DMA buffer
    rows = min(rows, max(1, (16 << 20) // (S * EMB_DIM * emb_itemsize)))
    if B <= rows:
        return B                      # single tile: block == full array dims
    # keep >= ~4 grid steps so v7x's two TensorCores both get work and
    # double-buffering still has something to overlap
    rows = min(rows, max(8, (pl.cdiv(B, 4) // 8) * 8))
    return max((rows // 8) * 8, 8)    # multiple of 8 sublanes when gridding


def regression_model_forward(embedding, attention_mask, genome_feat, params,
                             *, batch_tile=None):
    B, S, _ = embedding.shape
    mask = attention_mask
    if mask.dtype != jnp.float32:
        mask = mask.astype(jnp.float32)
    # genome features zero-padded 340 -> 384 (tiny array, negligible traffic)
    gen = jnp.pad(genome_feat.astype(jnp.float32),
                  ((0, 0), (0, GEN_PAD - GEN_DIM)))

    vmem_limit = _vmem_limit_bytes()
    tb = batch_tile if batch_tile is not None else _batch_tile(
        B, S, embedding.dtype.itemsize, vmem_limit)
    n_steps = pl.cdiv(B, tb)
    B_pad = n_steps * tb
    if B_pad != B:
        # Do NOT pad the (B,S,480) embedding (that would be an extra full
        # HBM read+write).  Pad only the tiny mask (zeros -> kills the
        # garbage the last partial embedding tile reads out-of-bounds) and
        # genome features; OOB output writes of the last tile are discarded.
        pad = B_pad - B
        mask = jnp.pad(mask, ((0, pad), (0, 0)))
        gen = jnp.pad(gen, ((0, pad), (0, 0)))

    weight_args = (params["pep_w"], params["pep_b"],
                   params["gw1_pad"], params["gb1"],
                   params["gw2"], params["gb2"],
                   params["lw1p"], params["lw1g"], params["lb1"],
                   params["lw2"], params["lb2"],
                   params["lw3_row"], params["lb3"])

    def build_call(single_buffer_weights):
        # weights/biases: full-shape blocks, constant index map -> DMA'd once,
        # VMEM-resident.  Their block index never changes, so a single buffer
        # suffices (saves ~1 MiB; matters most on v7x's 64 MiB VMEM).
        if single_buffer_weights:
            weight_specs = [pl.BlockSpec(w.shape, lambda b: (0, 0),
                                         pipeline_mode=pl.Buffered(1))
                            for w in weight_args]
        else:
            weight_specs = [pl.BlockSpec(w.shape, lambda b: (0, 0))
                            for w in weight_args]
        in_specs = [
            pl.BlockSpec((tb, S, EMB_DIM), lambda b: (b, 0, 0)),  # embedding
            pl.BlockSpec((tb, S), lambda b: (b, 0)),              # mask
            pl.BlockSpec((tb, GEN_PAD), lambda b: (b, 0)),        # genome
        ] + weight_specs
        return pl.pallas_call(
            mic_regression_kernel,
            out_shape=jax.ShapeDtypeStruct((B, 1), jnp.float32),
            grid=(n_steps,),
            in_specs=in_specs,
            out_specs=pl.BlockSpec((tb, 1), lambda b: (b, 0)),
            compiler_params=pltpu.CompilerParams(
                dimension_semantics=("parallel",),   # v7x: shard batch on 2 TCs
                vmem_limit_bytes=vmem_limit),
        )

    try:
        out = build_call(True)(embedding, mask, gen, *weight_args)
    except Exception:
        # Fallback if this jax build rejects pipeline_mode=pl.Buffered(1):
        # identical kernel with default (double) buffering of the weights.
        out = build_call(False)(embedding, mask, gen, *weight_args)
    return jnp.squeeze(out, axis=-1)              # matches predict.squeeze()


def reference_forward(embedding, attention_mask, genome_feat, params):
    """Pure-JAX reference mirroring the PyTorch forward (pooling='mean')."""
    m = attention_mask.astype(jnp.float32)
    emb = embedding.astype(jnp.float32)
    hidden = jnp.sum(emb * m[:, :, None], axis=1) / jnp.sum(
        m, axis=1, keepdims=True)
    pep = hidden @ params["pep_w"] + params["pep_b"]
    g1 = jnp.maximum(genome_feat @ params["gw1"] + params["gb1"], 0.0)
    g2 = g1 @ params["gw2"] + params["gb2"]
    feats = jnp.concatenate([pep, g2], axis=1)
    lw1 = jnp.concatenate([params["lw1p"], params["lw1g"]], axis=0)
    h1 = jnp.maximum(feats @ lw1 + params["lb1"], 0.0)
    h2 = jnp.maximum(h1 @ params["lw2"] + params["lb2"], 0.0)
    return jnp.squeeze(h2 @ params["lw3_row"].T + params["lb3"], axis=-1)


if __name__ == "__main__":
    key = jax.random.PRNGKey(0)
    k_emb, k_gen, k_par, k_emb2, k_gen2 = jax.random.split(key, 5)
    params = init_params(k_par, HIDDEN_FEAT)

    # --- small case: single tile ---------------------------------------------
    # S=16 keeps the bf16 sublane tile (16) aligned.  The embedding is
    # streamed as bf16 (the kernel is bound by this HBM read); pooling
    # accumulates in f32 in-kernel.
    B, S = 2, 16
    embedding = jax.random.normal(
        k_emb, (B, S, EMB_DIM), jnp.float32).astype(jnp.bfloat16)
    lengths = jnp.array([S, 5], dtype=jnp.int32)
    attention_mask = (jnp.arange(S)[None, :] < lengths[:, None]).astype(
        jnp.float32)                                   # (B, S)
    genome_feat = jax.random.normal(k_gen, (B, GEN_DIM), jnp.float32)

    out = regression_model_forward(embedding, attention_mask, genome_feat, params)
    out = jax.block_until_ready(out)
    ref = reference_forward(embedding, attention_mask, genome_feat, params)
    assert out.shape == (B,)
    assert jnp.allclose(out, ref, atol=1e-4, rtol=1e-4), (out, ref)

    # --- gridded case: B not a multiple of the tile (partial last tile) ------
    B2 = 20
    embedding2 = jax.random.normal(
        k_emb2, (B2, S, EMB_DIM), jnp.float32).astype(jnp.bfloat16)
    lengths2 = (jnp.arange(B2, dtype=jnp.int32) % (S - 3)) + 3
    attention_mask2 = (jnp.arange(S)[None, :] < lengths2[:, None]).astype(
        jnp.float32)
    genome_feat2 = jax.random.normal(k_gen2, (B2, GEN_DIM), jnp.float32)

    out2 = regression_model_forward(embedding2, attention_mask2, genome_feat2,
                                    params, batch_tile=8)   # 3 steps, last partial
    out2 = jax.block_until_ready(out2)
    ref2 = reference_forward(embedding2, attention_mask2, genome_feat2, params)
    assert out2.shape == (B2,)
    assert jnp.allclose(out2, ref2, atol=1e-4, rtol=1e-4), (out2, ref2)

    print("KERNEL_OK")
</pallas_src>

<mosaic_0001>
module attributes {stable_mosaic.version = 11 : i64} {
  func.func @mic_regression_kernel(%arg0: i32, %arg1: memref<2x16x480xbf16, #tpu.memory_space<vmem>>, %arg2: memref<2x16xf32, #tpu.memory_space<vmem>>, %arg3: memref<2x384xf32, #tpu.memory_space<vmem>>, %arg4: memref<480x256xf32, #tpu.memory_space<vmem>>, %arg5: memref<1x256xf32, #tpu.memory_space<vmem>>, %arg6: memref<384x256xf32, #tpu.memory_space<vmem>>, %arg7: memref<1x256xf32, #tpu.memory_space<vmem>>, %arg8: memref<256x128xf32, #tpu.memory_space<vmem>>, %arg9: memref<1x128xf32, #tpu.memory_space<vmem>>, %arg10: memref<256x32xf32, #tpu.memory_space<vmem>>, %arg11: memref<128x32xf32, #tpu.memory_space<vmem>>, %arg12: memref<1x32xf32, #tpu.memory_space<vmem>>, %arg13: memref<32x32xf32, #tpu.memory_space<vmem>>, %arg14: memref<1x32xf32, #tpu.memory_space<vmem>>, %arg15: memref<1x32xf32, #tpu.memory_space<vmem>>, %arg16: memref<1x1xf32, #tpu.memory_space<vmem>>, %arg17: memref<2x1xf32, #tpu.memory_space<vmem>>) attributes {dimension_semantics = [#tpu.dimension_semantics<parallel>], iteration_bounds = array<i64: 1>, scalar_prefetch = 0 : i64, scratch_operands = 0 : i64, tpu.core_type = #tpu.core_type<tc>, window_params = [{transform_indices = @transform_0, window_bounds = array<i64: 2, 16, 480>}, {transform_indices = @transform_1, window_bounds = array<i64: 2, 16>}, {transform_indices = @transform_2, window_bounds = array<i64: 2, 384>}, {pipeline_mode = #tpu.pipeline_mode<synchronous>, transform_indices = @transform_3, window_bounds = array<i64: 480, 256>}, {pipeline_mode = #tpu.pipeline_mode<synchronous>, transform_indices = @transform_4, window_bounds = array<i64: 1, 256>}, {pipeline_mode = #tpu.pipeline_mode<synchronous>, transform_indices = @transform_5, window_bounds = array<i64: 384, 256>}, {pipeline_mode = #tpu.pipeline_mode<synchronous>, transform_indices = @transform_6, window_bounds = array<i64: 1, 256>}, {pipeline_mode = #tpu.pipeline_mode<synchronous>, transform_indices = @transform_7, window_bounds = array<i64: 256, 128>}, {pipeline_mode = #tpu.pipeline_mode<synchronous>, transform_indices = @transform_8, window_bounds = array<i64: 1, 128>}, {pipeline_mode = #tpu.pipeline_mode<synchronous>, transform_indices = @transform_9, window_bounds = array<i64: 256, 32>}, {pipeline_mode = #tpu.pipeline_mode<synchronous>, transform_indices = @transform_10, window_bounds = array<i64: 128, 32>}, {pipeline_mode = #tpu.pipeline_mode<synchronous>, transform_indices = @transform_11, window_bounds = array<i64: 1, 32>}, {pipeline_mode = #tpu.pipeline_mode<synchronous>, transform_indices = @transform_12, window_bounds = array<i64: 32, 32>}, {pipeline_mode = #tpu.pipeline_mode<synchronous>, transform_indices = @transform_13, window_bounds = array<i64: 1, 32>}, {pipeline_mode = #tpu.pipeline_mode<synchronous>, transform_indices = @transform_14, window_bounds = array<i64: 1, 32>}, {pipeline_mode = #tpu.pipeline_mode<synchronous>, transform_indices = @transform_15, window_bounds = array<i64: 1, 1>}, {transform_indices = @transform_16, window_bounds = array<i64: 2, 1>}]} {
    %c0 = arith.constant 0 : index
    %c0_0 = arith.constant 0 : index
    %c0_1 = arith.constant 0 : index
    %0 = vector.load %arg1[%c0, %c0_0, %c0_1] : memref<2x16x480xbf16, #tpu.memory_space<vmem>>, vector<2x16x480xbf16>
    %1 = arith.extf %0 : vector<2x16x480xbf16> to vector<2x16x480xf32>
    %c0_2 = arith.constant 0 : index
    %c0_3 = arith.constant 0 : index
    %2 = vector.load %arg2[%c0_2, %c0_3] : memref<2x16xf32, #tpu.memory_space<vmem>>, vector<2x16xf32>
    %3 = vector.shape_cast %2 : vector<2x16xf32> to vector<2x16x1xf32>
    %4 = vector.broadcast %3 : vector<2x16x1xf32> to vector<2x16x480xf32>
    %5 = arith.mulf %1, %4 : vector<2x16x480xf32>
    %cst = arith.constant dense<0.000000e+00> : vector<2x480xf32>
    %6 = vector.multi_reduction <add>, %5, %cst [1] : vector<2x16x480xf32> to vector<2x480xf32>
    %cst_4 = arith.constant dense<0.000000e+00> : vector<2xf32>
    %7 = vector.multi_reduction <add>, %2, %cst_4 [1] : vector<2x16xf32> to vector<2xf32>
    %8 = vector.shape_cast %7 : vector<2xf32> to vector<2x1xf32>
    %cst_5 = arith.constant 1.000000e+00 : f32
    %9 = vector.broadcast %cst_5 : f32 to vector<2x1xf32>
    %10 = arith.maximumf %8, %9 : vector<2x1xf32>
    %11 = tpu.reciprocal %10 {approx = true} : vector<2x1xf32> -> vector<2x1xf32>
    %12 = arith.mulf %10, %11 : vector<2x1xf32>
    %cst_6 = arith.constant 2.000000e+00 : f32
    %13 = vector.broadcast %cst_6 : f32 to vector<2x1xf32>
    %14 = arith.subf %13, %12 : vector<2x1xf32>
    %15 = arith.mulf %11, %14 : vector<2x1xf32>
    %16 = vector.broadcast %15 : vector<2x1xf32> to vector<2x480xf32>
    %17 = arith.mulf %6, %16 : vector<2x480xf32>
    %c0_7 = arith.constant 0 : index
    %c0_8 = arith.constant 0 : index
    %18 = vector.load %arg4[%c0_7, %c0_8] : memref<480x256xf32, #tpu.memory_space<vmem>>, vector<480x256xf32>
    %cst_9 = arith.constant dense<0.000000e+00> : vector<2x256xf32>
    %19 = tpu.matmul %17, %18, %cst_9 {dimension_numbers = #tpu.dot_dimension_numbers<[1], [0], [0], [1], [0, 0, 1, 1], [], []>} : vector<2x480xf32>, vector<480x256xf32>, vector<2x256xf32> -> vector<2x256xf32>
    %c0_10 = arith.constant 0 : index
    %c0_11 = arith.constant 0 : index
    %20 = vector.load %arg5[%c0_10, %c0_11] : memref<1x256xf32, #tpu.memory_space<vmem>>, vector<1x256xf32>
    %21 = vector.broadcast %20 : vector<1x256xf32> to vector<2x256xf32>
    %22 = arith.addf %19, %21 : vector<2x256xf32>
    %c0_12 = arith.constant 0 : index
    %c0_13 = arith.constant 0 : index
    %23 = vector.load %arg3[%c0_12, %c0_13] : memref<2x384xf32, #tpu.memory_space<vmem>>, vector<2x384xf32>
    %c0_14 = arith.constant 0 : index
    %c0_15 = arith.constant 0 : index
    %24 = vector.load %arg6[%c0_14, %c0_15] : memref<384x256xf32, #tpu.memory_space<vmem>>, vector<384x256xf32>
    %cst_16 = arith.constant dense<0.000000e+00> : vector<2x256xf32>
    %25 = tpu.matmul %23, %24, %cst_16 {dimension_numbers = #tpu.dot_dimension_numbers<[1], [0], [0], [1], [0, 0, 1, 1], [], []>} : vector<2x384xf32>, vector<384x256xf32>, vector<2x256xf32> -> vector<2x256xf32>
    %c0_17 = arith.constant 0 : index
    %c0_18 = arith.constant 0 : index
    %26 = vector.load %arg7[%c0_17, %c0_18] : memref<1x256xf32, #tpu.memory_space<vmem>>, vector<1x256xf32>
    %27 = vector.broadcast %26 : vector<1x256xf32> to vector<2x256xf32>
    %28 = arith.addf %25, %27 : vector<2x256xf32>
    %cst_19 = arith.constant 0.000000e+00 : f32
    %29 = vector.broadcast %cst_19 : f32 to vector<2x256xf32>
    %30 = arith.maximumf %28, %29 : vector<2x256xf32>
    %c0_20 = arith.constant 0 : index
    %c0_21 = arith.constant 0 : index
    %31 = vector.load %arg8[%c0_20, %c0_21] : memref<256x128xf32, #tpu.memory_space<vmem>>, vector<256x128xf32>
    %cst_22 = arith.constant dense<0.000000e+00> : vector<2x128xf32>
    %32 = tpu.matmul %30, %31, %cst_22 {dimension_numbers = #tpu.dot_dimension_numbers<[1], [0], [0], [1], [0, 0, 1, 1], [], []>} : vector<2x256xf32>, vector<256x128xf32>, vector<2x128xf32> -> vector<2x128xf32>
    %c0_23 = arith.constant 0 : index
    %c0_24 = arith.constant 0 : index
    %33 = vector.load %arg9[%c0_23, %c0_24] : memref<1x128xf32, #tpu.memory_space<vmem>>, vector<1x128xf32>
    %34 = vector.broadcast %33 : vector<1x128xf32> to vector<2x128xf32>
    %35 = arith.addf %32, %34 : vector<2x128xf32>
    %c0_25 = arith.constant 0 : index
    %c0_26 = arith.constant 0 : index
    %36 = vector.load %arg10[%c0_25, %c0_26] : memref<256x32xf32, #tpu.memory_space<vmem>>, vector<256x32xf32>
    %cst_27 = arith.constant dense<0.000000e+00> : vector<2x32xf32>
    %37 = tpu.matmul %22, %36, %cst_27 {dimension_numbers = #tpu.dot_dimension_numbers<[1], [0], [0], [1], [0, 0, 1, 1], [], []>} : vector<2x256xf32>, vector<256x32xf32>, vector<2x32xf32> -> vector<2x32xf32>
    %c0_28 = arith.constant 0 : index
    %c0_29 = arith.constant 0 : index
    %38 = vector.load %arg11[%c0_28, %c0_29] : memref<128x32xf32, #tpu.memory_space<vmem>>, vector<128x32xf32>
    %cst_30 = arith.constant dense<0.000000e+00> : vector<2x32xf32>
    %39 = tpu.matmul %35, %38, %cst_30 {dimension_numbers = #tpu.dot_dimension_numbers<[1], [0], [0], [1], [0, 0, 1, 1], [], []>} : vector<2x128xf32>, vector<128x32xf32>, vector<2x32xf32> -> vector<2x32xf32>
    %40 = arith.addf %37, %39 : vector<2x32xf32>
    %c0_31 = arith.constant 0 : index
    %c0_32 = arith.constant 0 : index
    %41 = vector.load %arg12[%c0_31, %c0_32] : memref<1x32xf32, #tpu.memory_space<vmem>>, vector<1x32xf32>
    %42 = vector.broadcast %41 : vector<1x32xf32> to vector<2x32xf32>
    %43 = arith.addf %40, %42 : vector<2x32xf32>
    %cst_33 = arith.constant 0.000000e+00 : f32
    %44 = vector.broadcast %cst_33 : f32 to vector<2x32xf32>
    %45 = arith.maximumf %43, %44 : vector<2x32xf32>
    %c0_34 = arith.constant 0 : index
    %c0_35 = arith.constant 0 : index
    %46 = vector.load %arg13[%c0_34, %c0_35] : memref<32x32xf32, #tpu.memory_space<vmem>>, vector<32x32xf32>
    %cst_36 = arith.constant dense<0.000000e+00> : vector<2x32xf32>
    %47 = tpu.matmul %45, %46, %cst_36 {dimension_numbers = #tpu.dot_dimension_numbers<[1], [0], [0], [1], [0, 0, 1, 1], [], []>} : vector<2x32xf32>, vector<32x32xf32>, vector<2x32xf32> -> vector<2x32xf32>
    %c0_37 = arith.constant 0 : index
    %c0_38 = arith.constant 0 : index
    %48 = vector.load %arg14[%c0_37, %c0_38] : memref<1x32xf32, #tpu.memory_space<vmem>>, vector<1x32xf32>
    %49 = vector.broadcast %48 : vector<1x32xf32> to vector<2x32xf32>
    %50 = arith.addf %47, %49 : vector<2x32xf32>
    %cst_39 = arith.constant 0.000000e+00 : f32
    %51 = vector.broadcast %cst_39 : f32 to vector<2x32xf32>
    %52 = arith.maximumf %50, %51 : vector<2x32xf32>
    %c0_40 = arith.constant 0 : index
    %c0_41 = arith.constant 0 : index
    %53 = vector.load %arg15[%c0_40, %c0_41] : memref<1x32xf32, #tpu.memory_space<vmem>>, vector<1x32xf32>
    %54 = vector.broadcast %53 : vector<1x32xf32> to vector<2x32xf32>
    %55 = arith.mulf %52, %54 : vector<2x32xf32>
    %cst_42 = arith.constant dense<0.000000e+00> : vector<2xf32>
    %56 = vector.multi_reduction <add>, %55, %cst_42 [1] : vector<2x32xf32> to vector<2xf32>
    %57 = vector.shape_cast %56 : vector<2xf32> to vector<2x1xf32>
    %c0_43 = arith.constant 0 : index
    %c0_44 = arith.constant 0 : index
    %58 = vector.load %arg16[%c0_43, %c0_44] : memref<1x1xf32, #tpu.memory_space<vmem>>, vector<1x1xf32>
    %59 = vector.broadcast %58 : vector<1x1xf32> to vector<2x1xf32>
    %60 = arith.addf %57, %59 : vector<2x1xf32>
    %c0_45 = arith.constant 0 : index
    %c0_46 = arith.constant 0 : index
    %61 = vector.load %arg17[%c0_45, %c0_46] : memref<2x1xf32, #tpu.memory_space<vmem>>, vector<2x1xf32>
    tpu.vector_store %arg17[%c0_45, %c0_46], %60 {strides = array<i32>} : memref<2x1xf32, #tpu.memory_space<vmem>>, vector<2x1xf32>,
    return
  }
  func.func @transform_0(%arg0: i32) -> (i32, i32, i32) {
    %c0_i32 = arith.constant 0 : i32
    %c0_i32_0 = arith.constant 0 : i32
    %c0_i32_1 = arith.constant 0 : i32
    return %arg0, %c0_i32, %c0_i32_0 : i32, i32, i32
  }
  func.func @transform_1(%arg0: i32) -> (i32, i32) {
    %c0_i32 = arith.constant 0 : i32
    %c0_i32_0 = arith.constant 0 : i32
    return %arg0, %c0_i32 : i32, i32
  }
  func.func @transform_2(%arg0: i32) -> (i32, i32) {
    %c0_i32 = arith.constant 0 : i32
    %c0_i32_0 = arith.constant 0 : i32
    return %arg0, %c0_i32 : i32, i32
  }
  func.func @transform_3(%arg0: i32) -> (i32, i32) {
    %c0_i32 = arith.constant 0 : i32
    %c0_i32_0 = arith.constant 0 : i32
    %c0_i32_1 = arith.constant 0 : i32
    return %c0_i32, %c0_i32_0 : i32, i32
  }
  func.func @transform_4(%arg0: i32) -> (i32, i32) {
    %c0_i32 = arith.constant 0 : i32
    %c0_i32_0 = arith.constant 0 : i32
    %c0_i32_1 = arith.constant 0 : i32
    return %c0_i32, %c0_i32_0 : i32, i32
  }
  func.func @transform_5(%arg0: i32) -> (i32, i32) {
    %c0_i32 = arith.constant 0 : i32
    %c0_i32_0 = arith.constant 0 : i32
    %c0_i32_1 = arith.constant 0 : i32
    return %c0_i32, %c0_i32_0 : i32, i32
  }
  func.func @transform_6(%arg0: i32) -> (i32, i32) {
    %c0_i32 = arith.constant 0 : i32
    %c0_i32_0 = arith.constant 0 : i32
    %c0_i32_1 = arith.constant 0 : i32
    return %c0_i32, %c0_i32_0 : i32, i32
  }
  func.func @transform_7(%arg0: i32) -> (i32, i32) {
    %c0_i32 = arith.constant 0 : i32
    %c0_i32_0 = arith.constant 0 : i32
    %c0_i32_1 = arith.constant 0 : i32
    return %c0_i32, %c0_i32_0 : i32, i32
  }
  func.func @transform_8(%arg0: i32) -> (i32, i32) {
    %c0_i32 = arith.constant 0 : i32
    %c0_i32_0 = arith.constant 0 : i32
    %c0_i32_1 = arith.constant 0 : i32
    return %c0_i32, %c0_i32_0 : i32, i32
  }
  func.func @transform_9(%arg0: i32) -> (i32, i32) {
    %c0_i32 = arith.constant 0 : i32
    %c0_i32_0 = arith.constant 0 : i32
    %c0_i32_1 = arith.constant 0 : i32
    return %c0_i32, %c0_i32_0 : i32, i32
  }
  func.func @transform_10(%arg0: i32) -> (i32, i32) {
    %c0_i32 = arith.constant 0 : i32
    %c0_i32_0 = arith.constant 0 : i32
    %c0_i32_1 = arith.constant 0 : i32
    return %c0_i32, %c0_i32_0 : i32, i32
  }
  func.func @transform_11(%arg0: i32) -> (i32, i32) {
    %c0_i32 = arith.constant 0 : i32
    %c0_i32_0 = arith.constant 0 : i32
    %c0_i32_1 = arith.constant 0 : i32
    return %c0_i32, %c0_i32_0 : i32, i32
  }
  func.func @transform_12(%arg0: i32) -> (i32, i32) {
    %c0_i32 = arith.constant 0 : i32
    %c0_i32_0 = arith.constant 0 : i32
    %c0_i32_1 = arith.constant 0 : i32
    return %c0_i32, %c0_i32_0 : i32, i32
  }
  func.func @transform_13(%arg0: i32) -> (i32, i32) {
    %c0_i32 = arith.constant 0 : i32
    %c0_i32_0 = arith.constant 0 : i32
    %c0_i32_1 = arith.constant 0 : i32
    return %c0_i32, %c0_i32_0 : i32, i32
  }
  func.func @transform_14(%arg0: i32) -> (i32, i32) {
    %c0_i32 = arith.constant 0 : i32
    %c0_i32_0 = arith.constant 0 : i32
    %c0_i32_1 = arith.constant 0 : i32
    return %c0_i32, %c0_i32_0 : i32, i32
  }
  func.func @transform_15(%arg0: i32) -> (i32, i32) {
    %c0_i32 = arith.constant 0 : i32
    %c0_i32_0 = arith.constant 0 : i32
    %c0_i32_1 = arith.constant 0 : i32
    return %c0_i32, %c0_i32_0 : i32, i32
  }
  func.func @transform_16(%arg0: i32) -> (i32, i32) {
    %c0_i32 = arith.constant 0 : i32
    %c0_i32_0 = arith.constant 0 : i32
    return %arg0, %c0_i32 : i32, i32
  }
}

module attributes {stable_mosaic.version = 11 : i64} {
  func.func @mic_regression_kernel(%arg0: i32, %arg1: memref<2x16x480xbf16, #tpu.memory_space<vmem>>, %arg2: memref<2x16xf32, #tpu.memory_space<vmem>>, %arg3: memref<2x384xf32, #tpu.memory_space<vmem>>, %arg4: memref<480x256xf32, #tpu.memory_space<vmem>>, %arg5: memref<1x256xf32, #tpu.memory_space<vmem>>, %arg6: memref<384x256xf32, #tpu.memory_space<vmem>>, %arg7: memref<1x256xf32, #tpu.memory_space<vmem>>, %arg8: memref<256x128xf32, #tpu.memory_space<vmem>>, %arg9: memref<1x128xf32, #tpu.memory_space<vmem>>, %arg10: memref<256x32xf32, #tpu.memory_space<vmem>>, %arg11: memref<128x32xf32, #tpu.memory_space<vmem>>, %arg12: memref<1x32xf32, #tpu.memory_space<vmem>>, %arg13: memref<32x32xf32, #tpu.memory_space<vmem>>, %arg14: memref<1x32xf32, #tpu.memory_space<vmem>>, %arg15: memref<1x32xf32, #tpu.memory_space<vmem>>, %arg16: memref<1x1xf32, #tpu.memory_space<vmem>>, %arg17: memref<2x1xf32, #tpu.memory_space<vmem>>) attributes {dimension_semantics = [#tpu.dimension_semantics<parallel>], iteration_bounds = array<i64: 1>, scalar_prefetch = 0 : i64, scratch_operands = 0 : i64, tpu.core_type = #tpu.core_type<tc>, window_params = [{transform_indices = @transform_0, window_bounds = array<i64: 2, 16, 480>}, {transform_indices = @transform_1, window_bounds = array<i64: 2, 16>}, {transform_indices = @transform_2, window_bounds = array<i64: 2, 384>}, {pipeline_mode = #tpu.pipeline_mode<synchronous>, transform_indices = @transform_3, window_bounds = array<i64: 480, 256>}, {pipeline_mode = #tpu.pipeline_mode<synchronous>, transform_indices = @transform_4, window_bounds = array<i64: 1, 256>}, {pipeline_mode = #tpu.pipeline_mode<synchronous>, transform_indices = @transform_5, window_bounds = array<i64: 384, 256>}, {pipeline_mode = #tpu.pipeline_mode<synchronous>, transform_indices = @transform_6, window_bounds = array<i64: 1, 256>}, {pipeline_mode = #tpu.pipeline_mode<synchronous>, transform_indices = @transform_7, window_bounds = array<i64: 256, 128>}, {pipeline_mode = #tpu.pipeline_mode<synchronous>, transform_indices = @transform_8, window_bounds = array<i64: 1, 128>}, {pipeline_mode = #tpu.pipeline_mode<synchronous>, transform_indices = @transform_9, window_bounds = array<i64: 256, 32>}, {pipeline_mode = #tpu.pipeline_mode<synchronous>, transform_indices = @transform_10, window_bounds = array<i64: 128, 32>}, {pipeline_mode = #tpu.pipeline_mode<synchronous>, transform_indices = @transform_11, window_bounds = array<i64: 1, 32>}, {pipeline_mode = #tpu.pipeline_mode<synchronous>, transform_indices = @transform_12, window_bounds = array<i64: 32, 32>}, {pipeline_mode = #tpu.pipeline_mode<synchronous>, transform_indices = @transform_13, window_bounds = array<i64: 1, 32>}, {pipeline_mode = #tpu.pipeline_mode<synchronous>, transform_indices = @transform_14, window_bounds = array<i64: 1, 32>}, {pipeline_mode = #tpu.pipeline_mode<synchronous>, transform_indices = @transform_15, window_bounds = array<i64: 1, 1>}, {transform_indices = @transform_16, window_bounds = array<i64: 2, 1>}]} {
    %c0 = arith.constant 0 : index
    %c0_0 = arith.constant 0 : index
    %c0_1 = arith.constant 0 : index
    %0 = vector.load %arg1[%c0, %c0_0, %c0_1] : memref<2x16x480xbf16, #tpu.memory_space<vmem>>, vector<2x16x480xbf16>
    %1 = arith.extf %0 : vector<2x16x480xbf16> to vector<2x16x480xf32>
    %c0_2 = arith.constant 0 : index
    %c0_3 = arith.constant 0 : index
    %2 = vector.load %arg2[%c0_2, %c0_3] : memref<2x16xf32, #tpu.memory_space<vmem>>, vector<2x16xf32>
    %3 = vector.shape_cast %2 : vector<2x16xf32> to vector<2x16x1xf32>
    %4 = vector.broadcast %3 : vector<2x16x1xf32> to vector<2x16x480xf32>
    %5 = arith.mulf %1, %4 : vector<2x16x480xf32>
    %cst = arith.constant dense<0.000000e+00> : vector<2x480xf32>
    %6 = vector.multi_reduction <add>, %5, %cst [1] : vector<2x16x480xf32> to vector<2x480xf32>
    %cst_4 = arith.constant dense<0.000000e+00> : vector<2xf32>
    %7 = vector.multi_reduction <add>, %2, %cst_4 [1] : vector<2x16xf32> to vector<2xf32>
    %8 = vector.shape_cast %7 : vector<2xf32> to vector<2x1xf32>
    %cst_5 = arith.constant 1.000000e+00 : f32
    %9 = vector.broadcast %cst_5 : f32 to vector<2x1xf32>
    %10 = arith.maximumf %8, %9 : vector<2x1xf32>
    %11 = tpu.reciprocal %10 {approx = true} : vector<2x1xf32> -> vector<2x1xf32>
    %12 = arith.mulf %10, %11 : vector<2x1xf32>
    %cst_6 = arith.constant 2.000000e+00 : f32
    %13 = vector.broadcast %cst_6 : f32 to vector<2x1xf32>
    %14 = arith.subf %13, %12 : vector<2x1xf32>
    %15 = arith.mulf %11, %14 : vector<2x1xf32>
    %16 = vector.broadcast %15 : vector<2x1xf32> to vector<2x480xf32>
    %17 = arith.mulf %6, %16 : vector<2x480xf32>
    %c0_7 = arith.constant 0 : index
    %c0_8 = arith.constant 0 : index
    %18 = vector.load %arg4[%c0_7, %c0_8] : memref<480x256xf32, #tpu.memory_space<vmem>>, vector<480x256xf32>
    %cst_9 = arith.constant dense<0.000000e+00> : vector<2x256xf32>
    %19 = tpu.matmul %17, %18, %cst_9 {dimension_numbers = #tpu.dot_dimension_numbers<[1], [0], [0], [1], [0, 0, 1, 1], [], []>} : vector<2x480xf32>, vector<480x256xf32>, vector<2x256xf32> -> vector<2x256xf32>
    %c0_10 = arith.constant 0 : index
    %c0_11 = arith.constant 0 : index
    %20 = vector.load %arg5[%c0_10, %c0_11] : memref<1x256xf32, #tpu.memory_space<vmem>>, vector<1x256xf32>
    %21 = vector.broadcast %20 : vector<1x256xf32> to vector<2x256xf32>
    %22 = arith.addf %19, %21 : vector<2x256xf32>
    %c0_12 = arith.constant 0 : index
    %c0_13 = arith.constant 0 : index
    %23 = vector.load %arg3[%c0_12, %c0_13] : memref<2x384xf32, #tpu.memory_space<vmem>>, vector<2x384xf32>
    %c0_14 = arith.constant 0 : index
    %c0_15 = arith.constant 0 : index
    %24 = vector.load %arg6[%c0_14, %c0_15] : memref<384x256xf32, #tpu.memory_space<vmem>>, vector<384x256xf32>
    %cst_16 = arith.constant dense<0.000000e+00> : vector<2x256xf32>
    %25 = tpu.matmul %23, %24, %cst_16 {dimension_numbers = #tpu.dot_dimension_numbers<[1], [0], [0], [1], [0, 0, 1, 1], [], []>} : vector<2x384xf32>, vector<384x256xf32>, vector<2x256xf32> -> vector<2x256xf32>
    %c0_17 = arith.constant 0 : index
    %c0_18 = arith.constant 0 : index
    %26 = vector.load %arg7[%c0_17, %c0_18] : memref<1x256xf32, #tpu.memory_space<vmem>>, vector<1x256xf32>
    %27 = vector.broadcast %26 : vector<1x256xf32> to vector<2x256xf32>
    %28 = arith.addf %25, %27 : vector<2x256xf32>
    %cst_19 = arith.constant 0.000000e+00 : f32
    %29 = vector.broadcast %cst_19 : f32 to vector<2x256xf32>
    %30 = arith.maximumf %28, %29 : vector<2x256xf32>
    %c0_20 = arith.constant 0 : index
    %c0_21 = arith.constant 0 : index
    %31 = vector.load %arg8[%c0_20, %c0_21] : memref<256x128xf32, #tpu.memory_space<vmem>>, vector<256x128xf32>
    %cst_22 = arith.constant dense<0.000000e+00> : vector<2x128xf32>
    %32 = tpu.matmul %30, %31, %cst_22 {dimension_numbers = #tpu.dot_dimension_numbers<[1], [0], [0], [1], [0, 0, 1, 1], [], []>} : vector<2x256xf32>, vector<256x128xf32>, vector<2x128xf32> -> vector<2x128xf32>
    %c0_23 = arith.constant 0 : index
    %c0_24 = arith.constant 0 : index
    %33 = vector.load %arg9[%c0_23, %c0_24] : memref<1x128xf32, #tpu.memory_space<vmem>>, vector<1x128xf32>
    %34 = vector.broadcast %33 : vector<1x128xf32> to vector<2x128xf32>
    %35 = arith.addf %32, %34 : vector<2x128xf32>
    %c0_25 = arith.constant 0 : index
    %c0_26 = arith.constant 0 : index
    %36 = vector.load %arg10[%c0_25, %c0_26] : memref<256x32xf32, #tpu.memory_space<vmem>>, vector<256x32xf32>
    %cst_27 = arith.constant dense<0.000000e+00> : vector<2x32xf32>
    %37 = tpu.matmul %22, %36, %cst_27 {dimension_numbers = #tpu.dot_dimension_numbers<[1], [0], [0], [1], [0, 0, 1, 1], [], []>} : vector<2x256xf32>, vector<256x32xf32>, vector<2x32xf32> -> vector<2x32xf32>
    %c0_28 = arith.constant 0 : index
    %c0_29 = arith.constant 0 : index
    %38 = vector.load %arg11[%c0_28, %c0_29] : memref<128x32xf32, #tpu.memory_space<vmem>>, vector<128x32xf32>
    %cst_30 = arith.constant dense<0.000000e+00> : vector<2x32xf32>
    %39 = tpu.matmul %35, %38, %cst_30 {dimension_numbers = #tpu.dot_dimension_numbers<[1], [0], [0], [1], [0, 0, 1, 1], [], []>} : vector<2x128xf32>, vector<128x32xf32>, vector<2x32xf32> -> vector<2x32xf32>
    %40 = arith.addf %37, %39 : vector<2x32xf32>
    %c0_31 = arith.constant 0 : index
    %c0_32 = arith.constant 0 : index
    %41 = vector.load %arg12[%c0_31, %c0_32] : memref<1x32xf32, #tpu.memory_space<vmem>>, vector<1x32xf32>
    %42 = vector.broadcast %41 : vector<1x32xf32> to vector<2x32xf32>
    %43 = arith.addf %40, %42 : vector<2x32xf32>
    %cst_33 = arith.constant 0.000000e+00 : f32
    %44 = vector.broadcast %cst_33 : f32 to vector<2x32xf32>
    %45 = arith.maximumf %43, %44 : vector<2x32xf32>
    %c0_34 = arith.constant 0 : index
    %c0_35 = arith.constant 0 : index
    %46 = vector.load %arg13[%c0_34, %c0_35] : memref<32x32xf32, #tpu.memory_space<vmem>>, vector<32x32xf32>
    %cst_36 = arith.constant dense<0.000000e+00> : vector<2x32xf32>
    %47 = tpu.matmul %45, %46, %cst_36 {dimension_numbers = #tpu.dot_dimension_numbers<[1], [0], [0], [1], [0, 0, 1, 1], [], []>} : vector<2x32xf32>, vector<32x32xf32>, vector<2x32xf32> -> vector<2x32xf32>
    %c0_37 = arith.constant 0 : index
    %c0_38 = arith.constant 0 : index
    %48 = vector.load %arg14[%c0_37, %c0_38] : memref<1x32xf32, #tpu.memory_space<vmem>>, vector<1x32xf32>
    %49 = vector.broadcast %48 : vector<1x32xf32> to vector<2x32xf32>
    %50 = arith.addf %47, %49 : vector<2x32xf32>
    %cst_39 = arith.constant 0.000000e+00 : f32
    %51 = vector.broadcast %cst_39 : f32 to vector<2x32xf32>
    %52 = arith.maximumf %50, %51 : vector<2x32xf32>
    %c0_40 = arith.constant 0 : index
    %c0_41 = arith.constant 0 : index
    %53 = vector.load %arg15[%c0_40, %c0_41] : memref<1x32xf32, #tpu.memory_space<vmem>>, vector<1x32xf32>
    %54 = vector.broadcast %53 : vector<1x32xf32> to vector<2x32xf32>
    %55 = arith.mulf %52, %54 : vector<2x32xf32>
    %cst_42 = arith.constant dense<0.000000e+00> : vector<2xf32>
    %56 = vector.multi_reduction <add>, %55, %cst_42 [1] : vector<2x32xf32> to vector<2xf32>
    %57 = vector.shape_cast %56 : vector<2xf32> to vector<2x1xf32>
    %c0_43 = arith.constant 0 : index
    %c0_44 = arith.constant 0 : index
    %58 = vector.load %arg16[%c0_43, %c0_44] : memref<1x1xf32, #tpu.memory_space<vmem>>, vector<1x1xf32>
    %59 = vector.broadcast %58 : vector<1x1xf32> to vector<2x1xf32>
    %60 = arith.addf %57, %59 : vector<2x1xf32>
    %c0_45 = arith.constant 0 : index
    %c0_46 = arith.constant 0 : index
    %61 = vector.load %arg17[%c0_45, %c0_46] : memref<2x1xf32, #tpu.memory_space<vmem>>, vector<2x1xf32>
    tpu.vector_store %arg17[%c0_45, %c0_46], %60 {strides = array<i32>} : memref<2x1xf32, #tpu.memory_space<vmem>>, vector<2x1xf32>,
    return
  }
  func.func @transform_0(%arg0: i32) -> (i32, i32, i32) {
    %c0_i32 = arith.constant 0 : i32
    %c0_i32_0 = arith.constant 0 : i32
    %c0_i32_1 = arith.constant 0 : i32
    return %arg0, %c0_i32, %c0_i32_0 : i32, i32, i32
  }
  func.func @transform_1(%arg0: i32) -> (i32, i32) {
    %c0_i32 = arith.constant 0 : i32
    %c0_i32_0 = arith.constant 0 : i32
    return %arg0, %c0_i32 : i32, i32
  }
  func.func @transform_2(%arg0: i32) -> (i32, i32) {
    %c0_i32 = arith.constant 0 : i32
    %c0_i32_0 = arith.constant 0 : i32
    return %arg0, %c0_i32 : i32, i32
  }
  func.func @transform_3(%arg0: i32) -> (i32, i32) {
    %c0_i32 = arith.constant 0 : i32
    %c0_i32_0 = arith.constant 0 : i32
    %c0_i32_1 = arith.constant 0 : i32
    return %c0_i32, %c0_i32_0 : i32, i32
  }
  func.func @transform_4(%arg0: i32) -> (i32, i32) {
    %c0_i32 = arith.constant 0 : i32
    %c0_i32_0 = arith.constant 0 : i32
    %c0_i32_1 = arith.constant 0 : i32
    return %c0_i32, %c0_i32_0 : i32, i32
  }
  func.func @transform_5(%arg0: i32) -> (i32, i32) {
    %c0_i32 = arith.constant 0 : i32
    %c0_i32_0 = arith.constant 0 : i32
    %c0_i32_1 = arith.constant 0 : i32
    return %c0_i32, %c0_i32_0 : i32, i32
  }
  func.func @transform_6(%arg0: i32) -> (i32, i32) {
    %c0_i32 = arith.constant 0 : i32
    %c0_i32_0 = arith.constant 0 : i32
    %c0_i32_1 = arith.constant 0 : i32
    return %c0_i32, %c0_i32_0 : i32, i32
  }
  func.func @transform_7(%arg0: i32) -> (i32, i32) {
    %c0_i32 = arith.constant 0 : i32
    %c0_i32_0 = arith.constant 0 : i32
    %c0_i32_1 = arith.constant 0 : i32
    return %c0_i32, %c0_i32_0 : i32, i32
  }
  func.func @transform_8(%arg0: i32) -> (i32, i32) {
    %c0_i32 = arith.constant 0 : i32
    %c0_i32_0 = arith.constant 0 : i32
    %c0_i32_1 = arith.constant 0 : i32
    return %c0_i32, %c0_i32_0 : i32, i32
  }
  func.func @transform_9(%arg0: i32) -> (i32, i32) {
    %c0_i32 = arith.constant 0 : i32
    %c0_i32_0 = arith.constant 0 : i32
    %c0_i32_1 = arith.constant 0 : i32
    return %c0_i32, %c0_i32_0 : i32, i32
  }
  func.func @transform_10(%arg0: i32) -> (i32, i32) {
    %c0_i32 = arith.constant 0 : i32
    %c0_i32_0 = arith.constant 0 : i32
    %c0_i32_1 = arith.constant 0 : i32
    return %c0_i32, %c0_i32_0 : i32, i32
  }
  func.func @transform_11(%arg0: i32) -> (i32, i32) {
    %c0_i32 = arith.constant 0 : i32
    %c0_i32_0 = arith.constant 0 : i32
    %c0_i32_1 = arith.constant 0 : i32
    return %c0_i32, %c0_i32_0 : i32, i32
  }
  func.func @transform_12(%arg0: i32) -> (i32, i32) {
    %c0_i32 = arith.constant 0 : i32
    %c0_i32_0 = arith.constant 0 : i32
    %c0_i32_1 = arith.constant 0 : i32
    return %c0_i32, %c0_i32_0 : i32, i32
  }
  func.func @transform_13(%arg0: i32) -> (i32, i32) {
    %c0_i32 = arith.constant 0 : i32
    %c0_i32_0 = arith.constant 0 : i32
    %c0_i32_1 = arith.constant 0 : i32
    return %c0_i32, %c0_i32_0 : i32, i32
  }
  func.func @transform_14(%arg0: i32) -> (i32, i32) {
    %c0_i32 = arith.constant 0 : i32
    %c0_i32_0 = arith.constant 0 : i32
    %c0_i32_1 = arith.constant 0 : i32
    return %c0_i32, %c0_i32_0 : i32, i32
  }
  func.func @transform_15(%arg0: i32) -> (i32, i32) {
    %c0_i32 = arith.constant 0 : i32
    %c0_i32_0 = arith.constant 0 : i32
    %c0_i32_1 = arith.constant 0 : i32
    return %c0_i32, %c0_i32_0 : i32, i32
  }
  func.func @transform_16(%arg0: i32) -> (i32, i32) {
    %c0_i32 = arith.constant 0 : i32
    %c0_i32_0 = arith.constant 0 : i32
    return %arg0, %c0_i32 : i32, i32
  }
}

</mosaic_0001>

<bundles_post_ra>
// kernel: tpu_custom_call.1
= control target key start
LH: loop header
LB: loop body
LE: loop exit
PB: predicated region body
PF: predicated region fallthrough
CT: control target
= control target key end

     0   :  { %s1552_s0 = inlined_call_operand.vmem [shape: bf16[2,16,480], index: 0, kind: input, shape index: {}]   ;;  %s1553_s1 = inlined_call_operand.vmem [shape: f32[2,16], index: 1, kind: input, shape index: {}]   ;;  %s1554_s2 = inlined_call_operand.vmem [shape: f32[2,384], index: 2, kind: input, shape index: {}]   ;;  %s1555_s3 = inlined_call_operand.hbm [shape: f32[480,256], index: 3, kind: input, shape index: {}]   ;;  %s1556_s4 = inlined_call_operand.vmem [shape: f32[1,256], index: 4, kind: input, shape index: {}]   ;;  %s1557_s5 = inlined_call_operand.hbm [shape: f32[384,256], index: 5, kind: input, shape index: {}]   ;;  %s1558_s6 = inlined_call_operand.vmem [shape: f32[1,256], index: 6, kind: input, shape index: {}]   ;;  %s1559_s7 = inlined_call_operand.vmem [shape: f32[256,128], index: 7, kind: input, shape index: {}]   ;;  %s1560_s8 = inlined_call_operand.vmem [shape: f32[1,128], index: 8, kind: input, shape index: {}]   ;;  %s1561_s9 = inlined_call_operand.vmem [shape: f32[256,32], index: 9, kind: input, shape index: {}]   ;;  %s1562_s10 = inlined_call_operand.vmem [shape: f32[128,32], index: 10, kind: input, shape index: {}]   ;;  %s1563_s11 = inlined_call_operand.vmem [shape: f32[1,32], index: 11, kind: input, shape index: {}]   ;;  %s1564_s12 = inlined_call_operand.vmem [shape: f32[32,32], index: 12, kind: input, shape index: {}]   ;;  %s1565_s13 = inlined_call_operand.vmem [shape: f32[1,32], index: 13, kind: input, shape index: {}]   ;;  %s1566_s14 = inlined_call_operand.vmem [shape: f32[1,32], index: 14, kind: input, shape index: {}]   ;;  %s1567_s15 = inlined_call_operand.<no memory space> [shape: f32[1,1], index: 15, kind: input, shape index: {}]   ;;  %s1568_s16 = inlined_call_operand.vmem [shape: f32[2,1], index: 16, kind: output, shape index: {}]  }
   0x1   :  { %1570 = sst [smem:[#allocation9_spill]] %s1552_s0  ;;  %v21_v0 = vstv %s1567_s15 }
   0x2   :  { %22 = vst [vmem:[#allocation2] sm:$0x1] %v21_v0 }
   0x3   :  { %23 = vsyncpa [#allocation4], 0  ;;  %s35_s25 = sshll.u32 %s1555_s3, 4  ;;  %s36_s25 = int_to_ptr.hbm [resolvable:$true] %s35_s25 }
   0x4   :  { %24 = vsyncpa [#allocation6], 0  ;;  %s1093_s26 = smov [#allocation3]   ;;  %s50_s30 = sshll.u32 %s1557_s5, 4  ;;  %s51_s30 = int_to_ptr.hbm [resolvable:$true] %s50_s30 }
   0x5   :  { %s37_s27 = sshll.u32 %s1093_s26, 4  ;;  %s1094_s0 = smov 256   ;;  %s38_s27 = int_to_ptr.vmem [resolvable:$true] %s37_s27 }
   0x6   :  { %s1095_s17 = smov 16   ;;  %s1096_s15 = smov [#allocation5]  }
   0x7   :  { %43 = dma.hbm_to_vmem [thread:$0]  %s36_s25, 15360, %s38_s27, [#allocation4], %s1094_s0, %s1094_s0, %s1095_s17  }
   0x8   :  { %s52_s18 = sshll.u32 %s1096_s15, 4  ;;  %s53_s18 = int_to_ptr.vmem [resolvable:$true] %s52_s18 }
   0x9   :  { %58 = dma.hbm_to_vmem [thread:$0]  %s51_s30, 12288, %s53_s18, [#allocation6], %s1094_s0, %s1094_s0, %s1095_s17  }
   0xa   :  { %1089 = dma.done.wait [#allocation4], 15360  }
   0xb   :  { %1090 = vsyncadd [#allocation4], 4294951936 }
   0xc   :  { %1091 = dma.done.wait [#allocation6], 12288  }
   0xd   :  { %1092 = vsyncadd [#allocation6], 4294955008  ;;  %v113_v1 = vlaneseq  ;;  %vm215_vm0 = vcmask 123904   ;;  %v1202_v4 = vld [vmem:[%s1553_s1] sm:$0x3]  ;;  %v264_v9 = vld [vmem:[#allocation3 + $0xe0] sm:$0xff] }
   0xe   :  { %v266_v5 = vld [vmem:[#allocation3 + $0xf0] sm:$0xff]  ;;  %v216_v7 = vsel %vm215_vm0, %v1202_v4, 0.0  ;;  %v296_v10 = vld [vmem:[#allocation3 + $0x1e0] sm:$0xff]  ;;  %v125_v14 = vperm.slane %v1202_v4, 1  ;;  %v112_v18 = vperm.slane %v1202_v4, 0  ;;  %v267_v59 = vld [vmem:[#allocation3 + $0xf8] sm:$0xff] }
   0xf   :  { %v1191_v2 = vshrl.u32 %v113_v1, 7  ;;  %v298_v6 = vld [vmem:[#allocation3 + $0x1f0] sm:$0xff]  ;;  %384 = vmatpush.msra.mxu0 %v266_v5  ;;  %217 = vadd.xlane.f32.xlu0 %v216_v7  ;;  %v328_v11 = vld [vmem:[#allocation3 + $0x2e0] sm:$0xff]  ;;  %v265_v63 = vld [vmem:[#allocation3 + $0xe8] sm:$0xff]  ;;  %s1571_s20 = sld [smem:[#allocation9_spill]]  ;;  %vm175_vm1 = vcmask 785408  }
  0x10   :  { %404 = vmatpush.msra.mxu1 %v298_v6  ;;  %v330_v8 = vld [vmem:[#allocation3 + $0x2f0] sm:$0xff]  ;;  %v352_v17 = vld [vmem:[#allocation3 + $0x3a0] sm:$0xff]  ;;  %v261_v7 = vld [vmem:[#allocation3 + $0xc8] sm:$0xff]  ;;  %vm371_vm2 = vcmask 1041409   ;;  %vm975_vm3 = vcmask 261120   ;;  %vm1005_vm4 = vcmask 254976  }
  0x11   :  { %v1194_v3 = vadd.s32 8, %v1191_v2  ;;  %1029 = vset.pattern.permute.xlu0 %v1191_v2  ;;  %424 = vmatpush.msra.mxu2 %v330_v8  ;;  %v354_v12 = vld [vmem:[#allocation3 + $0x3b0] sm:$0xff]  ;;  %v260_v19 = vld [vmem:[#allocation3 + $0xc0] sm:$0xff]  ;;  %v299_v8 = vld [vmem:[#allocation3 + $0x1f8] sm:$0xff]  ;;  %vm1014_vm5 = vcmask 1024  }
  0x12   :  { %v262_v13 = vld [vmem:[#allocation3 + $0xd0] sm:$0xff]  ;;  %385 = vmatpush.msra.mxu0 %v264_v9  ;;  %405 = vmatpush.msra.mxu1 %v296_v10  ;;  %v292_v20 = vld [vmem:[#allocation3 + $0x1c0] sm:$0xff]  ;;  %v331_v9 = vld [vmem:[#allocation3 + $0x2f8] sm:$0xff] }
  0x13   :  { %1030 = vset.pattern.permute.xlu1 %v1194_v3  ;;  %1032 = vset.pattern.permute.xlu2 %v1194_v3  ;;  %v294_v15 = vld [vmem:[#allocation3 + $0x1d0] sm:$0xff]  ;;  %v324_v21 = vld [vmem:[#allocation3 + $0x2c0] sm:$0xff]  ;;  %v355_v10 = vld [vmem:[#allocation3 + $0x3b8] sm:$0xff] }
  0x14   :  { %v326_v16 = vld [vmem:[#allocation3 + $0x2d0] sm:$0xff]  ;;  %425 = vmatpush.msra.mxu2 %v328_v11  ;;  %448 = vmatpush.msra.mxu3 %v354_v12  ;;  %v348_v26 = vld [vmem:[#allocation3 + $0x380] sm:$0xff]  ;;  %v259_v11 = vld [vmem:[#allocation3 + $0xb8] sm:$0xff] }
  0x15   :  { %386 = vmatpush.msra.mxu0 %v262_v13  ;;  %406 = vmatpush.msra.mxu1 %v294_v15  ;;  %v350_v22 = vld [vmem:[#allocation3 + $0x390] sm:$0xff]  ;;  %v256_v27 = vld [vmem:[#allocation3 + $0xa0] sm:$0xff]  ;;  %v297_v12 = vld [vmem:[#allocation3 + $0x1e8] sm:$0xff] }
  0x16   :  { %426 = vmatpush.msra.mxu2 %v326_v16  ;;  %449 = vmatpush.msra.mxu3 %v352_v17  ;;  %v258_v23 = vld [vmem:[#allocation3 + $0xb0] sm:$0xff]  ;;  %v288_v28 = vld [vmem:[#allocation3 + $0x1a0] sm:$0xff]  ;;  %v329_v13 = vld [vmem:[#allocation3 + $0x2e8] sm:$0xff] }
  0x17   :  { %v290_v24 = vld [vmem:[#allocation3 + $0x1b0] sm:$0xff]  ;;  %387 = vmatpush.msra.mxu0 %v260_v19  ;;  %407 = vmatpush.msra.mxu1 %v292_v20  ;;  %v320_v29 = vld [vmem:[#allocation3 + $0x2a0] sm:$0xff]  ;;  %v257_v15 = vld [vmem:[#allocation3 + $0xa8] sm:$0xff] }
  0x18   :  { %v322_v25 = vld [vmem:[#allocation3 + $0x2b0] sm:$0xff]  ;;  %427 = vmatpush.msra.mxu2 %v324_v21  ;;  %450 = vmatpush.msra.mxu3 %v350_v22  ;;  %v344_v34 = vld [vmem:[#allocation3 + $0x360] sm:$0xff]  ;;  %v295_v16 = vld [vmem:[#allocation3 + $0x1d8] sm:$0xff] }
  0x19   :  { %v346_v30 = vld [vmem:[#allocation3 + $0x370] sm:$0xff]  ;;  %388 = vmatpush.msra.mxu0 %v258_v23  ;;  %408 = vmatpush.msra.mxu1 %v290_v24  ;;  %v252_v35 = vld [vmem:[#allocation3 + $0x80] sm:$0xff]  ;;  %v327_v17 = vld [vmem:[#allocation3 + $0x2d8] sm:$0xff] }
  0x1a   :  { %428 = vmatpush.msra.mxu2 %v322_v25  ;;  %451 = vmatpush.msra.mxu3 %v348_v26  ;;  %v254_v31 = vld [vmem:[#allocation3 + $0x90] sm:$0xff]  ;;  %v284_v36 = vld [vmem:[#allocation3 + $0x180] sm:$0xff]  ;;  %v255_v19 = vld [vmem:[#allocation3 + $0x98] sm:$0xff] }
  0x1b   :  { %136 = vperm.xlu1 %1030, %v125_v14   ;;  %123 = vperm.xlu2 %1032, %v112_v18   ;;  %v286_v32 = vld [vmem:[#allocation3 + $0x190] sm:$0xff]  ;;  %v316_v37 = vld [vmem:[#allocation3 + $0x280] sm:$0xff]  ;;  %v293_v20 = vld [vmem:[#allocation3 + $0x1c8] sm:$0xff] }
  0x1c   :  { %389 = vmatpush.msra.mxu0 %v256_v27  ;;  %409 = vmatpush.msra.mxu1 %v288_v28  ;;  %v318_v33 = vld [vmem:[#allocation3 + $0x290] sm:$0xff]  ;;  %v340_v42 = vld [vmem:[#allocation3 + $0x340] sm:$0xff]  ;;  %v325_v21 = vld [vmem:[#allocation3 + $0x2c8] sm:$0xff] }
  0x1d   :  { %429 = vmatpush.msra.mxu2 %v320_v29  ;;  %452 = vmatpush.msra.mxu3 %v346_v30  ;;  %v342_v38 = vld [vmem:[#allocation3 + $0x350] sm:$0xff]  ;;  %v248_v43 = vld [vmem:[#allocation3 + $0x60] sm:$0xff]  ;;  %v349_v22 = vld [vmem:[#allocation3 + $0x388] sm:$0xff] }
  0x1e   :  { %390 = vmatpush.msra.mxu0 %v254_v31  ;;  %410 = vmatpush.msra.mxu1 %v286_v32  ;;  %v250_v39 = vld [vmem:[#allocation3 + $0x70] sm:$0xff]  ;;  %v280_v44 = vld [vmem:[#allocation3 + $0x160] sm:$0xff]  ;;  %v253_v23 = vld [vmem:[#allocation3 + $0x88] sm:$0xff] }
  0x1f   :  { %430 = vmatpush.msra.mxu2 %v318_v33  ;;  %453 = vmatpush.msra.mxu3 %v344_v34  ;;  %v282_v40 = vld [vmem:[#allocation3 + $0x170] sm:$0xff]  ;;  %v312_v45 = vld [vmem:[#allocation3 + $0x260] sm:$0xff]  ;;  %v291_v24 = vld [vmem:[#allocation3 + $0x1b8] sm:$0xff] }
  0x20   :  { %391 = vmatpush.msra.mxu0 %v252_v35  ;;  %411 = vmatpush.msra.mxu1 %v284_v36  ;;  %v314_v41 = vld [vmem:[#allocation3 + $0x270] sm:$0xff]  ;;  %v336_v50 = vld [vmem:[#allocation3 + $0x320] sm:$0xff]  ;;  %v323_v25 = vld [vmem:[#allocation3 + $0x2b8] sm:$0xff] }
  0x21   :  { %431 = vmatpush.msra.mxu2 %v316_v37  ;;  %454 = vmatpush.msra.mxu3 %v342_v38  ;;  %v338_v46 = vld [vmem:[#allocation3 + $0x330] sm:$0xff]  ;;  %v244_v51 = vld [vmem:[#allocation3 + $0x40] sm:$0xff]  ;;  %v347_v26 = vld [vmem:[#allocation3 + $0x378] sm:$0xff] }
  0x22   :  { %392 = vmatpush.msra.mxu0 %v250_v39  ;;  %412 = vmatpush.msra.mxu1 %v282_v40  ;;  %v246_v47 = vld [vmem:[#allocation3 + $0x50] sm:$0xff]  ;;  %v276_v52 = vld [vmem:[#allocation3 + $0x140] sm:$0xff]  ;;  %v251_v27 = vld [vmem:[#allocation3 + $0x78] sm:$0xff] }
  0x23   :  { %1031 = vset.pattern.permute.xlu1 %v1191_v2  ;;  %130 = vperm.xlu0 %1029, %v125_v14   ;;  %v278_v48 = vld [vmem:[#allocation3 + $0x150] sm:$0xff]  ;;  %v308_v53 = vld [vmem:[#allocation3 + $0x240] sm:$0xff]  ;;  %v353_v14 = vld [vmem:[#allocation3 + $0x3a8] sm:$0xff] }
  0x24   :  { %432 = vmatpush.msra.mxu2 %v314_v41  ;;  %455 = vmatpush.msra.mxu3 %v340_v42  ;;  %v310_v49 = vld [vmem:[#allocation3 + $0x250] sm:$0xff]  ;;  %v332_v58 = vld [vmem:[#allocation3 + $0x300] sm:$0xff]  ;;  %v289_v28 = vld [vmem:[#allocation3 + $0x1a8] sm:$0xff] }
  0x25   :  { %393 = vmatpush.msra.mxu0 %v248_v43  ;;  %413 = vmatpush.msra.mxu1 %v280_v44  ;;  %v334_v54 = vld [vmem:[#allocation3 + $0x310] sm:$0xff]  ;;  %v240_v60 = vld [vmem:[#allocation3 + $0x20] sm:$0xff]  ;;  %v321_v29 = vld [vmem:[#allocation3 + $0x2a8] sm:$0xff] }
  0x26   :  { %433 = vmatpush.msra.mxu2 %v312_v45  ;;  %456 = vmatpush.msra.mxu3 %v338_v46  ;;  %v242_v55 = vld [vmem:[#allocation3 + $0x30] sm:$0xff]  ;;  %v272_v61 = vld [vmem:[#allocation3 + $0x120] sm:$0xff]  ;;  %v345_v30 = vld [vmem:[#allocation3 + $0x368] sm:$0xff] }
  0x27   :  { %394 = vmatpush.msra.mxu0 %v246_v47  ;;  %414 = vmatpush.msra.mxu1 %v278_v48  ;;  %v274_v56 = vld [vmem:[#allocation3 + $0x130] sm:$0xff]  ;;  %v304_v62 = vld [vmem:[#allocation3 + $0x220] sm:$0xff]  ;;  %v249_v31 = vld [vmem:[#allocation3 + $0x68] sm:$0xff] }
  0x28   :  { %434 = vmatpush.msra.mxu2 %v310_v49  ;;  %457 = vmatpush.msra.mxu3 %v336_v50  ;;  %v306_v57 = vld [vmem:[#allocation3 + $0x230] sm:$0xff]  ;;  %v236_v4 = vld [vmem:[#allocation3] sm:$0xff]  ;;  %v287_v32 = vld [vmem:[#allocation3 + $0x198] sm:$0xff] }
  0x29   :  { %395 = vmatpush.msra.mxu0 %v244_v51  ;;  %415 = vmatpush.msra.mxu1 %v276_v52  ;;  %v238_v0 = vld [vmem:[#allocation3 + $0x10] sm:$0xff]  ;;  %v268_v5 = vld [vmem:[#allocation3 + $0x100] sm:$0xff]  ;;  %v319_v33 = vld [vmem:[#allocation3 + $0x298] sm:$0xff] }
  0x2a   :  { %435 = vmatpush.msra.mxu2 %v308_v53  ;;  %458 = vmatpush.msra.mxu3 %v334_v54  ;;  %v270_v1 = vld [vmem:[#allocation3 + $0x110] sm:$0xff]  ;;  %v300_v6 = vld [vmem:[#allocation3 + $0x200] sm:$0xff]  ;;  %v343_v35 = vld [vmem:[#allocation3 + $0x358] sm:$0xff] }
  0x2b   :  { %117 = vperm.xlu1 %1031, %v112_v18   ;;  %1033 = vset.pattern.permute.xlu0 %v1194_v3  ;;  %v302_v2 = vld [vmem:[#allocation3 + $0x210] sm:$0xff]  ;;  %v263_v3 = vld [vmem:[#allocation3 + $0xd8] sm:$0xff]  ;;  %v285_v37 = vld [vmem:[#allocation3 + $0x188] sm:$0xff] }
  0x2c   :  { %396 = vmatpush.msra.mxu0 %v242_v55  ;;  %416 = vmatpush.msra.mxu1 %v274_v56  ;;  %v351_v18 = vld [vmem:[#allocation3 + $0x398] sm:$0xff]  ;;  %v317_v39 = vld [vmem:[#allocation3 + $0x288] sm:$0xff] }
  0x2d   :  { %436 = vmatpush.msra.mxu2 %v306_v57  ;;  %459 = vmatpush.msra.mxu3 %v332_v58  ;;  %v247_v36 = vld [vmem:[#allocation3 + $0x58] sm:$0xff]  ;;  %v341_v40 = vld [vmem:[#allocation3 + $0x348] sm:$0xff] }
  0x2e   :  { %397 = vmatpush.msra.mxu0 %v240_v60  ;;  %417 = vmatpush.msra.mxu1 %v272_v61  ;;  %v245_v41 = vld [vmem:[#allocation3 + $0x48] sm:$0xff]  ;;  %v283_v42 = vld [vmem:[#allocation3 + $0x178] sm:$0xff] }
  0x2f   :  { %464 = vmatpush.msrb.mxu3 %v267_v59  ;;  %437 = vmatpush.msra.mxu2 %v304_v62  ;;  %v315_v43 = vld [vmem:[#allocation3 + $0x278] sm:$0xff]  ;;  %v281_v46 = vld [vmem:[#allocation3 + $0x168] sm:$0xff] }
  0x30   :  { %398 = vmatpush.msra.mxu0 %v238_v0  ;;  %418 = vmatpush.msra.mxu1 %v270_v1  ;;  %v339_v44 = vld [vmem:[#allocation3 + $0x338] sm:$0xff]  ;;  %v313_v47 = vld [vmem:[#allocation3 + $0x268] sm:$0xff] }
  0x31   :  { %465 = vmatpush.msrb.mxu3 %v265_v63  ;;  %438 = vmatpush.msra.mxu2 %v302_v2  ;;  %v243_v45 = vld [vmem:[#allocation3 + $0x38] sm:$0xff]  ;;  %v337_v48 = vld [vmem:[#allocation3 + $0x328] sm:$0xff] }
  0x32   :  { %399 = vmatpush.msra.mxu0 %v236_v4  ;;  %419 = vmatpush.msra.mxu1 %v268_v5  ;;  %v241_v49 = vld [vmem:[#allocation3 + $0x28] sm:$0xff]  ;;  %v279_v50 = vld [vmem:[#allocation3 + $0x158] sm:$0xff] }
  0x33   :  { %466 = vmatpush.msrb.mxu3 %v263_v3  ;;  %439 = vmatpush.msra.mxu2 %v300_v6  ;;  %v311_v51 = vld [vmem:[#allocation3 + $0x258] sm:$0xff]  ;;  %v1212_v52 = vld [vmem:[%s1571_s20 + $0x18] sm:$0xff]  ;;  %v89_v59 = vld [vmem:[%s1571_s20 + $0x10] sm:$0xff] }
  0x34   :  { %484 = vmatpush.msrb.mxu0 %v299_v8  ;;  %504 = vmatpush.msrb.mxu1 %v331_v9  ;;  %v335_v53 = vld [vmem:[#allocation3 + $0x318] sm:$0xff]  ;;  %v1217_v55 = vld [vmem:[%s1571_s20 + $0x38] sm:$0xff]  ;;  %v93_v62 = vld [vmem:[%s1571_s20 + $0x30] sm:$0xff]  ;;  %v102_v63 = vunpack.c.h.bf16 %v1212_v52  ;;  %v99_v8 = vunpack.c.l.bf16 %v89_v59 }
  0x35   :  { %467 = vmatpush.msrb.mxu3 %v261_v7  ;;  %528 = vmatpush.msrb.mxu2 %v355_v10  ;;  %v239_v54 = vld [vmem:[#allocation3 + $0x18] sm:$0xff]  ;;  %v277_v56 = vld [vmem:[#allocation3 + $0x148] sm:$0xff]  ;;  %v110_v0 = vunpack.c.h.bf16 %v1217_v55  ;;  %v107_v9 = vunpack.c.l.bf16 %v93_v62  ;;  %v108_v10 = vunpack.c.h.bf16 %v93_v62 }
  0x36   :  { %485 = vmatpush.msrb.mxu0 %v297_v12  ;;  %505 = vmatpush.msrb.mxu1 %v329_v13  ;;  %v309_v57 = vld [vmem:[#allocation3 + $0x248] sm:$0xff]  ;;  %v275_v3 = vld [vmem:[#allocation3 + $0x138] sm:$0xff] }
  0x37   :  { %468 = vmatpush.msrb.mxu3 %v259_v11  ;;  %529 = vmatpush.msrb.mxu2 %v353_v14  ;;  %v333_v60 = vld [vmem:[#allocation3 + $0x308] sm:$0xff]  ;;  %v307_v4 = vld [vmem:[#allocation3 + $0x238] sm:$0xff]  ;;  %v109_v14 = vunpack.c.l.bf16 %v1217_v55 }
  0x38   :  { %486 = vmatpush.msrb.mxu0 %v295_v16  ;;  %506 = vmatpush.msrb.mxu1 %v327_v17  ;;  %v237_v2 = vld [vmem:[#allocation3 + $0x8] sm:$0xff]  ;;  %v91_v7 = vld [vmem:[%s1571_s20 + $0x20] sm:$0xff]  ;;  %v92_v11 = vld [vmem:[%s1571_s20 + $0x28] sm:$0xff]  ;;  %v101_v16 = vunpack.c.l.bf16 %v1212_v52 }
  0x39   :  { %469 = vmatpush.msrb.mxu3 %v257_v15  ;;  %530 = vmatpush.msrb.mxu2 %v351_v18  ;;  %v273_v12 = vld [vmem:[#allocation3 + $0x128] sm:$0xff]  ;;  %v100_v15 = vunpack.c.h.bf16 %v89_v59  ;;  %v87_v18 = vld [vmem:[%s1571_s20] sm:$0xff] }
  0x3a   :  { %487 = vmatpush.msrb.mxu0 %v293_v20  ;;  %507 = vmatpush.msrb.mxu1 %v325_v21  ;;  %v305_v13 = vld [vmem:[#allocation3 + $0x228] sm:$0xff] }
  0x3b   :  { %470 = vmatpush.msrb.mxu3 %v255_v19  ;;  %531 = vmatpush.msrb.mxu2 %v349_v22  ;;  %v88_v19 = vld [vmem:[%s1571_s20 + $0x8] sm:$0xff]  ;;  %v103_v22 = vunpack.c.l.bf16 %v91_v7 }
  0x3c   :  { %488 = vmatpush.msrb.mxu0 %v291_v24  ;;  %508 = vmatpush.msrb.mxu1 %v323_v25  ;;  %v303_v24 = vld [vmem:[#allocation3 + $0x218] sm:$0xff]  ;;  %v104_v25 = vunpack.c.h.bf16 %v91_v7 }
  0x3d   :  { %471 = vmatpush.msrb.mxu3 %v253_v23  ;;  %532 = vmatpush.msrb.mxu2 %v347_v26  ;;  %v271_v23 = vld [vmem:[#allocation3 + $0x118] sm:$0xff]  ;;  %v105_v26 = vunpack.c.l.bf16 %v92_v11 }
  0x3e   :  { %489 = vmatpush.msrb.mxu0 %v289_v28  ;;  %509 = vmatpush.msrb.mxu1 %v321_v29  ;;  %v95_v29 = vunpack.c.l.bf16 %v87_v18 }
  0x3f   :  { %472 = vmatpush.msrb.mxu3 %v251_v27  ;;  %533 = vmatpush.msrb.mxu2 %v345_v30  ;;  %v106_v27 = vunpack.c.h.bf16 %v92_v11  ;;  %v96_v30 = vunpack.c.h.bf16 %v87_v18 }
  0x40   :  { %490 = vmatpush.msrb.mxu0 %v287_v32  ;;  %510 = vmatpush.msrb.mxu1 %v319_v33  ;;  %v98_v32 = vunpack.c.h.bf16 %v88_v19  ;;  %v269_v33 = vld [vmem:[#allocation3 + $0x108] sm:$0xff] }
  0x41   :  { %473 = vmatpush.msrb.mxu3 %v249_v31  ;;  %534 = vmatpush.msrb.mxu2 %v343_v35  ;;  %v97_v31 = vunpack.c.l.bf16 %v88_v19 }
  0x42   :  { %491 = vmatpush.msrb.mxu0 %v285_v37  ;;  %511 = vmatpush.msrb.mxu1 %v317_v39 }
  0x43   :  { %474 = vmatpush.msrb.mxu3 %v247_v36  ;;  %535 = vmatpush.msrb.mxu2 %v341_v40 }
  0x44   :  { %492 = vmatpush.msrb.mxu0 %v283_v42  ;;  %512 = vmatpush.msrb.mxu1 %v315_v43 }
  0x45   :  { %475 = vmatpush.msrb.mxu3 %v245_v41  ;;  %536 = vmatpush.msrb.mxu2 %v339_v44 }
  0x46   :  { %493 = vmatpush.msrb.mxu0 %v281_v46  ;;  %513 = vmatpush.msrb.mxu1 %v313_v47 }
  0x47   :  { %476 = vmatpush.msrb.mxu3 %v243_v45  ;;  %537 = vmatpush.msrb.mxu2 %v337_v48 }
  0x48   :  { %494 = vmatpush.msrb.mxu0 %v279_v50  ;;  %514 = vmatpush.msrb.mxu1 %v311_v51 }
  0x49   :  { %477 = vmatpush.msrb.mxu3 %v241_v49  ;;  %538 = vmatpush.msrb.mxu2 %v335_v53 }
  0x4a   :  { %495 = vmatpush.msrb.mxu0 %v277_v56  ;;  %515 = vmatpush.msrb.mxu1 %v309_v57 }
  0x4b   :  { %478 = vmatpush.msrb.mxu3 %v239_v54  ;;  %539 = vmatpush.msrb.mxu2 %v333_v60 }
  0x4c   :  { %496 = vmatpush.msrb.mxu0 %v275_v3  ;;  %516 = vmatpush.msrb.mxu1 %v307_v4 }
  0x4d   :  { %479 = vmatpush.msrb.mxu3 %v237_v2 }
  0x4e   :  { %497 = vmatpush.msrb.mxu0 %v273_v12  ;;  %517 = vmatpush.msrb.mxu1 %v305_v13 }
  0x50   :  { %498 = vmatpush.msrb.mxu0 %v271_v23  ;;  %518 = vmatpush.msrb.mxu1 %v303_v24 }
  0x52   :  { %499 = vmatpush.msrb.mxu0 %v269_v33 }
  0x75   :  { %v124_v1 = vpop.permute.xlu2 %123 }
  0x76   :  { %v145_v17 = vmul.f32 %v124_v1, %v102_v63  ;;  %v142_v28 = vmul.f32 %v124_v1, %v99_v8  ;;  %v143_v36 = vmul.f32 %v124_v1, %v100_v15  ;;  %v144_v37 = vmul.f32 %v124_v1, %v101_v16 }
  0x82   :  { %v218_v34 = vpop.xlane.xlu0 %217 }
  0x83   :  { %v219_v38 = vmax.f32 %v218_v34, 1.0  ;;  %v301_v34 = vld [vmem:[#allocation3 + $0x208] sm:$0xff] }
  0x84   :  { %519 = vmatpush.msrb.mxu1 %v301_v34 }
  0x85   :  { %1039 = vrcp.f32 %v219_v38 }
  0x8b   :  { %v1040_v58 = vpop.eup %1039 }
  0x8c   :  { %v221_v61 = vmul.f32 %v1040_v58, %v219_v38  ;;  %v177_v38 = vsel %vm175_vm1, %v145_v17, 0.0 }
  0x8d   :  { %v137_v6 = vpop.permute.xlu1 %136 }
  0x8e   :  { %v222_v5 = vsub.f32 2.0, %v221_v61  ;;  %v153_v21 = vmul.f32 %v137_v6, %v110_v0  ;;  %v150_v35 = vmul.f32 %v137_v6, %v107_v9  ;;  %v151_v39 = vmul.f32 %v137_v6, %v108_v10 }
  0x8f   :  { %v152_v40 = vmul.f32 %v137_v6, %v109_v14 }
  0x90   :  { %v1241_v20 = vmul.f32 %v1040_v58, %v222_v5  ;;  %v207_v42 = vsel %vm175_vm1, %v153_v21, 0.0 }
  0x92   :  { %v1246_v43 = vrot.slane %v1241_v20, 1 }
  0x95   :  { %v131_v41 = vpop.permute.xlu0 %130 }
  0x96   :  { %v146_v44 = vmul.f32 %v131_v41, %v103_v22  ;;  %v147_v45 = vmul.f32 %v131_v41, %v104_v25  ;;  %v148_v46 = vmul.f32 %v131_v41, %v105_v26  ;;  %v149_v47 = vmul.f32 %v131_v41, %v106_v27 }
  0x98   :  { %v185_v53 = vadd.f32 %v150_v35, %v146_v44  ;;  %v192_v54 = vadd.f32 %v151_v39, %v147_v45  ;;  %v199_v55 = vadd.f32 %v152_v40, %v148_v46  ;;  %v206_v56 = vsel %vm175_vm1, %v149_v47, 0.0 }
  0x99   :  { %v208_v57 = vadd.f32 %v207_v42, %v206_v56  ;;  %v544_v42 = vld [vmem:[%s1554_s2] sm:$0x3f] }
  0x9a   :  { %v186_v61 = vrot.slane %v185_v53, 4  ;;  %v193_v62 = vrot.slane %v192_v54, 4  ;;  %v200_v63 = vrot.slane %v199_v55, 4  ;;  %648 = vst [vmem:[#allocation1] ss:$4 sm:$0xff] %v544_v42  ;;  %v617_v42 = vld [vmem:[#allocation5 + $0x240] sm:$0xff] }
  0x9b   :  { %v209_v1 = vrot.slane %v208_v57, 4 }
  0x9c   :  { %v187_v5 = vadd.f32 %v186_v61, %v185_v53  ;;  %v194_v6 = vadd.f32 %v193_v62, %v192_v54  ;;  %v201_v7 = vadd.f32 %v200_v63, %v199_v55  ;;  %v639_v61 = vld [vmem:[#allocation5 + $0x2f0] sm:$0xff] }
  0x9d   :  { %v118_v48 = vpop.permute.xlu1 %117  ;;  %v210_v9 = vadd.f32 %v209_v1, %v208_v57  ;;  %v575_v1 = vld [vmem:[#allocation5 + $0xf0] sm:$0xff] }
  0x9e   :  { %v138_v49 = vmul.f32 %v118_v48, %v95_v29  ;;  %v139_v50 = vmul.f32 %v118_v48, %v96_v30  ;;  %v140_v51 = vmul.f32 %v118_v48, %v97_v31  ;;  %v141_v52 = vmul.f32 %v118_v48, %v98_v32 }
  0x9f   :  { %v188_v13 = vrot.slane %v187_v5, 2  ;;  %v195_v14 = vrot.slane %v194_v6, 2  ;;  %v202_v15 = vrot.slane %v201_v7, 2  ;;  %v211_v17 = vrot.slane %v210_v9, 2 }
  0xa0   :  { %v154_v58 = vadd.f32 %v142_v28, %v138_v49  ;;  %v161_v59 = vadd.f32 %v143_v36, %v139_v50  ;;  %v168_v60 = vadd.f32 %v144_v37, %v140_v51  ;;  %v176_v0 = vsel %vm175_vm1, %v141_v52, 0.0 }
  0xa1   :  { %v178_v8 = vadd.f32 %v177_v38, %v176_v0  ;;  %v189_v23 = vadd.f32 %v188_v13, %v187_v5  ;;  %v196_v24 = vadd.f32 %v195_v14, %v194_v6  ;;  %v203_v25 = vadd.f32 %v202_v15, %v201_v7  ;;  %v573_v5 = vld [vmem:[#allocation5 + $0xe0] sm:$0xff]  ;;  %v635_v7 = vld [vmem:[#allocation5 + $0x2d0] sm:$0xff] }
  0xa2   :  { %v155_v2 = vrot.slane %v154_v58, 4  ;;  %v162_v3 = vrot.slane %v161_v59, 4  ;;  %v169_v4 = vrot.slane %v168_v60, 4  ;;  %v212_v26 = vadd.f32 %v211_v17, %v210_v9  ;;  %v605_v6 = vld [vmem:[#allocation5 + $0x1e0] sm:$0xff]  ;;  %v603_v9 = vld [vmem:[#allocation5 + $0x1d0] sm:$0xff] }
  0xa3   :  { %v179_v16 = vrot.slane %v178_v8, 4  ;;  %v190_v31 = vrot.slane %v189_v23, 1  ;;  %v197_v32 = vrot.slane %v196_v24, 1  ;;  %v204_v33 = vrot.slane %v203_v25, 1  ;;  %v601_v13 = vld [vmem:[#allocation5 + $0x1c0] sm:$0xff]  ;;  %v631_v14 = vld [vmem:[#allocation5 + $0x2b0] sm:$0xff] }
  0xa4   :  { %v156_v10 = vadd.f32 %v155_v2, %v154_v58  ;;  %v163_v11 = vadd.f32 %v162_v3, %v161_v59  ;;  %v170_v12 = vadd.f32 %v169_v4, %v168_v60  ;;  %v213_v37 = vrot.slane %v212_v26, 1  ;;  %v607_v3 = vld [vmem:[#allocation5 + $0x1f0] sm:$0xff]  ;;  %v637_v4 = vld [vmem:[#allocation5 + $0x2e0] sm:$0xff] }
  0xa5   :  { %v180_v22 = vadd.f32 %v179_v16, %v178_v8  ;;  %v191_v38 = vadd.f32 %v190_v31, %v189_v23  ;;  %v198_v39 = vadd.f32 %v197_v32, %v196_v24  ;;  %v205_v40 = vadd.f32 %v204_v33, %v203_v25  ;;  %v571_v8 = vld [vmem:[#allocation5 + $0xd0] sm:$0xff]  ;;  %v565_v15 = vld [vmem:[#allocation5 + $0xa0] sm:$0xff]  ;;  %v572_v23 = vld [vmem:[#allocation5 + $0xd8] sm:$0xff] }
  0xa6   :  { %v157_v18 = vrot.slane %v156_v10, 2  ;;  %v164_v19 = vrot.slane %v163_v11, 2  ;;  %v171_v21 = vrot.slane %v170_v12, 2  ;;  %v214_v47 = vadd.f32 %v213_v37, %v212_v26  ;;  %v599_v16 = vld [vmem:[#allocation5 + $0x1b0] sm:$0xff]  ;;  %v629_v17 = vld [vmem:[#allocation5 + $0x2a0] sm:$0xff]  ;;  %v568_v31 = vld [vmem:[#allocation5 + $0xb8] sm:$0xff] }
  0xa7   :  { %v181_v30 = vrot.slane %v180_v22, 2  ;;  %v232_v48 = vmul.f32 %v1246_v43, %v191_v38  ;;  %v233_v49 = vmul.f32 %v1246_v43, %v198_v39  ;;  %v234_v50 = vmul.f32 %v1246_v43, %v205_v40  ;;  %v561_v24 = vld [vmem:[#allocation5 + $0x80] sm:$0xff]  ;;  %v595_v25 = vld [vmem:[#allocation5 + $0x190] sm:$0xff]  ;;  %v564_v39 = vld [vmem:[#allocation5 + $0x98] sm:$0xff] }
  0xa8   :  { %v158_v27 = vadd.f32 %v157_v18, %v156_v10  ;;  %v165_v28 = vadd.f32 %v164_v19, %v163_v11  ;;  %v172_v29 = vadd.f32 %v171_v21, %v170_v12  ;;  %v235_v55 = vmul.f32 %v1246_v43, %v214_v47  ;;  %v576_v10 = vld [vmem:[#allocation5 + $0xf8] sm:$0xff]  ;;  %v569_v11 = vld [vmem:[#allocation5 + $0xc0] sm:$0xff]  ;;  %v567_v12 = vld [vmem:[#allocation5 + $0xb0] sm:$0xff] }
  0xa9   :  { %v182_v41 = vadd.f32 %v181_v30, %v180_v22  ;;  %v370_v56 = vrot.slane %v232_v48, 7  ;;  %v373_v57 = vrot.slane %v233_v49, 7  ;;  %v375_v58 = vrot.slane %v234_v50, 7  ;;  %v574_v18 = vld [vmem:[#allocation5 + $0xe8] sm:$0xff]  ;;  %v563_v19 = vld [vmem:[#allocation5 + $0x90] sm:$0xff]  ;;  %v597_v21 = vld [vmem:[#allocation5 + $0x1a0] sm:$0xff] }
  0xaa   :  { %v159_v34 = vrot.slane %v158_v27, 1  ;;  %v166_v35 = vrot.slane %v165_v28, 1  ;;  %v173_v36 = vrot.slane %v172_v29, 1  ;;  %v377_v60 = vrot.slane %v235_v55, 7  ;;  %v627_v22 = vld [vmem:[#allocation5 + $0x290] sm:$0xff]  ;;  %v625_v26 = vld [vmem:[#allocation5 + $0x280] sm:$0xff] }
  0xab   :  { %v183_v51 = vrot.slane %v182_v41, 1  ;;  %v623_v30 = vld [vmem:[#allocation5 + $0x270] sm:$0xff]  ;;  %v557_v32 = vld [vmem:[#allocation5 + $0x60] sm:$0xff]  ;;  %v560_v48 = vld [vmem:[#allocation5 + $0x78] sm:$0xff] }
  0xac   :  { %v160_v44 = vadd.f32 %v159_v34, %v158_v27  ;;  %v167_v45 = vadd.f32 %v166_v35, %v165_v28  ;;  %v174_v46 = vadd.f32 %v173_v36, %v172_v29  ;;  %v570_v27 = vld [vmem:[#allocation5 + $0xc8] sm:$0xff]  ;;  %v559_v28 = vld [vmem:[#allocation5 + $0x70] sm:$0xff]  ;;  %v593_v29 = vld [vmem:[#allocation5 + $0x180] sm:$0xff] }
  0xad   :  { %v184_v59 = vadd.f32 %v183_v51, %v182_v41  ;;  %v591_v33 = vld [vmem:[#allocation5 + $0x170] sm:$0xff]  ;;  %v621_v34 = vld [vmem:[#allocation5 + $0x260] sm:$0xff]  ;;  %v566_v35 = vld [vmem:[#allocation5 + $0xa8] sm:$0xff] }
  0xae   :  { %v228_v52 = vmul.f32 %v1241_v20, %v160_v44  ;;  %v229_v53 = vmul.f32 %v1241_v20, %v167_v45  ;;  %v230_v54 = vmul.f32 %v1241_v20, %v174_v46  ;;  %v555_v36 = vld [vmem:[#allocation5 + $0x50] sm:$0xff]  ;;  %v589_v37 = vld [vmem:[#allocation5 + $0x160] sm:$0xff]  ;;  %v562_v44 = vld [vmem:[#allocation5 + $0x88] sm:$0xff] }
  0xaf   :  { %v231_v2 = vmul.f32 %v1241_v20, %v184_v59  ;;  %v633_v20 = vld [vmem:[#allocation5 + $0x2c0] sm:$0xff]  ;;  %v619_v38 = vld [vmem:[#allocation5 + $0x250] sm:$0xff] }
  0xb0   :  { %v372_v62 = vsel %vm371_vm2, %v370_v56, %v228_v52  ;;  %v374_v63 = vsel %vm371_vm2, %v373_v57, %v229_v53  ;;  %v376_v0 = vsel %vm371_vm2, %v375_v58, %v230_v54  ;;  %v553_v40 = vld [vmem:[#allocation5 + $0x40] sm:$0xff]  ;;  %v587_v41 = vld [vmem:[#allocation5 + $0x150] sm:$0xff]  ;;  %v558_v52 = vld [vmem:[#allocation5 + $0x68] sm:$0xff] }
  0xb1   :  { %400 = vmatmul.f32.vlgmr.msra.gmra.mxu0 %v372_v62  ;;  %420 = vmatmul.f32.vlgmr.msra.gmra.mxu1 %v374_v63  ;;  %v378_v43 = vsel %vm371_vm2, %v377_v60, %v231_v2  ;;  %v551_v45 = vld [vmem:[#allocation5 + $0x30] sm:$0xff]  ;;  %v585_v46 = vld [vmem:[#allocation5 + $0x140] sm:$0xff]  ;;  %v556_v56 = vld [vmem:[#allocation5 + $0x58] sm:$0xff] }
  0xb2   :  { %440 = vmatmul.f32.vlgmr.msra.gmra.mxu2 %v376_v0  ;;  %695 = vmatpush.msra.mxu0 %v639_v61  ;;  %v615_v47 = vld [vmem:[#allocation5 + $0x230] sm:$0xff]  ;;  %v549_v49 = vld [vmem:[#allocation5 + $0x20] sm:$0xff]  ;;  %v608_v61 = vld [vmem:[#allocation5 + $0x1f8] sm:$0xff] }
  0xb3   :  { %655 = vmatpush.msra.mxu2 %v575_v1  ;;  %1022 = vmatmul.msk.f32.vlgmr.msra.gmra.mxu3 %vm175_vm1, %v378_v43  ;;  %v583_v50 = vld [vmem:[#allocation5 + $0x130] sm:$0xff]  ;;  %v613_v51 = vld [vmem:[#allocation5 + $0x220] sm:$0xff]  ;;  %v606_v1 = vld [vmem:[#allocation5 + $0x1e8] sm:$0xff] }
  0xb4   :  { %675 = vmatpush.msra.mxu3 %v607_v3  ;;  %696 = vmatpush.msra.mxu0 %v637_v4  ;;  %v547_v53 = vld [vmem:[#allocation5 + $0x10] sm:$0xff]  ;;  %v581_v54 = vld [vmem:[#allocation5 + $0x120] sm:$0xff]  ;;  %v640_v2 = vld [vmem:[#allocation5 + $0x2f8] sm:$0xff] }
  0xb5   :  { %656 = vmatpush.msra.mxu2 %v573_v5  ;;  %715 = vmatpush.msra.mxu1 %v576_v10  ;;  %v611_v55 = vld [vmem:[#allocation5 + $0x210] sm:$0xff]  ;;  %v545_v57 = vld [vmem:[#allocation5] sm:$0xff]  ;;  %v554_v3 = vld [vmem:[#allocation5 + $0x48] sm:$0xff] }
  0xb6   :  { %676 = vmatpush.msra.mxu3 %v605_v6  ;;  %697 = vmatpush.msra.mxu0 %v635_v7  ;;  %v579_v58 = vld [vmem:[#allocation5 + $0x110] sm:$0xff]  ;;  %v609_v60 = vld [vmem:[#allocation5 + $0x200] sm:$0xff]  ;;  %v604_v4 = vld [vmem:[#allocation5 + $0x1d8] sm:$0xff] }
  0xb7   :  { %657 = vmatpush.msra.mxu2 %v571_v8  ;;  %716 = vmatpush.msra.mxu1 %v574_v18  ;;  %v649_v59 = vld.sshfl [vmem:[#allocation1] sm:$0xff pattern:$0x73625140]  ;;  %v602_v6 = vld [vmem:[#allocation5 + $0x1c8] sm:$0xff] }
  0xb8   :  { %677 = vmatpush.msra.mxu3 %v603_v9  ;;  %698 = vmatpush.msra.mxu0 %v633_v20  ;;  %v552_v5 = vld [vmem:[#allocation5 + $0x38] sm:$0xff]  ;;  %v550_v8 = vld [vmem:[#allocation5 + $0x28] sm:$0xff] }
  0xb9   :  { %658 = vmatpush.msra.mxu2 %v569_v11  ;;  %500 = vmatmul.f32.vlgmr.msrb.gmra.mxu0 %v374_v63  ;;  %v1267_v63 = vld.sshfl [vmem:[#allocation1 + $0x8] sm:$0xff pattern:$0x73625140]  ;;  %v634_v20 = vld [vmem:[#allocation5 + $0x2c8] sm:$0xff] }
  0xba   :  { %520 = vmatmul.f32.vlgmr.msrb.gmra.mxu1 %v376_v0  ;;  %1023 = vmatmul.msk.f32.vlgmr.msrb.gmra.mxu2 %vm175_vm1, %v378_v43  ;;  %v1269_v0 = vld.sshfl [vmem:[#allocation1 + $0x10] sm:$0xff pattern:$0x73625140]  ;;  %v636_v7 = vld [vmem:[#allocation5 + $0x2d8] sm:$0xff]  ;;  %v792_v18 = vld [vmem:[%s1559_s7 + $0x78] sm:$0xff] }
  0xbb   :  { %659 = vmatpush.msra.mxu2 %v567_v12  ;;  %678 = vmatpush.msra.mxu3 %v601_v13  ;;  %v638_v43 = vld [vmem:[#allocation5 + $0x2e8] sm:$0xff]  ;;  %v600_v9 = vld [vmem:[#allocation5 + $0x1b8] sm:$0xff] }
  0xbc   :  { %480 = vmatmul.f32.vlgmr.msrb.gmra.mxu3 %v372_v62  ;;  %699 = vmatpush.msra.mxu0 %v631_v14  ;;  %v577_v62 = vld [vmem:[#allocation5 + $0x100] sm:$0xff]  ;;  %v548_v10 = vld [vmem:[#allocation5 + $0x18] sm:$0xff]  ;;  %v598_v11 = vld [vmem:[#allocation5 + $0x1a8] sm:$0xff] }
  0xbd   :  { %660 = vmatpush.msra.mxu2 %v565_v15  ;;  %679 = vmatpush.msra.mxu3 %v599_v16  ;;  %v632_v12 = vld [vmem:[#allocation5 + $0x2b8] sm:$0xff]  ;;  %v546_v13 = vld [vmem:[#allocation5 + $0x8] sm:$0xff] }
  0xbe   :  { %700 = vmatpush.msra.mxu0 %v629_v17  ;;  %717 = vmatpush.msra.mxu1 %v572_v23  ;;  %v596_v14 = vld [vmem:[#allocation5 + $0x198] sm:$0xff]  ;;  %v630_v15 = vld [vmem:[#allocation5 + $0x2a8] sm:$0xff] }
  0xbf   :  { %661 = vmatpush.msra.mxu2 %v563_v19  ;;  %680 = vmatpush.msra.mxu3 %v597_v21  ;;  %v594_v16 = vld [vmem:[#allocation5 + $0x188] sm:$0xff]  ;;  %v628_v17 = vld [vmem:[#allocation5 + $0x298] sm:$0xff] }
  0xc0   :  { %701 = vmatpush.msra.mxu0 %v627_v22  ;;  %718 = vmatpush.msra.mxu1 %v570_v27  ;;  %v592_v19 = vld [vmem:[#allocation5 + $0x178] sm:$0xff]  ;;  %v626_v21 = vld [vmem:[#allocation5 + $0x288] sm:$0xff] }
  0xc1   :  { %662 = vmatpush.msra.mxu2 %v561_v24  ;;  %681 = vmatpush.msra.mxu3 %v595_v25  ;;  %v791_v22 = vld [vmem:[%s1559_s7 + $0x70] sm:$0xff]  ;;  %v624_v24 = vld [vmem:[#allocation5 + $0x278] sm:$0xff] }
  0xc2   :  { %702 = vmatpush.msra.mxu0 %v625_v26  ;;  %719 = vmatpush.msra.mxu1 %v568_v31  ;;  %v590_v23 = vld [vmem:[#allocation5 + $0x168] sm:$0xff]  ;;  %v790_v25 = vld [vmem:[%s1559_s7 + $0x68] sm:$0xff] }
  0xc3   :  { %663 = vmatpush.msra.mxu2 %v559_v28  ;;  %682 = vmatpush.msra.mxu3 %v593_v29  ;;  %v588_v26 = vld [vmem:[#allocation5 + $0x158] sm:$0xff]  ;;  %v622_v27 = vld [vmem:[#allocation5 + $0x268] sm:$0xff] }
  0xc4   :  { %703 = vmatpush.msra.mxu0 %v623_v30  ;;  %720 = vmatpush.msra.mxu1 %v566_v35  ;;  %v789_v28 = vld [vmem:[%s1559_s7 + $0x60] sm:$0xff]  ;;  %v586_v29 = vld [vmem:[#allocation5 + $0x148] sm:$0xff] }
  0xc5   :  { %664 = vmatpush.msra.mxu2 %v557_v32  ;;  %683 = vmatpush.msra.mxu3 %v591_v33  ;;  %v620_v30 = vld [vmem:[#allocation5 + $0x258] sm:$0xff]  ;;  %v618_v32 = vld [vmem:[#allocation5 + $0x248] sm:$0xff] }
  0xc6   :  { %704 = vmatpush.msra.mxu0 %v621_v34  ;;  %721 = vmatpush.msra.mxu1 %v564_v39  ;;  %v584_v31 = vld [vmem:[#allocation5 + $0x138] sm:$0xff]  ;;  %v582_v33 = vld [vmem:[#allocation5 + $0x128] sm:$0xff] }
  0xc7   :  { %665 = vmatpush.msra.mxu2 %v555_v36  ;;  %684 = vmatpush.msra.mxu3 %v589_v37  ;;  %v616_v34 = vld [vmem:[#allocation5 + $0x238] sm:$0xff]  ;;  %v614_v36 = vld [vmem:[#allocation5 + $0x228] sm:$0xff] }
  0xc8   :  { %705 = vmatpush.msra.mxu0 %v619_v38  ;;  %722 = vmatpush.msra.mxu1 %v562_v44  ;;  %v580_v35 = vld [vmem:[#allocation5 + $0x118] sm:$0xff]  ;;  %v578_v37 = vld [vmem:[#allocation5 + $0x108] sm:$0xff] }
  0xc9   :  { %666 = vmatpush.msra.mxu2 %v553_v40  ;;  %685 = vmatpush.msra.mxu3 %v587_v41  ;;  %v612_v38 = vld [vmem:[#allocation5 + $0x218] sm:$0xff]  ;;  %v610_v39 = vld [vmem:[#allocation5 + $0x208] sm:$0xff] }
  0xca   :  { %706 = vmatpush.msra.mxu0 %v617_v42  ;;  %723 = vmatpush.msra.mxu1 %v560_v48  ;;  %v868_v40 = vld [vmem:[%s1561_s9 + $0x78] sm:$0xff]  ;;  %v867_v41 = vld [vmem:[%s1561_s9 + $0x70] sm:$0xff]  ;;  %v866_v42 = vld [vmem:[%s1561_s9 + $0x68] sm:$0xff] }
  0xcb   :  { %667 = vmatpush.msra.mxu2 %v551_v45  ;;  %686 = vmatpush.msra.mxu3 %v585_v46  ;;  %v865_v44 = vld [vmem:[%s1561_s9 + $0x60] sm:$0xff]  ;;  %v864_v45 = vld [vmem:[%s1561_s9 + $0x58] sm:$0xff]  ;;  %v863_v46 = vld [vmem:[%s1561_s9 + $0x50] sm:$0xff] }
  0xcc   :  { %707 = vmatpush.msra.mxu0 %v615_v47  ;;  %724 = vmatpush.msra.mxu1 %v558_v52  ;;  %v862_v47 = vld [vmem:[%s1561_s9 + $0x48] sm:$0xff]  ;;  %v861_v48 = vld [vmem:[%s1561_s9 + $0x40] sm:$0xff] }
  0xcd   :  { %668 = vmatpush.msra.mxu2 %v549_v49  ;;  %687 = vmatpush.msra.mxu3 %v583_v50  ;;  %v860_v49 = vld [vmem:[%s1561_s9 + $0x38] sm:$0xff]  ;;  %v859_v50 = vld [vmem:[%s1561_s9 + $0x30] sm:$0xff]  ;;  %v858_v52 = vld [vmem:[%s1561_s9 + $0x28] sm:$0xff] }
  0xce   :  { %708 = vmatpush.msra.mxu0 %v613_v51  ;;  %725 = vmatpush.msra.mxu1 %v556_v56  ;;  %v788_v51 = vld [vmem:[%s1559_s7 + $0x58] sm:$0xff] }
  0xcf   :  { %669 = vmatpush.msra.mxu2 %v547_v53  ;;  %688 = vmatpush.msra.mxu3 %v581_v54  ;;  %v787_v53 = vld [vmem:[%s1559_s7 + $0x50] sm:$0xff]  ;;  %v857_v54 = vld [vmem:[%s1561_s9 + $0x20] sm:$0xff]  ;;  %v856_v56 = vld [vmem:[%s1561_s9 + $0x18] sm:$0xff] }
  0xd0   :  { %709 = vmatpush.msra.mxu0 %v611_v55  ;;  %726 = vmatpush.msra.mxu1 %v554_v3  ;;  %v786_v55 = vld [vmem:[%s1559_s7 + $0x48] sm:$0xff] }
  0xd1   :  { %670 = vmatpush.msra.mxu2 %v545_v57  ;;  %689 = vmatpush.msra.mxu3 %v579_v58  ;;  %v785_v57 = vld [vmem:[%s1559_s7 + $0x40] sm:$0xff]  ;;  %v855_v58 = vld [vmem:[%s1561_s9 + $0x10] sm:$0xff]  ;;  %v778_v3 = vld [vmem:[%s1559_s7 + $0x8] sm:$0xff] }
  0xd2   :  { %671 = vmatmul.f32.vlgmr.msra.gmra.mxu2 %v649_v59  ;;  %710 = vmatpush.msra.mxu0 %v609_v60  ;;  %v854_v60 = vld [vmem:[%s1561_s9 + $0x8] sm:$0xff] }
  0xd3   :  { %735 = vmatpush.msrb.mxu2 %v608_v61  ;;  %690 = vmatpush.msra.mxu3 %v577_v62  ;;  %v783_v61 = vld [vmem:[%s1559_s7 + $0x30] sm:$0xff]  ;;  %v853_v62 = vld [vmem:[%s1561_s9] sm:$0xff] }
  0xd4   :  { %691 = vmatmul.f32.vlgmr.msra.gmra.mxu3 %v1267_v63  ;;  %711 = vmatmul.f32.vlgmr.msra.gmra.mxu0 %v1269_v0 }
  0xd5   :  { %736 = vmatpush.msrb.mxu2 %v606_v1  ;;  %755 = vmatpush.msrb.mxu3 %v640_v2  ;;  %v780_v1 = vld [vmem:[%s1559_s7 + $0x18] sm:$0xff]  ;;  %v779_v2 = vld [vmem:[%s1559_s7 + $0x10] sm:$0xff] }
  0xd6   :  { %727 = vmatpush.msra.mxu1 %v552_v5  ;;  %813 = vmatpush.msrb.mxu0 %v792_v18  ;;  %v883_v5 = vld [vmem:[%s1561_s9 + $0xf0] sm:$0xff] }
  0xd7   :  { %737 = vmatpush.msrb.mxu2 %v604_v4  ;;  %756 = vmatpush.msrb.mxu3 %v638_v43  ;;  %v777_v4 = vld [vmem:[%s1559_s7] sm:$0xff]  ;;  %v884_v43 = vld [vmem:[%s1561_s9 + $0xf8] sm:$0xff] }
  0xd8   :  { %728 = vmatpush.msra.mxu1 %v550_v8  ;;  %814 = vmatpush.msrb.mxu0 %v791_v22  ;;  %v881_v8 = vld [vmem:[%s1561_s9 + $0xe0] sm:$0xff] }
  0xd9   :  { %738 = vmatpush.msrb.mxu2 %v602_v6  ;;  %757 = vmatpush.msrb.mxu3 %v636_v7  ;;  %v1380_v6 = vld [vmem:[%s1556_s4] sm:$0x3]  ;;  %v882_v7 = vld [vmem:[%s1561_s9 + $0xe8] sm:$0xff] }
  0xda   :  { %729 = vmatpush.msra.mxu1 %v548_v10  ;;  %815 = vmatpush.msrb.mxu0 %v790_v25  ;;  %v808_v25 = vld [vmem:[%s1559_s7 + $0xf8] sm:$0xff] }
  0xdb   :  { %739 = vmatpush.msrb.mxu2 %v600_v9  ;;  %758 = vmatpush.msrb.mxu3 %v634_v20  ;;  %v358_v9 = vperm.slane %v1380_v6, 0  ;;  %v880_v20 = vld [vmem:[%s1561_s9 + $0xd8] sm:$0xff] }
  0xdc   :  { %730 = vmatpush.msra.mxu1 %v546_v13  ;;  %816 = vmatpush.msrb.mxu0 %v789_v28  ;;  %v878_v13 = vld [vmem:[%s1561_s9 + $0xc8] sm:$0xff]  ;;  %v872_v28 = vld [vmem:[%s1561_s9 + $0x98] sm:$0xff] }
  0xdd   :  { %740 = vmatpush.msrb.mxu2 %v598_v11  ;;  %759 = vmatpush.msrb.mxu3 %v632_v12  ;;  %v879_v11 = vld [vmem:[%s1561_s9 + $0xd0] sm:$0xff] }
  0xde   :  { %731 = vmatmul.f32.vlgmr.msra.gmra.mxu1 %v649_v59  ;;  %817 = vmatpush.msrb.mxu0 %v788_v51  ;;  %v784_v59 = vld [vmem:[%s1559_s7 + $0x38] sm:$0xff] }
  0xdf   :  { %741 = vmatpush.msrb.mxu2 %v596_v14  ;;  %760 = vmatpush.msrb.mxu3 %v630_v15 }
  0xe0   :  { %818 = vmatpush.msrb.mxu0 %v787_v53  ;;  %833 = vmatpush.msrb.mxu1 %v808_v25 }
  0xe1   :  { %742 = vmatpush.msrb.mxu2 %v594_v16  ;;  %761 = vmatpush.msrb.mxu3 %v628_v17  ;;  %v877_v17 = vld [vmem:[%s1561_s9 + $0xc0] sm:$0xff] }
  0xe2   :  { %819 = vmatpush.msrb.mxu0 %v786_v55 }
  0xe3   :  { %743 = vmatpush.msrb.mxu2 %v592_v19  ;;  %762 = vmatpush.msrb.mxu3 %v626_v21  ;;  %v876_v21 = vld [vmem:[%s1561_s9 + $0xb8] sm:$0xff] }
  0xe4   :  { %820 = vmatpush.msrb.mxu0 %v785_v57  ;;  %v794_v57 = vld [vmem:[%s1559_s7 + $0x88] sm:$0xff] }
  0xe5   :  { %744 = vmatpush.msrb.mxu2 %v590_v23  ;;  %763 = vmatpush.msrb.mxu3 %v624_v24  ;;  %v875_v23 = vld [vmem:[%s1561_s9 + $0xb0] sm:$0xff]  ;;  %v874_v24 = vld [vmem:[%s1561_s9 + $0xa8] sm:$0xff] }
  0xe6   :  { %821 = vmatpush.msrb.mxu0 %v784_v59  ;;  %v793_v59 = vld [vmem:[%s1559_s7 + $0x80] sm:$0xff] }
  0xe7   :  { %745 = vmatpush.msrb.mxu2 %v588_v26  ;;  %764 = vmatpush.msrb.mxu3 %v622_v27  ;;  %v873_v26 = vld [vmem:[%s1561_s9 + $0xa0] sm:$0xff]  ;;  %v807_v27 = vld [vmem:[%s1559_s7 + $0xf0] sm:$0xff] }
  0xe8   :  { %822 = vmatpush.msrb.mxu0 %v783_v61  ;;  %834 = vmatpush.msrb.mxu1 %v807_v27 }
  0xe9   :  { %746 = vmatpush.msrb.mxu2 %v586_v29  ;;  %765 = vmatpush.msrb.mxu3 %v620_v30  ;;  %v806_v29 = vld [vmem:[%s1559_s7 + $0xe8] sm:$0xff]  ;;  %v871_v30 = vld [vmem:[%s1561_s9 + $0x90] sm:$0xff] }
  0xea   :  { %835 = vmatpush.msrb.mxu1 %v806_v29  ;;  %v970_v29 = vld [vmem:[%s1564_s12 + $0x18] sm:$0xff] }
  0xeb   :  { %747 = vmatpush.msrb.mxu2 %v584_v31  ;;  %766 = vmatpush.msrb.mxu3 %v618_v32  ;;  %v805_v31 = vld [vmem:[%s1559_s7 + $0xe0] sm:$0xff]  ;;  %v870_v32 = vld [vmem:[%s1561_s9 + $0x88] sm:$0xff] }
  0xec   :  { %836 = vmatpush.msrb.mxu1 %v805_v31  ;;  %v968_v31 = vld [vmem:[%s1564_s12 + $0x8] sm:$0xff] }
  0xed   :  { %748 = vmatpush.msrb.mxu2 %v582_v33  ;;  %767 = vmatpush.msrb.mxu3 %v616_v34  ;;  %v804_v33 = vld [vmem:[%s1559_s7 + $0xd8] sm:$0xff]  ;;  %v869_v34 = vld [vmem:[%s1561_s9 + $0x80] sm:$0xff] }
  0xee   :  { %837 = vmatpush.msrb.mxu1 %v804_v33 }
  0xef   :  { %749 = vmatpush.msrb.mxu2 %v580_v35  ;;  %768 = vmatpush.msrb.mxu3 %v614_v36  ;;  %v803_v35 = vld [vmem:[%s1559_s7 + $0xd0] sm:$0xff]  ;;  %v802_v36 = vld [vmem:[%s1559_s7 + $0xc8] sm:$0xff] }
  0xf0   :  { %838 = vmatpush.msrb.mxu1 %v803_v35 }
  0xf1   :  { %750 = vmatpush.msrb.mxu2 %v578_v37  ;;  %769 = vmatpush.msrb.mxu3 %v612_v38  ;;  %v801_v37 = vld [vmem:[%s1559_s7 + $0xc0] sm:$0xff]  ;;  %v800_v38 = vld [vmem:[%s1559_s7 + $0xb8] sm:$0xff] }
  0xf2   :  { %751 = vmatmul.f32.vlgmr.msrb.gmra.mxu2 %v1267_v63  ;;  %v782_v63 = vld [vmem:[%s1559_s7 + $0x28] sm:$0xff]  ;;  %839 = vmatpush.msrb.mxu1 %v802_v36  ;;  %v1035_v36 = vld [vmem:[%s1563_s11] ss:$0 sm:$0xff] }
  0xf3   :  { %770 = vmatpush.msrb.mxu3 %v610_v39  ;;  %823 = vmatpush.msrb.mxu0 %v782_v63  ;;  %v799_v39 = vld [vmem:[%s1559_s7 + $0xb0] sm:$0xff] }
  0xf4   :  { %771 = vmatmul.f32.vlgmr.msrb.gmra.mxu3 %v1269_v0  ;;  %v781_v0 = vld [vmem:[%s1559_s7 + $0x20] sm:$0xff]  ;;  %840 = vmatpush.msrb.mxu1 %v801_v37 }
  0xf5   :  { %921 = vmatpush.msra.mxu3 %v868_v40  ;;  %824 = vmatpush.msrb.mxu0 %v781_v0 }
  0xf6   :  { %841 = vmatpush.msrb.mxu1 %v800_v38 }
  0xf7   :  { %922 = vmatpush.msra.mxu3 %v867_v41  ;;  %825 = vmatpush.msrb.mxu0 %v780_v1  ;;  %v798_v41 = vld [vmem:[%s1559_s7 + $0xa8] sm:$0xff] }
  0xf8   :  { %842 = vmatpush.msrb.mxu1 %v799_v39 }
  0xf9   :  { %923 = vmatpush.msra.mxu3 %v866_v42  ;;  %826 = vmatpush.msrb.mxu0 %v779_v2 }
  0xfa   :  { %843 = vmatpush.msrb.mxu1 %v798_v41  ;;  %v1036_v41 = vld [vmem:[%s1565_s13] ss:$0 sm:$0xff] }
  0xfb   :  { %924 = vmatpush.msra.mxu3 %v865_v44  ;;  %827 = vmatpush.msrb.mxu0 %v778_v3 }
  0xfd   :  { %925 = vmatpush.msra.mxu3 %v864_v45  ;;  %828 = vmatpush.msrb.mxu0 %v777_v4  ;;  %v641_v45 = vld [vmem:[%s1558_s6] sm:$0x3] }
  0xfe   :  { %v644_v1 = vperm.slane %v641_v45, 1 }
  0xff   :  { %926 = vmatpush.msra.mxu3 %v863_v46  ;;  %941 = vmatpush.msra.mxu0 %v884_v43  ;;  %v797_v46 = vld [vmem:[%s1559_s7 + $0xa0] sm:$0xff] }
 0x100   :  { %844 = vmatpush.msrb.mxu1 %v797_v46 }
 0x101   :  { %927 = vmatpush.msra.mxu3 %v862_v47  ;;  %942 = vmatpush.msra.mxu0 %v883_v5  ;;  %v643_v47 = vperm.slane %v641_v45, 0  ;;  %v1037_v45 = vld [vmem:[%s1566_s14] ss:$0 sm:$0xff] }
 0x103   :  { %928 = vmatpush.msra.mxu3 %v861_v48  ;;  %943 = vmatpush.msra.mxu0 %v882_v7  ;;  %v359_v48 = vperm.slane %v1380_v6, 1 }
 0x105   :  { %929 = vmatpush.msra.mxu3 %v860_v49  ;;  %944 = vmatpush.msra.mxu0 %v881_v8  ;;  %v796_v49 = vld [vmem:[%s1559_s7 + $0x98] sm:$0xff] }
 0x106   :  { %845 = vmatpush.msrb.mxu1 %v796_v49  ;;  %v900_v8 = vld [vmem:[%s1562_s10 + $0x78] sm:$0xff]  ;;  %v1038_v49 = vld [vmem:[#allocation2] ss:$0 sm:$0xff] }
 0x107   :  { %930 = vmatpush.msra.mxu3 %v859_v50  ;;  %945 = vmatpush.msra.mxu0 %v880_v20  ;;  %v898_v20 = vld [vmem:[%s1562_s10 + $0x68] sm:$0xff] }
 0x108   :  { %901 = vmatpush.msra.mxu2 %v900_v8 }
 0x109   :  { %931 = vmatpush.msra.mxu3 %v858_v52  ;;  %946 = vmatpush.msra.mxu0 %v879_v11  ;;  %v795_v52 = vld [vmem:[%s1559_s7 + $0x90] sm:$0xff]  ;;  %v896_v11 = vld [vmem:[%s1562_s10 + $0x58] sm:$0xff] }
 0x10a   :  { %846 = vmatpush.msrb.mxu1 %v795_v52 }
 0x10b   :  { %932 = vmatpush.msra.mxu3 %v857_v54  ;;  %947 = vmatpush.msra.mxu0 %v878_v13  ;;  %v894_v13 = vld [vmem:[%s1562_s10 + $0x48] sm:$0xff] }
 0x10c   :  { %847 = vmatpush.msrb.mxu1 %v794_v57 }
 0x10d   :  { %933 = vmatpush.msra.mxu3 %v856_v56  ;;  %948 = vmatpush.msra.mxu0 %v877_v17  ;;  %v890_v17 = vld [vmem:[%s1562_s10 + $0x28] sm:$0xff] }
 0x10e   :  { %848 = vmatpush.msrb.mxu1 %v793_v59 }
 0x10f   :  { %934 = vmatpush.msra.mxu3 %v855_v58  ;;  %949 = vmatpush.msra.mxu0 %v876_v21  ;;  %v887_v21 = vld [vmem:[%s1562_s10 + $0x10] sm:$0xff] }
 0x110   :  { %991 = vmatpush.msra.mxu1 %v970_v29 }
 0x111   :  { %935 = vmatpush.msra.mxu3 %v854_v60  ;;  %950 = vmatpush.msra.mxu0 %v875_v23  ;;  %v885_v23 = vld [vmem:[%s1562_s10] sm:$0xff] }
 0x113   :  { %936 = vmatpush.msra.mxu3 %v853_v62  ;;  %951 = vmatpush.msra.mxu0 %v874_v24  ;;  %v1034_v24 = vld [vmem:[%s1560_s8] ss:$0 sm:$0xff] }
 0x115   :  { %952 = vmatpush.msra.mxu0 %v873_v26 }
 0x117   :  { %953 = vmatpush.msra.mxu0 %v872_v28 }
 0x119   :  { %954 = vmatpush.msra.mxu0 %v871_v30  ;;  %v969_v30 = vld [vmem:[%s1564_s12 + $0x10] sm:$0xff] }
 0x11a   :  { %992 = vmatpush.msra.mxu1 %v969_v30 }
 0x11b   :  { %955 = vmatpush.msra.mxu0 %v870_v32  ;;  %v967_v32 = vld [vmem:[%s1564_s12] sm:$0xff] }
 0x11c   :  { %993 = vmatpush.msra.mxu1 %v968_v31 }
 0x11d   :  { %956 = vmatpush.msra.mxu0 %v869_v34 }
 0x11e   :  { %994 = vmatpush.msra.mxu1 %v967_v32 }
 0x12e   :  { %v401_v10 = vpop.f32.mrf.mxu0  ;;  %v421_v14 = vpop.f32.mrf.mxu1 }
 0x12f   :  { %v402_v12 = vadd.f32 %v401_v10, %v358_v9  ;;  %v899_v9 = vld [vmem:[%s1562_s10 + $0x70] sm:$0xff]  ;;  %v897_v10 = vld [vmem:[%s1562_s10 + $0x60] sm:$0xff] }
 0x130   :  { %902 = vmatpush.msra.mxu2 %v899_v9 }
 0x131   :  { %v422_v15 = vadd.f32 %v421_v14, %v402_v12  ;;  %v895_v12 = vld [vmem:[%s1562_s10 + $0x50] sm:$0xff]  ;;  %v893_v14 = vld [vmem:[%s1562_s10 + $0x40] sm:$0xff] }
 0x132   :  { %903 = vmatpush.msra.mxu2 %v898_v20 }
 0x134   :  { %904 = vmatpush.msra.mxu2 %v897_v10 }
 0x135   :  { %v441_v16 = vpop.f32.mrf.mxu2 }
 0x136   :  { %v442_v18 = vadd.f32 %v441_v16, %v422_v15  ;;  %v461_v19 = vpop.f32.mrf.mxu3  ;;  %v501_v42 = vpop.f32.mrf.mxu0  ;;  %905 = vmatpush.msra.mxu2 %v896_v11  ;;  %v892_v15 = vld [vmem:[%s1562_s10 + $0x38] sm:$0xff]  ;;  %v891_v16 = vld [vmem:[%s1562_s10 + $0x30] sm:$0xff] }
 0x137   :  { %v521_v62 = vpop.f32.mrf.mxu1 }
 0x138   :  { %v462_v22 = vadd.f32 %v461_v19, %v442_v18  ;;  %906 = vmatpush.msra.mxu2 %v895_v12  ;;  %v889_v18 = vld [vmem:[%s1562_s10 + $0x20] sm:$0xff]  ;;  %v888_v19 = vld [vmem:[%s1562_s10 + $0x18] sm:$0xff] }
 0x13a   :  { %937 = vmatmul.f32.vlgmr.msra.gmra.mxu3 %v462_v22  ;;  %907 = vmatpush.msra.mxu2 %v894_v13  ;;  %v886_v22 = vld [vmem:[%s1562_s10 + $0x8] sm:$0xff] }
 0x13c   :  { %908 = vmatpush.msra.mxu2 %v893_v14 }
 0x13d   :  { %v541_v40 = vpop.f32.mrf.mxu2 }
 0x13e   :  { %909 = vmatpush.msra.mxu2 %v892_v15 }
 0x13f   :  { %v481_v44 = vpop.f32.mrf.mxu3 }
 0x140   :  { %v482_v55 = vadd.f32 %v481_v44, %v359_v48  ;;  %910 = vmatpush.msra.mxu2 %v891_v16 }
 0x142   :  { %v502_v60 = vadd.f32 %v501_v42, %v482_v55  ;;  %911 = vmatpush.msra.mxu2 %v890_v17 }
 0x144   :  { %v522_v63 = vadd.f32 %v521_v62, %v502_v60  ;;  %912 = vmatpush.msra.mxu2 %v889_v18 }
 0x146   :  { %v542_v0 = vadd.f32 %v541_v40, %v522_v63  ;;  %913 = vmatpush.msra.mxu2 %v888_v19 }
 0x148   :  { %914 = vmatpush.msra.mxu2 %v887_v21 }
 0x14a   :  { %915 = vmatpush.msra.mxu2 %v886_v22 }
 0x14c   :  { %916 = vmatpush.msra.mxu2 %v885_v23 }
 0x151   :  { %v712_v54 = vpop.f32.mrf.mxu0 }
 0x155   :  { %v672_v50 = vpop.f32.mrf.mxu2 }
 0x156   :  { %v673_v51 = vadd.f32 %v672_v50, %v643_v47 }
 0x157   :  { %v692_v53 = vpop.f32.mrf.mxu3 }
 0x158   :  { %v693_v56 = vadd.f32 %v692_v53, %v673_v51 }
 0x15a   :  { %v713_v58 = vadd.f32 %v712_v54, %v693_v56 }
 0x15b   :  { %v732_v2 = vpop.f32.mrf.mxu1 }
 0x15c   :  { %v775_v61 = vmax.f32 %v713_v58, 0.0  ;;  %v733_v3 = vadd.f32 %v732_v2, %v644_v1 }
 0x15e   :  { %829 = vmatmul.f32.vlgmr.msrb.gmra.mxu0 %v775_v61 }
 0x166   :  { %957 = vmatmul.f32.vlgmr.msra.gmra.mxu0 %v542_v0 }
 0x175   :  { %v752_v4 = vpop.f32.mrf.mxu2 }
 0x176   :  { %v753_v43 = vadd.f32 %v752_v4, %v733_v3 }
 0x177   :  { %v772_v5 = vpop.f32.mrf.mxu3 }
 0x178   :  { %v773_v6 = vadd.f32 %v772_v5, %v753_v43 }
 0x17a   :  { %v776_v7 = vmax.f32 %v773_v6, 0.0 }
 0x17c   :  { %849 = vmatmul.f32.vlgmr.msrb.gmra.mxu1 %v776_v7 }
 0x1bd   :  { %v938_v33 = vpop.f32.mrf.mxu3 }
 0x1db   :  { %v830_v25 = vpop.f32.mrf.mxu0 }
 0x1dc   :  { %v831_v26 = vadd.f32 %v1034_v24, %v830_v25 }
 0x1e3   :  { %v958_v37 = vpop.f32.mrf.mxu0 }
 0x1f9   :  { %v850_v27 = vpop.f32.mrf.mxu1 }
 0x1fa   :  { %v851_v28 = vadd.f32 %v850_v27, %v831_v26 }
 0x1fc   :  { %917 = vmatmul.f32.vlgmr.msra.gmra.mxu2 %v851_v28 }
 0x27f   :  { %v918_v34 = vpop.f32.mrf.mxu2 }
 0x280   :  { %v939_v35 = vadd.f32 %v938_v33, %v918_v34 }
 0x282   :  { %v959_v38 = vadd.f32 %v958_v37, %v939_v35 }
 0x284   :  { %v965_v39 = vadd.f32 %v1035_v36, %v959_v38 }
 0x286   :  { %v966_v40 = vmax.f32 %v965_v39, 0.0 }
 0x288   :  { %1024 = vmatmul.msk.f32.vlgmr.msra.gmra.mxu1 %vm975_vm3, %v966_v40 }
 0x305   :  { %v996_v42 = vpop.f32.mrf.mxu1 }
 0x306   :  { %v997_v44 = vadd.f32 %v1036_v41, %v996_v42 }
 0x308   :  { %v999_v46 = vmax.f32 %v997_v44, 0.0 }
 0x30a   :  { %v1004_v47 = vmul.f32 %v1037_v45, %v999_v46 }
 0x30c   :  { %v1006_v48 = vsel %vm1005_vm4, %v1004_v47, 0.0 }
 0x30d   :  { %1007 = vadd.xlane.f32.xlu2 %v1006_v48 }
 0x380   :  { %v1008_v50 = vpop.xlane.xlu2 %1007 }
 0x381   :  { %v1013_v51 = vadd.f32 %v1038_v49, %v1008_v50 }
 0x383   :  { %1015 = vst.msk [vmem:[%s1568_s16] sm:$0x3] %vm1014_vm5, %v1013_v51 }
 0x384   :  { %1020 = vsyncpa [#allocation4], 1 }
 0x385   :  { %1021 = vsyncpa [#allocation6], 1 }

// kernel: tpu_custom_call.1
= control target key start
LH: loop header
LB: loop body
LE: loop exit
PB: predicated region body
PF: predicated region fallthrough
CT: control target
= control target key end

     0   :  { %s1552_s0 = inlined_call_operand.vmem [shape: bf16[2,16,480], index: 0, kind: input, shape index: {}]   ;;  %s1553_s1 = inlined_call_operand.vmem [shape: f32[2,16], index: 1, kind: input, shape index: {}]   ;;  %s1554_s2 = inlined_call_operand.vmem [shape: f32[2,384], index: 2, kind: input, shape index: {}]   ;;  %s1555_s3 = inlined_call_operand.hbm [shape: f32[480,256], index: 3, kind: input, shape index: {}]   ;;  %s1556_s4 = inlined_call_operand.vmem [shape: f32[1,256], index: 4, kind: input, shape index: {}]   ;;  %s1557_s5 = inlined_call_operand.hbm [shape: f32[384,256], index: 5, kind: input, shape index: {}]   ;;  %s1558_s6 = inlined_call_operand.vmem [shape: f32[1,256], index: 6, kind: input, shape index: {}]   ;;  %s1559_s7 = inlined_call_operand.vmem [shape: f32[256,128], index: 7, kind: input, shape index: {}]   ;;  %s1560_s8 = inlined_call_operand.vmem [shape: f32[1,128], index: 8, kind: input, shape index: {}]   ;;  %s1561_s9 = inlined_call_operand.vmem [shape: f32[256,32], index: 9, kind: input, shape index: {}]   ;;  %s1562_s10 = inlined_call_operand.vmem [shape: f32[128,32], index: 10, kind: input, shape index: {}]   ;;  %s1563_s11 = inlined_call_operand.vmem [shape: f32[1,32], index: 11, kind: input, shape index: {}]   ;;  %s1564_s12 = inlined_call_operand.vmem [shape: f32[32,32], index: 12, kind: input, shape index: {}]   ;;  %s1565_s13 = inlined_call_operand.vmem [shape: f32[1,32], index: 13, kind: input, shape index: {}]   ;;  %s1566_s14 = inlined_call_operand.vmem [shape: f32[1,32], index: 14, kind: input, shape index: {}]   ;;  %s1567_s15 = inlined_call_operand.<no memory space> [shape: f32[1,1], index: 15, kind: input, shape index: {}]   ;;  %s1568_s16 = inlined_call_operand.vmem [shape: f32[2,1], index: 16, kind: output, shape index: {}]  }
   0x1   :  { %1570 = sst [smem:[#allocation9_spill]] %s1552_s0  ;;  %v21_v0 = vstv %s1567_s15 }
   0x2   :  { %22 = vst [vmem:[#allocation2] sm:$0x1] %v21_v0 }
   0x3   :  { %23 = vsyncpa [#allocation4], 0  ;;  %s35_s25 = sshll.u32 %s1555_s3, 4  ;;  %s36_s25 = int_to_ptr.hbm [resolvable:$true] %s35_s25 }
   0x4   :  { %24 = vsyncpa [#allocation6], 0  ;;  %s1093_s26 = smov [#allocation3]   ;;  %s50_s30 = sshll.u32 %s1557_s5, 4  ;;  %s51_s30 = int_to_ptr.hbm [resolvable:$true] %s50_s30 }
   0x5   :  { %s37_s27 = sshll.u32 %s1093_s26, 4  ;;  %s1094_s0 = smov 256   ;;  %s38_s27 = int_to_ptr.vmem [resolvable:$true] %s37_s27 }
   0x6   :  { %s1095_s17 = smov 16   ;;  %s1096_s15 = smov [#allocation5]  }
   0x7   :  { %43 = dma.hbm_to_vmem [thread:$0]  %s36_s25, 15360, %s38_s27, [#allocation4], %s1094_s0, %s1094_s0, %s1095_s17  }
   0x8   :  { %s52_s18 = sshll.u32 %s1096_s15, 4  ;;  %s53_s18 = int_to_ptr.vmem [resolvable:$true] %s52_s18 }
   0x9   :  { %58 = dma.hbm_to_vmem [thread:$0]  %s51_s30, 12288, %s53_s18, [#allocation6], %s1094_s0, %s1094_s0, %s1095_s17  }
   0xa   :  { %1089 = dma.done.wait [#allocation4], 15360  }
   0xb   :  { %1090 = vsyncadd [#allocation4], 4294951936 }
   0xc   :  { %1091 = dma.done.wait [#allocation6], 12288  }
   0xd   :  { %1092 = vsyncadd [#allocation6], 4294955008  ;;  %v113_v1 = vlaneseq  ;;  %vm215_vm0 = vcmask 123904   ;;  %v1202_v4 = vld [vmem:[%s1553_s1] sm:$0x3]  ;;  %v264_v9 = vld [vmem:[#allocation3 + $0xe0] sm:$0xff] }
   0xe   :  { %v266_v5 = vld [vmem:[#allocation3 + $0xf0] sm:$0xff]  ;;  %v216_v7 = vsel %vm215_vm0, %v1202_v4, 0.0  ;;  %v296_v10 = vld [vmem:[#allocation3 + $0x1e0] sm:$0xff]  ;;  %v125_v14 = vperm.slane %v1202_v4, 1  ;;  %v112_v18 = vperm.slane %v1202_v4, 0  ;;  %v267_v59 = vld [vmem:[#allocation3 + $0xf8] sm:$0xff] }
   0xf   :  { %v1191_v2 = vshrl.u32 %v113_v1, 7  ;;  %v298_v6 = vld [vmem:[#allocation3 + $0x1f0] sm:$0xff]  ;;  %384 = vmatpush.msra.mxu0 %v266_v5  ;;  %217 = vadd.xlane.f32.xlu0 %v216_v7  ;;  %v328_v11 = vld [vmem:[#allocation3 + $0x2e0] sm:$0xff]  ;;  %v265_v63 = vld [vmem:[#allocation3 + $0xe8] sm:$0xff]  ;;  %s1571_s20 = sld [smem:[#allocation9_spill]]  ;;  %vm175_vm1 = vcmask 785408  }
  0x10   :  { %404 = vmatpush.msra.mxu1 %v298_v6  ;;  %v330_v8 = vld [vmem:[#allocation3 + $0x2f0] sm:$0xff]  ;;  %v352_v17 = vld [vmem:[#allocation3 + $0x3a0] sm:$0xff]  ;;  %v261_v7 = vld [vmem:[#allocation3 + $0xc8] sm:$0xff]  ;;  %vm371_vm2 = vcmask 1041409   ;;  %vm975_vm3 = vcmask 261120   ;;  %vm1005_vm4 = vcmask 254976  }
  0x11   :  { %v1194_v3 = vadd.s32 8, %v1191_v2  ;;  %1029 = vset.pattern.permute.xlu0 %v1191_v2  ;;  %424 = vmatpush.msra.mxu2 %v330_v8  ;;  %v354_v12 = vld [vmem:[#allocation3 + $0x3b0] sm:$0xff]  ;;  %v260_v19 = vld [vmem:[#allocation3 + $0xc0] sm:$0xff]  ;;  %v299_v8 = vld [vmem:[#allocation3 + $0x1f8] sm:$0xff]  ;;  %vm1014_vm5 = vcmask 1024  }
  0x12   :  { %v262_v13 = vld [vmem:[#allocation3 + $0xd0] sm:$0xff]  ;;  %385 = vmatpush.msra.mxu0 %v264_v9  ;;  %405 = vmatpush.msra.mxu1 %v296_v10  ;;  %v292_v20 = vld [vmem:[#allocation3 + $0x1c0] sm:$0xff]  ;;  %v331_v9 = vld [vmem:[#allocation3 + $0x2f8] sm:$0xff] }
  0x13   :  { %1030 = vset.pattern.permute.xlu1 %v1194_v3  ;;  %1032 = vset.pattern.permute.xlu2 %v1194_v3  ;;  %v294_v15 = vld [vmem:[#allocation3 + $0x1d0] sm:$0xff]  ;;  %v324_v21 = vld [vmem:[#allocation3 + $0x2c0] sm:$0xff]  ;;  %v355_v10 = vld [vmem:[#allocation3 + $0x3b8] sm:$0xff] }
  0x14   :  { %v326_v16 = vld [vmem:[#allocation3 + $0x2d0] sm:$0xff]  ;;  %425 = vmatpush.msra.mxu2 %v328_v11  ;;  %448 = vmatpush.msra.mxu3 %v354_v12  ;;  %v348_v26 = vld [vmem:[#allocation3 + $0x380] sm:$0xff]  ;;  %v259_v11 = vld [vmem:[#allocation3 + $0xb8] sm:$0xff] }
  0x15   :  { %386 = vmatpush.msra.mxu0 %v262_v13  ;;  %406 = vmatpush.msra.mxu1 %v294_v15  ;;  %v350_v22 = vld [vmem:[#allocation3 + $0x390] sm:$0xff]  ;;  %v256_v27 = vld [vmem:[#allocation3 + $0xa0] sm:$0xff]  ;;  %v297_v12 = vld [vmem:[#allocation3 + $0x1e8] sm:$0xff] }
  0x16   :  { %426 = vmatpush.msra.mxu2 %v326_v16  ;;  %449 = vmatpush.msra.mxu3 %v352_v17  ;;  %v258_v23 = vld [vmem:[#allocation3 + $0xb0] sm:$0xff]  ;;  %v288_v28 = vld [vmem:[#allocation3 + $0x1a0] sm:$0xff]  ;;  %v329_v13 = vld [vmem:[#allocation3 + $0x2e8] sm:$0xff] }
  0x17   :  { %v290_v24 = vld [vmem:[#allocation3 + $0x1b0] sm:$0xff]  ;;  %387 = vmatpush.msra.mxu0 %v260_v19  ;;  %407 = vmatpush.msra.mxu1 %v292_v20  ;;  %v320_v29 = vld [vmem:[#allocation3 + $0x2a0] sm:$0xff]  ;;  %v257_v15 = vld [vmem:[#allocation3 + $0xa8] sm:$0xff] }
  0x18   :  { %v322_v25 = vld [vmem:[#allocation3 + $0x2b0] sm:$0xff]  ;;  %427 = vmatpush.msra.mxu2 %v324_v21  ;;  %450 = vmatpush.msra.mxu3 %v350_v22  ;;  %v344_v34 = vld [vmem:[#allocation3 + $0x360] sm:$0xff]  ;;  %v295_v16 = vld [vmem:[#allocation3 + $0x1d8] sm:$0xff] }
  0x19   :  { %v346_v30 = vld [vmem:[#allocation3 + $0x370] sm:$0xff]  ;;  %388 = vmatpush.msra.mxu0 %v258_v23  ;;  %408 = vmatpush.msra.mxu1 %v290_v24  ;;  %v252_v35 = vld [vmem:[#allocation3 + $0x80] sm:$0xff]  ;;  %v327_v17 = vld [vmem:[#allocation3 + $0x2d8] sm:$0xff] }
  0x1a   :  { %428 = vmatpush.msra.mxu2 %v322_v25  ;;  %451 = vmatpush.msra.mxu3 %v348_v26  ;;  %v254_v31 = vld [vmem:[#allocation3 + $0x90] sm:$0xff]  ;;  %v284_v36 = vld [vmem:[#allocation3 + $0x180] sm:$0xff]  ;;  %v255_v19 = vld [vmem:[#allocation3 + $0x98] sm:$0xff] }
  0x1b   :  { %136 = vperm.xlu1 %1030, %v125_v14   ;;  %123 = vperm.xlu2 %1032, %v112_v18   ;;  %v286_v32 = vld [vmem:[#allocation3 + $0x190] sm:$0xff]  ;;  %v316_v37 = vld [vmem:[#allocation3 + $0x280] sm:$0xff]  ;;  %v293_v20 = vld [vmem:[#allocation3 + $0x1c8] sm:$0xff] }
  0x1c   :  { %389 = vmatpush.msra.mxu0 %v256_v27  ;;  %409 = vmatpush.msra.mxu1 %v288_v28  ;;  %v318_v33 = vld [vmem:[#allocation3 + $0x290] sm:$0xff]  ;;  %v340_v42 = vld [vmem:[#allocation3 + $0x340] sm:$0xff]  ;;  %v325_v21 = vld [vmem:[#allocation3 + $0x2c8] sm:$0xff] }
  0x1d   :  { %429 = vmatpush.msra.mxu2 %v320_v29  ;;  %452 = vmatpush.msra.mxu3 %v346_v30  ;;  %v342_v38 = vld [vmem:[#allocation3 + $0x350] sm:$0xff]  ;;  %v248_v43 = vld [vmem:[#allocation3 + $0x60] sm:$0xff]  ;;  %v349_v22 = vld [vmem:[#allocation3 + $0x388] sm:$0xff] }
  0x1e   :  { %390 = vmatpush.msra.mxu0 %v254_v31  ;;  %410 = vmatpush.msra.mxu1 %v286_v32  ;;  %v250_v39 = vld [vmem:[#allocation3 + $0x70] sm:$0xff]  ;;  %v280_v44 = vld [vmem:[#allocation3 + $0x160] sm:$0xff]  ;;  %v253_v23 = vld [vmem:[#allocation3 + $0x88] sm:$0xff] }
  0x1f   :  { %430 = vmatpush.msra.mxu2 %v318_v33  ;;  %453 = vmatpush.msra.mxu3 %v344_v34  ;;  %v282_v40 = vld [vmem:[#allocation3 + $0x170] sm:$0xff]  ;;  %v312_v45 = vld [vmem:[#allocation3 + $0x260] sm:$0xff]  ;;  %v291_v24 = vld [vmem:[#allocation3 + $0x1b8] sm:$0xff] }
  0x20   :  { %391 = vmatpush.msra.mxu0 %v252_v35  ;;  %411 = vmatpush.msra.mxu1 %v284_v36  ;;  %v314_v41 = vld [vmem:[#allocation3 + $0x270] sm:$0xff]  ;;  %v336_v50 = vld [vmem:[#allocation3 + $0x320] sm:$0xff]  ;;  %v323_v25 = vld [vmem:[#allocation3 + $0x2b8] sm:$0xff] }
  0x21   :  { %431 = vmatpush.msra.mxu2 %v316_v37  ;;  %454 = vmatpush.msra.mxu3 %v342_v38  ;;  %v338_v46 = vld [vmem:[#allocation3 + $0x330] sm:$0xff]  ;;  %v244_v51 = vld [vmem:[#allocation3 + $0x40] sm:$0xff]  ;;  %v347_v26 = vld [vmem:[#allocation3 + $0x378] sm:$0xff] }
  0x22   :  { %392 = vmatpush.msra.mxu0 %v250_v39  ;;  %412 = vmatpush.msra.mxu1 %v282_v40  ;;  %v246_v47 = vld [vmem:[#allocation3 + $0x50] sm:$0xff]  ;;  %v276_v52 = vld [vmem:[#allocation3 + $0x140] sm:$0xff]  ;;  %v251_v27 = vld [vmem:[#allocation3 + $0x78] sm:$0xff] }
  0x23   :  { %1031 = vset.pattern.permute.xlu1 %v1191_v2  ;;  %130 = vperm.xlu0 %1029, %v125_v14   ;;  %v278_v48 = vld [vmem:[#allocation3 + $0x150] sm:$0xff]  ;;  %v308_v53 = vld [vmem:[#allocation3 + $0x240] sm:$0xff]  ;;  %v353_v14 = vld [vmem:[#allocation3 + $0x3a8] sm:$0xff] }
  0x24   :  { %432 = vmatpush.msra.mxu2 %v314_v41  ;;  %455 = vmatpush.msra.mxu3 %v340_v42  ;;  %v310_v49 = vld [vmem:[#allocation3 + $0x250] sm:$0xff]  ;;  %v332_v58 = vld [vmem:[#allocation3 + $0x300] sm:$0xff]  ;;  %v289_v28 = vld [vmem:[#allocation3 + $0x1a8] sm:$0xff] }
  0x25   :  { %393 = vmatpush.msra.mxu0 %v248_v43  ;;  %413 = vmatpush.msra.mxu1 %v280_v44  ;;  %v334_v54 = vld [vmem:[#allocation3 + $0x310] sm:$0xff]  ;;  %v240_v60 = vld [vmem:[#allocation3 + $0x20] sm:$0xff]  ;;  %v321_v29 = vld [vmem:[#allocation3 + $0x2a8] sm:$0xff] }
  0x26   :  { %433 = vmatpush.msra.mxu2 %v312_v45  ;;  %456 = vmatpush.msra.mxu3 %v338_v46  ;;  %v242_v55 = vld [vmem:[#allocation3 + $0x30] sm:$0xff]  ;;  %v272_v61 = vld [vmem:[#allocation3 + $0x120] sm:$0xff]  ;;  %v345_v30 = vld [vmem:[#allocation3 + $0x368] sm:$0xff] }
  0x27   :  { %394 = vmatpush.msra.mxu0 %v246_v47  ;;  %414 = vmatpush.msra.mxu1 %v278_v48  ;;  %v274_v56 = vld [vmem:[#allocation3 + $0x130] sm:$0xff]  ;;  %v304_v62 = vld [vmem:[#allocation3 + $0x220] sm:$0xff]  ;;  %v249_v31 = vld [vmem:[#allocation3 + $0x68] sm:$0xff] }
  0x28   :  { %434 = vmatpush.msra.mxu2 %v310_v49  ;;  %457 = vmatpush.msra.mxu3 %v336_v50  ;;  %v306_v57 = vld [vmem:[#allocation3 + $0x230] sm:$0xff]  ;;  %v236_v4 = vld [vmem:[#allocation3] sm:$0xff]  ;;  %v287_v32 = vld [vmem:[#allocation3 + $0x198] sm:$0xff] }
  0x29   :  { %395 = vmatpush.msra.mxu0 %v244_v51  ;;  %415 = vmatpush.msra.mxu1 %v276_v52  ;;  %v238_v0 = vld [vmem:[#allocation3 + $0x10] sm:$0xff]  ;;  %v268_v5 = vld [vmem:[#allocation3 + $0x100] sm:$0xff]  ;;  %v319_v33 = vld [vmem:[#allocation3 + $0x298] sm:$0xff] }
  0x2a   :  { %435 = vmatpush.msra.mxu2 %v308_v53  ;;  %458 = vmatpush.msra.mxu3 %v334_v54  ;;  %v270_v1 = vld [vmem:[#allocation3 + $0x110] sm:$0xff]  ;;  %v300_v6 = vld [vmem:[#allocation3 + $0x200] sm:$0xff]  ;;  %v343_v35 = vld [vmem:[#allocation3 + $0x358] sm:$0xff] }
  0x2b   :  { %117 = vperm.xlu1 %1031, %v112_v18   ;;  %1033 = vset.pattern.permute.xlu0 %v1194_v3  ;;  %v302_v2 = vld [vmem:[#allocation3 + $0x210] sm:$0xff]  ;;  %v263_v3 = vld [vmem:[#allocation3 + $0xd8] sm:$0xff]  ;;  %v285_v37 = vld [vmem:[#allocation3 + $0x188] sm:$0xff] }
  0x2c   :  { %396 = vmatpush.msra.mxu0 %v242_v55  ;;  %416 = vmatpush.msra.mxu1 %v274_v56  ;;  %v351_v18 = vld [vmem:[#allocation3 + $0x398] sm:$0xff]  ;;  %v317_v39 = vld [vmem:[#allocation3 + $0x288] sm:$0xff] }
  0x2d   :  { %436 = vmatpush.msra.mxu2 %v306_v57  ;;  %459 = vmatpush.msra.mxu3 %v332_v58  ;;  %v247_v36 = vld [vmem:[#allocation3 + $0x58] sm:$0xff]  ;;  %v341_v40 = vld [vmem:[#allocation3 + $0x348] sm:$0xff] }
  0x2e   :  { %397 = vmatpush.msra.mxu0 %v240_v60  ;;  %417 = vmatpush.msra.mxu1 %v272_v61  ;;  %v245_v41 = vld [vmem:[#allocation3 + $0x48] sm:$0xff]  ;;  %v283_v42 = vld [vmem:[#allocation3 + $0x178] sm:$0xff] }
  0x2f   :  { %464 = vmatpush.msrb.mxu3 %v267_v59  ;;  %437 = vmatpush.msra.mxu2 %v304_v62  ;;  %v315_v43 = vld [vmem:[#allocation3 + $0x278] sm:$0xff]  ;;  %v281_v46 = vld [vmem:[#allocation3 + $0x168] sm:$0xff] }
  0x30   :  { %398 = vmatpush.msra.mxu0 %v238_v0  ;;  %418 = vmatpush.msra.mxu1 %v270_v1  ;;  %v339_v44 = vld [vmem:[#allocation3 + $0x338] sm:$0xff]  ;;  %v313_v47 = vld [vmem:[#allocation3 + $0x268] sm:$0xff] }
  0x31   :  { %465 = vmatpush.msrb.mxu3 %v265_v63  ;;  %438 = vmatpush.msra.mxu2 %v302_v2  ;;  %v243_v45 = vld [vmem:[#allocation3 + $0x38] sm:$0xff]  ;;  %v337_v48 = vld [vmem:[#allocation3 + $0x328] sm:$0xff] }
  0x32   :  { %399 = vmatpush.msra.mxu0 %v236_v4  ;;  %419 = vmatpush.msra.mxu1 %v268_v5  ;;  %v241_v49 = vld [vmem:[#allocation3 + $0x28] sm:$0xff]  ;;  %v279_v50 = vld [vmem:[#allocation3 + $0x158] sm:$0xff] }
  0x33   :  { %466 = vmatpush.msrb.mxu3 %v263_v3  ;;  %439 = vmatpush.msra.mxu2 %v300_v6  ;;  %v311_v51 = vld [vmem:[#allocation3 + $0x258] sm:$0xff]  ;;  %v1212_v52 = vld [vmem:[%s1571_s20 + $0x18] sm:$0xff]  ;;  %v89_v59 = vld [vmem:[%s1571_s20 + $0x10] sm:$0xff] }
  0x34   :  { %484 = vmatpush.msrb.mxu0 %v299_v8  ;;  %504 = vmatpush.msrb.mxu1 %v331_v9  ;;  %v335_v53 = vld [vmem:[#allocation3 + $0x318] sm:$0xff]  ;;  %v1217_v55 = vld [vmem:[%s1571_s20 + $0x38] sm:$0xff]  ;;  %v93_v62 = vld [vmem:[%s1571_s20 + $0x30] sm:$0xff]  ;;  %v102_v63 = vunpack.c.h.bf16 %v1212_v52  ;;  %v99_v8 = vunpack.c.l.bf16 %v89_v59 }
  0x35   :  { %467 = vmatpush.msrb.mxu3 %v261_v7  ;;  %528 = vmatpush.msrb.mxu2 %v355_v10  ;;  %v239_v54 = vld [vmem:[#allocation3 + $0x18] sm:$0xff]  ;;  %v277_v56 = vld [vmem:[#allocation3 + $0x148] sm:$0xff]  ;;  %v110_v0 = vunpack.c.h.bf16 %v1217_v55  ;;  %v107_v9 = vunpack.c.l.bf16 %v93_v62  ;;  %v108_v10 = vunpack.c.h.bf16 %v93_v62 }
  0x36   :  { %485 = vmatpush.msrb.mxu0 %v297_v12  ;;  %505 = vmatpush.msrb.mxu1 %v329_v13  ;;  %v309_v57 = vld [vmem:[#allocation3 + $0x248] sm:$0xff]  ;;  %v275_v3 = vld [vmem:[#allocation3 + $0x138] sm:$0xff] }
  0x37   :  { %468 = vmatpush.msrb.mxu3 %v259_v11  ;;  %529 = vmatpush.msrb.mxu2 %v353_v14  ;;  %v333_v60 = vld [vmem:[#allocation3 + $0x308] sm:$0xff]  ;;  %v307_v4 = vld [vmem:[#allocation3 + $0x238] sm:$0xff]  ;;  %v109_v14 = vunpack.c.l.bf16 %v1217_v55 }
  0x38   :  { %486 = vmatpush.msrb.mxu0 %v295_v16  ;;  %506 = vmatpush.msrb.mxu1 %v327_v17  ;;  %v237_v2 = vld [vmem:[#allocation3 + $0x8] sm:$0xff]  ;;  %v91_v7 = vld [vmem:[%s1571_s20 + $0x20] sm:$0xff]  ;;  %v92_v11 = vld [vmem:[%s1571_s20 + $0x28] sm:$0xff]  ;;  %v101_v16 = vunpack.c.l.bf16 %v1212_v52 }
  0x39   :  { %469 = vmatpush.msrb.mxu3 %v257_v15  ;;  %530 = vmatpush.msrb.mxu2 %v351_v18  ;;  %v273_v12 = vld [vmem:[#allocation3 + $0x128] sm:$0xff]  ;;  %v100_v15 = vunpack.c.h.bf16 %v89_v59  ;;  %v87_v18 = vld [vmem:[%s1571_s20] sm:$0xff] }
  0x3a   :  { %487 = vmatpush.msrb.mxu0 %v293_v20  ;;  %507 = vmatpush.msrb.mxu1 %v325_v21  ;;  %v305_v13 = vld [vmem:[#allocation3 + $0x228] sm:$0xff] }
  0x3b   :  { %470 = vmatpush.msrb.mxu3 %v255_v19  ;;  %531 = vmatpush.msrb.mxu2 %v349_v22  ;;  %v88_v19 = vld [vmem:[%s1571_s20 + $0x8] sm:$0xff]  ;;  %v103_v22 = vunpack.c.l.bf16 %v91_v7 }
  0x3c   :  { %488 = vmatpush.msrb.mxu0 %v291_v24  ;;  %508 = vmatpush.msrb.mxu1 %v323_v25  ;;  %v303_v24 = vld [vmem:[#allocation3 + $0x218] sm:$0xff]  ;;  %v104_v25 = vunpack.c.h.bf16 %v91_v7 }
  0x3d   :  { %471 = vmatpush.msrb.mxu3 %v253_v23  ;;  %532 = vmatpush.msrb.mxu2 %v347_v26  ;;  %v271_v23 = vld [vmem:[#allocation3 + $0x118] sm:$0xff]  ;;  %v105_v26 = vunpack.c.l.bf16 %v92_v11 }
  0x3e   :  { %489 = vmatpush.msrb.mxu0 %v289_v28  ;;  %509 = vmatpush.msrb.mxu1 %v321_v29  ;;  %v95_v29 = vunpack.c.l.bf16 %v87_v18 }
  0x3f   :  { %472 = vmatpush.msrb.mxu3 %v251_v27  ;;  %533 = vmatpush.msrb.mxu2 %v345_v30  ;;  %v106_v27 = vunpack.c.h.bf16 %v92_v11  ;;  %v96_v30 = vunpack.c.h.bf16 %v87_v18 }
  0x40   :  { %490 = vmatpush.msrb.mxu0 %v287_v32  ;;  %510 = vmatpush.msrb.mxu1 %v319_v33  ;;  %v98_v32 = vunpack.c.h.bf16 %v88_v19  ;;  %v269_v33 = vld [vmem:[#allocation3 + $0x108] sm:$0xff] }
  0x41   :  { %473 = vmatpush.msrb.mxu3 %v249_v31  ;;  %534 = vmatpush.msrb.mxu2 %v343_v35  ;;  %v97_v31 = vunpack.c.l.bf16 %v88_v19 }
  0x42   :  { %491 = vmatpush.msrb.mxu0 %v285_v37  ;;  %511 = vmatpush.msrb.mxu1 %v317_v39 }
  0x43   :  { %474 = vmatpush.msrb.mxu3 %v247_v36  ;;  %535 = vmatpush.msrb.mxu2 %v341_v40 }
  0x44   :  { %492 = vmatpush.msrb.mxu0 %v283_v42  ;;  %512 = vmatpush.msrb.mxu1 %v315_v43 }
  0x45   :  { %475 = vmatpush.msrb.mxu3 %v245_v41  ;;  %536 = vmatpush.msrb.mxu2 %v339_v44 }
  0x46   :  { %493 = vmatpush.msrb.mxu0 %v281_v46  ;;  %513 = vmatpush.msrb.mxu1 %v313_v47 }
  0x47   :  { %476 = vmatpush.msrb.mxu3 %v243_v45  ;;  %537 = vmatpush.msrb.mxu2 %v337_v48 }
  0x48   :  { %494 = vmatpush.msrb.mxu0 %v279_v50  ;;  %514 = vmatpush.msrb.mxu1 %v311_v51 }
  0x49   :  { %477 = vmatpush.msrb.mxu3 %v241_v49  ;;  %538 = vmatpush.msrb.mxu2 %v335_v53 }
  0x4a   :  { %495 = vmatpush.msrb.mxu0 %v277_v56  ;;  %515 = vmatpush.msrb.mxu1 %v309_v57 }
  0x4b   :  { %478 = vmatpush.msrb.mxu3 %v239_v54  ;;  %539 = vmatpush.msrb.mxu2 %v333_v60 }
  0x4c   :  { %496 = vmatpush.msrb.mxu0 %v275_v3  ;;  %516 = vmatpush.msrb.mxu1 %v307_v4 }
  0x4d   :  { %479 = vmatpush.msrb.mxu3 %v237_v2 }
  0x4e   :  { %497 = vmatpush.msrb.mxu0 %v273_v12  ;;  %517 = vmatpush.msrb.mxu1 %v305_v13 }
  0x50   :  { %498 = vmatpush.msrb.mxu0 %v271_v23  ;;  %518 = vmatpush.msrb.mxu1 %v303_v24 }
  0x52   :  { %499 = vmatpush.msrb.mxu0 %v269_v33 }
  0x75   :  { %v124_v1 = vpop.permute.xlu2 %123 }
  0x76   :  { %v145_v17 = vmul.f32 %v124_v1, %v102_v63  ;;  %v142_v28 = vmul.f32 %v124_v1, %v99_v8  ;;  %v143_v36 = vmul.f32 %v124_v1, %v100_v15  ;;  %v144_v37 = vmul.f32 %v124_v1, %v101_v16 }
  0x82   :  { %v218_v34 = vpop.xlane.xlu0 %217 }
  0x83   :  { %v219_v38 = vmax.f32 %v218_v34, 1.0  ;;  %v301_v34 = vld [vmem:[#allocation3 + $0x208] sm:$0xff] }
  0x84   :  { %519 = vmatpush.msrb.mxu1 %v301_v34 }
  0x85   :  { %1039 = vrcp.f32 %v219_v38 }
  0x8b   :  { %v1040_v58 = vpop.eup %1039 }
  0x8c   :  { %v221_v61 = vmul.f32 %v1040_v58, %v219_v38  ;;  %v177_v38 = vsel %vm175_vm1, %v145_v17, 0.0 }
  0x8d   :  { %v137_v6 = vpop.permute.xlu1 %136 }
  0x8e   :  { %v222_v5 = vsub.f32 2.0, %v221_v61  ;;  %v153_v21 = vmul.f32 %v137_v6, %v110_v0  ;;  %v150_v35 = vmul.f32 %v137_v6, %v107_v9  ;;  %v151_v39 = vmul.f32 %v137_v6, %v108_v10 }
  0x8f   :  { %v152_v40 = vmul.f32 %v137_v6, %v109_v14 }
  0x90   :  { %v1241_v20 = vmul.f32 %v1040_v58, %v222_v5  ;;  %v207_v42 = vsel %vm175_vm1, %v153_v21, 0.0 }
  0x92   :  { %v1246_v43 = vrot.slane %v1241_v20, 1 }
  0x95   :  { %v131_v41 = vpop.permute.xlu0 %130 }
  0x96   :  { %v146_v44 = vmul.f32 %v131_v41, %v103_v22  ;;  %v147_v45 = vmul.f32 %v131_v41, %v104_v25  ;;  %v148_v46 = vmul.f32 %v131_v41, %v105_v26  ;;  %v149_v47 = vmul.f32 %v131_v41, %v106_v27 }
  0x98   :  { %v185_v53 = vadd.f32 %v150_v35, %v146_v44  ;;  %v192_v54 = vadd.f32 %v151_v39, %v147_v45  ;;  %v199_v55 = vadd.f32 %v152_v40, %v148_v46  ;;  %v206_v56 = vsel %vm175_vm1, %v149_v47, 0.0 }
  0x99   :  { %v208_v57 = vadd.f32 %v207_v42, %v206_v56  ;;  %v544_v42 = vld [vmem:[%s1554_s2] sm:$0x3f] }
  0x9a   :  { %v186_v61 = vrot.slane %v185_v53, 4  ;;  %v193_v62 = vrot.slane %v192_v54, 4  ;;  %v200_v63 = vrot.slane %v199_v55, 4  ;;  %648 = vst [vmem:[#allocation1] ss:$4 sm:$0xff] %v544_v42  ;;  %v617_v42 = vld [vmem:[#allocation5 + $0x240] sm:$0xff] }
  0x9b   :  { %v209_v1 = vrot.slane %v208_v57, 4 }
  0x9c   :  { %v187_v5 = vadd.f32 %v186_v61, %v185_v53  ;;  %v194_v6 = vadd.f32 %v193_v62, %v192_v54  ;;  %v201_v7 = vadd.f32 %v200_v63, %v199_v55  ;;  %v639_v61 = vld [vmem:[#allocation5 + $0x2f0] sm:$0xff] }
  0x9d   :  { %v118_v48 = vpop.permute.xlu1 %117  ;;  %v210_v9 = vadd.f32 %v209_v1, %v208_v57  ;;  %v575_v1 = vld [vmem:[#allocation5 + $0xf0] sm:$0xff] }
  0x9e   :  { %v138_v49 = vmul.f32 %v118_v48, %v95_v29  ;;  %v139_v50 = vmul.f32 %v118_v48, %v96_v30  ;;  %v140_v51 = vmul.f32 %v118_v48, %v97_v31  ;;  %v141_v52 = vmul.f32 %v118_v48, %v98_v32 }
  0x9f   :  { %v188_v13 = vrot.slane %v187_v5, 2  ;;  %v195_v14 = vrot.slane %v194_v6, 2  ;;  %v202_v15 = vrot.slane %v201_v7, 2  ;;  %v211_v17 = vrot.slane %v210_v9, 2 }
  0xa0   :  { %v154_v58 = vadd.f32 %v142_v28, %v138_v49  ;;  %v161_v59 = vadd.f32 %v143_v36, %v139_v50  ;;  %v168_v60 = vadd.f32 %v144_v37, %v140_v51  ;;  %v176_v0 = vsel %vm175_vm1, %v141_v52, 0.0 }
  0xa1   :  { %v178_v8 = vadd.f32 %v177_v38, %v176_v0  ;;  %v189_v23 = vadd.f32 %v188_v13, %v187_v5  ;;  %v196_v24 = vadd.f32 %v195_v14, %v194_v6  ;;  %v203_v25 = vadd.f32 %v202_v15, %v201_v7  ;;  %v573_v5 = vld [vmem:[#allocation5 + $0xe0] sm:$0xff]  ;;  %v635_v7 = vld [vmem:[#allocation5 + $0x2d0] sm:$0xff] }
  0xa2   :  { %v155_v2 = vrot.slane %v154_v58, 4  ;;  %v162_v3 = vrot.slane %v161_v59, 4  ;;  %v169_v4 = vrot.slane %v168_v60, 4  ;;  %v212_v26 = vadd.f32 %v211_v17, %v210_v9  ;;  %v605_v6 = vld [vmem:[#allocation5 + $0x1e0] sm:$0xff]  ;;  %v603_v9 = vld [vmem:[#allocation5 + $0x1d0] sm:$0xff] }
  0xa3   :  { %v179_v16 = vrot.slane %v178_v8, 4  ;;  %v190_v31 = vrot.slane %v189_v23, 1  ;;  %v197_v32 = vrot.slane %v196_v24, 1  ;;  %v204_v33 = vrot.slane %v203_v25, 1  ;;  %v601_v13 = vld [vmem:[#allocation5 + $0x1c0] sm:$0xff]  ;;  %v631_v14 = vld [vmem:[#allocation5 + $0x2b0] sm:$0xff] }
  0xa4   :  { %v156_v10 = vadd.f32 %v155_v2, %v154_v58  ;;  %v163_v11 = vadd.f32 %v162_v3, %v161_v59  ;;  %v170_v12 = vadd.f32 %v169_v4, %v168_v60  ;;  %v213_v37 = vrot.slane %v212_v26, 1  ;;  %v607_v3 = vld [vmem:[#allocation5 + $0x1f0] sm:$0xff]  ;;  %v637_v4 = vld [vmem:[#allocation5 + $0x2e0] sm:$0xff] }
  0xa5   :  { %v180_v22 = vadd.f32 %v179_v16, %v178_v8  ;;  %v191_v38 = vadd.f32 %v190_v31, %v189_v23  ;;  %v198_v39 = vadd.f32 %v197_v32, %v196_v24  ;;  %v205_v40 = vadd.f32 %v204_v33, %v203_v25  ;;  %v571_v8 = vld [vmem:[#allocation5 + $0xd0] sm:$0xff]  ;;  %v565_v15 = vld [vmem:[#allocation5 + $0xa0] sm:$0xff]  ;;  %v572_v23 = vld [vmem:[#allocation5 + $0xd8] sm:$0xff] }
  0xa6   :  { %v157_v18 = vrot.slane %v156_v10, 2  ;;  %v164_v19 = vrot.slane %v163_v11, 2  ;;  %v171_v21 = vrot.slane %v170_v12, 2  ;;  %v214_v47 = vadd.f32 %v213_v37, %v212_v26  ;;  %v599_v16 = vld [vmem:[#allocation5 + $0x1b0] sm:$0xff]  ;;  %v629_v17 = vld [vmem:[#allocation5 + $0x2a0] sm:$0xff]  ;;  %v568_v31 = vld [vmem:[#allocation5 + $0xb8] sm:$0xff] }
  0xa7   :  { %v181_v30 = vrot.slane %v180_v22, 2  ;;  %v232_v48 = vmul.f32 %v1246_v43, %v191_v38  ;;  %v233_v49 = vmul.f32 %v1246_v43, %v198_v39  ;;  %v234_v50 = vmul.f32 %v1246_v43, %v205_v40  ;;  %v561_v24 = vld [vmem:[#allocation5 + $0x80] sm:$0xff]  ;;  %v595_v25 = vld [vmem:[#allocation5 + $0x190] sm:$0xff]  ;;  %v564_v39 = vld [vmem:[#allocation5 + $0x98] sm:$0xff] }
  0xa8   :  { %v158_v27 = vadd.f32 %v157_v18, %v156_v10  ;;  %v165_v28 = vadd.f32 %v164_v19, %v163_v11  ;;  %v172_v29 = vadd.f32 %v171_v21, %v170_v12  ;;  %v235_v55 = vmul.f32 %v1246_v43, %v214_v47  ;;  %v576_v10 = vld [vmem:[#allocation5 + $0xf8] sm:$0xff]  ;;  %v569_v11 = vld [vmem:[#allocation5 + $0xc0] sm:$0xff]  ;;  %v567_v12 = vld [vmem:[#allocation5 + $0xb0] sm:$0xff] }
  0xa9   :  { %v182_v41 = vadd.f32 %v181_v30, %v180_v22  ;;  %v370_v56 = vrot.slane %v232_v48, 7  ;;  %v373_v57 = vrot.slane %v233_v49, 7  ;;  %v375_v58 = vrot.slane %v234_v50, 7  ;;  %v574_v18 = vld [vmem:[#allocation5 + $0xe8] sm:$0xff]  ;;  %v563_v19 = vld [vmem:[#allocation5 + $0x90] sm:$0xff]  ;;  %v597_v21 = vld [vmem:[#allocation5 + $0x1a0] sm:$0xff] }
  0xaa   :  { %v159_v34 = vrot.slane %v158_v27, 1  ;;  %v166_v35 = vrot.slane %v165_v28, 1  ;;  %v173_v36 = vrot.slane %v172_v29, 1  ;;  %v377_v60 = vrot.slane %v235_v55, 7  ;;  %v627_v22 = vld [vmem:[#allocation5 + $0x290] sm:$0xff]  ;;  %v625_v26 = vld [vmem:[#allocation5 + $0x280] sm:$0xff] }
  0xab   :  { %v183_v51 = vrot.slane %v182_v41, 1  ;;  %v623_v30 = vld [vmem:[#allocation5 + $0x270] sm:$0xff]  ;;  %v557_v32 = vld [vmem:[#allocation5 + $0x60] sm:$0xff]  ;;  %v560_v48 = vld [vmem:[#allocation5 + $0x78] sm:$0xff] }
  0xac   :  { %v160_v44 = vadd.f32 %v159_v34, %v158_v27  ;;  %v167_v45 = vadd.f32 %v166_v35, %v165_v28  ;;  %v174_v46 = vadd.f32 %v173_v36, %v172_v29  ;;  %v570_v27 = vld [vmem:[#allocation5 + $0xc8] sm:$0xff]  ;;  %v559_v28 = vld [vmem:[#allocation5 + $0x70] sm:$0xff]  ;;  %v593_v29 = vld [vmem:[#allocation5 + $0x180] sm:$0xff] }
  0xad   :  { %v184_v59 = vadd.f32 %v183_v51, %v182_v41  ;;  %v591_v33 = vld [vmem:[#allocation5 + $0x170] sm:$0xff]  ;;  %v621_v34 = vld [vmem:[#allocation5 + $0x260] sm:$0xff]  ;;  %v566_v35 = vld [vmem:[#allocation5 + $0xa8] sm:$0xff] }
  0xae   :  { %v228_v52 = vmul.f32 %v1241_v20, %v160_v44  ;;  %v229_v53 = vmul.f32 %v1241_v20, %v167_v45  ;;  %v230_v54 = vmul.f32 %v1241_v20, %v174_v46  ;;  %v555_v36 = vld [vmem:[#allocation5 + $0x50] sm:$0xff]  ;;  %v589_v37 = vld [vmem:[#allocation5 + $0x160] sm:$0xff]  ;;  %v562_v44 = vld [vmem:[#allocation5 + $0x88] sm:$0xff] }
  0xaf   :  { %v231_v2 = vmul.f32 %v1241_v20, %v184_v59  ;;  %v633_v20 = vld [vmem:[#allocation5 + $0x2c0] sm:$0xff]  ;;  %v619_v38 = vld [vmem:[#allocation5 + $0x250] sm:$0xff] }
  0xb0   :  { %v372_v62 = vsel %vm371_vm2, %v370_v56, %v228_v52  ;;  %v374_v63 = vsel %vm371_vm2, %v373_v57, %v229_v53  ;;  %v376_v0 = vsel %vm371_vm2, %v375_v58, %v230_v54  ;;  %v553_v40 = vld [vmem:[#allocation5 + $0x40] sm:$0xff]  ;;  %v587_v41 = vld [vmem:[#allocation5 + $0x150] sm:$0xff]  ;;  %v558_v52 = vld [vmem:[#allocation5 + $0x68] sm:$0xff] }
  0xb1   :  { %400 = vmatmul.f32.vlgmr.msra.gmra.mxu0 %v372_v62  ;;  %420 = vmatmul.f32.vlgmr.msra.gmra.mxu1 %v374_v63  ;;  %v378_v43 = vsel %vm371_vm2, %v377_v60, %v231_v2  ;;  %v551_v45 = vld [vmem:[#allocation5 + $0x30] sm:$0xff]  ;;  %v585_v46 = vld [vmem:[#allocation5 + $0x140] sm:$0xff]  ;;  %v556_v56 = vld [vmem:[#allocation5 + $0x58] sm:$0xff] }
  0xb2   :  { %440 = vmatmul.f32.vlgmr.msra.gmra.mxu2 %v376_v0  ;;  %695 = vmatpush.msra.mxu0 %v639_v61  ;;  %v615_v47 = vld [vmem:[#allocation5 + $0x230] sm:$0xff]  ;;  %v549_v49 = vld [vmem:[#allocation5 + $0x20] sm:$0xff]  ;;  %v608_v61 = vld [vmem:[#allocation5 + $0x1f8] sm:$0xff] }
  0xb3   :  { %655 = vmatpush.msra.mxu2 %v575_v1  ;;  %1022 = vmatmul.msk.f32.vlgmr.msra.gmra.mxu3 %vm175_vm1, %v378_v43  ;;  %v583_v50 = vld [vmem:[#allocation5 + $0x130] sm:$0xff]  ;;  %v613_v51 = vld [vmem:[#allocation5 + $0x220] sm:$0xff]  ;;  %v606_v1 = vld [vmem:[#allocation5 + $0x1e8] sm:$0xff] }
  0xb4   :  { %675 = vmatpush.msra.mxu3 %v607_v3  ;;  %696 = vmatpush.msra.mxu0 %v637_v4  ;;  %v547_v53 = vld [vmem:[#allocation5 + $0x10] sm:$0xff]  ;;  %v581_v54 = vld [vmem:[#allocation5 + $0x120] sm:$0xff]  ;;  %v640_v2 = vld [vmem:[#allocation5 + $0x2f8] sm:$0xff] }
  0xb5   :  { %656 = vmatpush.msra.mxu2 %v573_v5  ;;  %715 = vmatpush.msra.mxu1 %v576_v10  ;;  %v611_v55 = vld [vmem:[#allocation5 + $0x210] sm:$0xff]  ;;  %v545_v57 = vld [vmem:[#allocation5] sm:$0xff]  ;;  %v554_v3 = vld [vmem:[#allocation5 + $0x48] sm:$0xff] }
  0xb6   :  { %676 = vmatpush.msra.mxu3 %v605_v6  ;;  %697 = vmatpush.msra.mxu0 %v635_v7  ;;  %v579_v58 = vld [vmem:[#allocation5 + $0x110] sm:$0xff]  ;;  %v609_v60 = vld [vmem:[#allocation5 + $0x200] sm:$0xff]  ;;  %v604_v4 = vld [vmem:[#allocation5 + $0x1d8] sm:$0xff] }
  0xb7   :  { %657 = vmatpush.msra.mxu2 %v571_v8  ;;  %716 = vmatpush.msra.mxu1 %v574_v18  ;;  %v649_v59 = vld.sshfl [vmem:[#allocation1] sm:$0xff pattern:$0x73625140]  ;;  %v602_v6 = vld [vmem:[#allocation5 + $0x1c8] sm:$0xff] }
  0xb8   :  { %677 = vmatpush.msra.mxu3 %v603_v9  ;;  %698 = vmatpush.msra.mxu0 %v633_v20  ;;  %v552_v5 = vld [vmem:[#allocation5 + $0x38] sm:$0xff]  ;;  %v550_v8 = vld [vmem:[#allocation5 + $0x28] sm:$0xff] }
  0xb9   :  { %658 = vmatpush.msra.mxu2 %v569_v11  ;;  %500 = vmatmul.f32.vlgmr.msrb.gmra.mxu0 %v374_v63  ;;  %v1267_v63 = vld.sshfl [vmem:[#allocation1 + $0x8] sm:$0xff pattern:$0x73625140]  ;;  %v634_v20 = vld [vmem:[#allocation5 + $0x2c8] sm:$0xff] }
  0xba   :  { %520 = vmatmul.f32.vlgmr.msrb.gmra.mxu1 %v376_v0  ;;  %1023 = vmatmul.msk.f32.vlgmr.msrb.gmra.mxu2 %vm175_vm1, %v378_v43  ;;  %v1269_v0 = vld.sshfl [vmem:[#allocation1 + $0x10] sm:$0xff pattern:$0x73625140]  ;;  %v636_v7 = vld [vmem:[#allocation5 + $0x2d8] sm:$0xff]  ;;  %v792_v18 = vld [vmem:[%s1559_s7 + $0x78] sm:$0xff] }
  0xbb   :  { %659 = vmatpush.msra.mxu2 %v567_v12  ;;  %678 = vmatpush.msra.mxu3 %v601_v13  ;;  %v638_v43 = vld [vmem:[#allocation5 + $0x2e8] sm:$0xff]  ;;  %v600_v9 = vld [vmem:[#allocation5 + $0x1b8] sm:$0xff] }
  0xbc   :  { %480 = vmatmul.f32.vlgmr.msrb.gmra.mxu3 %v372_v62  ;;  %699 = vmatpush.msra.mxu0 %v631_v14  ;;  %v577_v62 = vld [vmem:[#allocation5 + $0x100] sm:$0xff]  ;;  %v548_v10 = vld [vmem:[#allocation5 + $0x18] sm:$0xff]  ;;  %v598_v11 = vld [vmem:[#allocation5 + $0x1a8] sm:$0xff] }
  0xbd   :  { %660 = vmatpush.msra.mxu2 %v565_v15  ;;  %679 = vmatpush.msra.mxu3 %v599_v16  ;;  %v632_v12 = vld [vmem:[#allocation5 + $0x2b8] sm:$0xff]  ;;  %v546_v13 = vld [vmem:[#allocation5 + $0x8] sm:$0xff] }
  0xbe   :  { %700 = vmatpush.msra.mxu0 %v629_v17  ;;  %717 = vmatpush.msra.mxu1 %v572_v23  ;;  %v596_v14 = vld [vmem:[#allocation5 + $0x198] sm:$0xff]  ;;  %v630_v15 = vld [vmem:[#allocation5 + $0x2a8] sm:$0xff] }
  0xbf   :  { %661 = vmatpush.msra.mxu2 %v563_v19  ;;  %680 = vmatpush.msra.mxu3 %v597_v21  ;;  %v594_v16 = vld [vmem:[#allocation5 + $0x188] sm:$0xff]  ;;  %v628_v17 = vld [vmem:[#allocation5 + $0x298] sm:$0xff] }
  0xc0   :  { %701 = vmatpush.msra.mxu0 %v627_v22  ;;  %718 = vmatpush.msra.mxu1 %v570_v27  ;;  %v592_v19 = vld [vmem:[#allocation5 + $0x178] sm:$0xff]  ;;  %v626_v21 = vld [vmem:[#allocation5 + $0x288] sm:$0xff] }
  0xc1   :  { %662 = vmatpush.msra.mxu2 %v561_v24  ;;  %681 = vmatpush.msra.mxu3 %v595_v25  ;;  %v791_v22 = vld [vmem:[%s1559_s7 + $0x70] sm:$0xff]  ;;  %v624_v24 = vld [vmem:[#allocation5 + $0x278] sm:$0xff] }
  0xc2   :  { %702 = vmatpush.msra.mxu0 %v625_v26  ;;  %719 = vmatpush.msra.mxu1 %v568_v31  ;;  %v590_v23 = vld [vmem:[#allocation5 + $0x168] sm:$0xff]  ;;  %v790_v25 = vld [vmem:[%s1559_s7 + $0x68] sm:$0xff] }
  0xc3   :  { %663 = vmatpush.msra.mxu2 %v559_v28  ;;  %682 = vmatpush.msra.mxu3 %v593_v29  ;;  %v588_v26 = vld [vmem:[#allocation5 + $0x158] sm:$0xff]  ;;  %v622_v27 = vld [vmem:[#allocation5 + $0x268] sm:$0xff] }
  0xc4   :  { %703 = vmatpush.msra.mxu0 %v623_v30  ;;  %720 = vmatpush.msra.mxu1 %v566_v35  ;;  %v789_v28 = vld [vmem:[%s1559_s7 + $0x60] sm:$0xff]  ;;  %v586_v29 = vld [vmem:[#allocation5 + $0x148] sm:$0xff] }
  0xc5   :  { %664 = vmatpush.msra.mxu2 %v557_v32  ;;  %683 = vmatpush.msra.mxu3 %v591_v33  ;;  %v620_v30 = vld [vmem:[#allocation5 + $0x258] sm:$0xff]  ;;  %v618_v32 = vld [vmem:[#allocation5 + $0x248] sm:$0xff] }
  0xc6   :  { %704 = vmatpush.msra.mxu0 %v621_v34  ;;  %721 = vmatpush.msra.mxu1 %v564_v39  ;;  %v584_v31 = vld [vmem:[#allocation5 + $0x138] sm:$0xff]  ;;  %v582_v33 = vld [vmem:[#allocation5 + $0x128] sm:$0xff] }
  0xc7   :  { %665 = vmatpush.msra.mxu2 %v555_v36  ;;  %684 = vmatpush.msra.mxu3 %v589_v37  ;;  %v616_v34 = vld [vmem:[#allocation5 + $0x238] sm:$0xff]  ;;  %v614_v36 = vld [vmem:[#allocation5 + $0x228] sm:$0xff] }
  0xc8   :  { %705 = vmatpush.msra.mxu0 %v619_v38  ;;  %722 = vmatpush.msra.mxu1 %v562_v44  ;;  %v580_v35 = vld [vmem:[#allocation5 + $0x118] sm:$0xff]  ;;  %v578_v37 = vld [vmem:[#allocation5 + $0x108] sm:$0xff] }
  0xc9   :  { %666 = vmatpush.msra.mxu2 %v553_v40  ;;  %685 = vmatpush.msra.mxu3 %v587_v41  ;;  %v612_v38 = vld [vmem:[#allocation5 + $0x218] sm:$0xff]  ;;  %v610_v39 = vld [vmem:[#allocation5 + $0x208] sm:$0xff] }
  0xca   :  { %706 = vmatpush.msra.mxu0 %v617_v42  ;;  %723 = vmatpush.msra.mxu1 %v560_v48  ;;  %v868_v40 = vld [vmem:[%s1561_s9 + $0x78] sm:$0xff]  ;;  %v867_v41 = vld [vmem:[%s1561_s9 + $0x70] sm:$0xff]  ;;  %v866_v42 = vld [vmem:[%s1561_s9 + $0x68] sm:$0xff] }
  0xcb   :  { %667 = vmatpush.msra.mxu2 %v551_v45  ;;  %686 = vmatpush.msra.mxu3 %v585_v46  ;;  %v865_v44 = vld [vmem:[%s1561_s9 + $0x60] sm:$0xff]  ;;  %v864_v45 = vld [vmem:[%s1561_s9 + $0x58] sm:$0xff]  ;;  %v863_v46 = vld [vmem:[%s1561_s9 + $0x50] sm:$0xff] }
  0xcc   :  { %707 = vmatpush.msra.mxu0 %v615_v47  ;;  %724 = vmatpush.msra.mxu1 %v558_v52  ;;  %v862_v47 = vld [vmem:[%s1561_s9 + $0x48] sm:$0xff]  ;;  %v861_v48 = vld [vmem:[%s1561_s9 + $0x40] sm:$0xff] }
  0xcd   :  { %668 = vmatpush.msra.mxu2 %v549_v49  ;;  %687 = vmatpush.msra.mxu3 %v583_v50  ;;  %v860_v49 = vld [vmem:[%s1561_s9 + $0x38] sm:$0xff]  ;;  %v859_v50 = vld [vmem:[%s1561_s9 + $0x30] sm:$0xff]  ;;  %v858_v52 = vld [vmem:[%s1561_s9 + $0x28] sm:$0xff] }
  0xce   :  { %708 = vmatpush.msra.mxu0 %v613_v51  ;;  %725 = vmatpush.msra.mxu1 %v556_v56  ;;  %v788_v51 = vld [vmem:[%s1559_s7 + $0x58] sm:$0xff] }
  0xcf   :  { %669 = vmatpush.msra.mxu2 %v547_v53  ;;  %688 = vmatpush.msra.mxu3 %v581_v54  ;;  %v787_v53 = vld [vmem:[%s1559_s7 + $0x50] sm:$0xff]  ;;  %v857_v54 = vld [vmem:[%s1561_s9 + $0x20] sm:$0xff]  ;;  %v856_v56 = vld [vmem:[%s1561_s9 + $0x18] sm:$0xff] }
  0xd0   :  { %709 = vmatpush.msra.mxu0 %v611_v55  ;;  %726 = vmatpush.msra.mxu1 %v554_v3  ;;  %v786_v55 = vld [vmem:[%s1559_s7 + $0x48] sm:$0xff] }
  0xd1   :  { %670 = vmatpush.msra.mxu2 %v545_v57  ;;  %689 = vmatpush.msra.mxu3 %v579_v58  ;;  %v785_v57 = vld [vmem:[%s1559_s7 + $0x40] sm:$0xff]  ;;  %v855_v58 = vld [vmem:[%s1561_s9 + $0x10] sm:$0xff]  ;;  %v778_v3 = vld [vmem:[%s1559_s7 + $0x8] sm:$0xff] }
  0xd2   :  { %671 = vmatmul.f32.vlgmr.msra.gmra.mxu2 %v649_v59  ;;  %710 = vmatpush.msra.mxu0 %v609_v60  ;;  %v854_v60 = vld [vmem:[%s1561_s9 + $0x8] sm:$0xff] }
  0xd3   :  { %735 = vmatpush.msrb.mxu2 %v608_v61  ;;  %690 = vmatpush.msra.mxu3 %v577_v62  ;;  %v783_v61 = vld [vmem:[%s1559_s7 + $0x30] sm:$0xff]  ;;  %v853_v62 = vld [vmem:[%s1561_s9] sm:$0xff] }
  0xd4   :  { %691 = vmatmul.f32.vlgmr.msra.gmra.mxu3 %v1267_v63  ;;  %711 = vmatmul.f32.vlgmr.msra.gmra.mxu0 %v1269_v0 }
  0xd5   :  { %736 = vmatpush.msrb.mxu2 %v606_v1  ;;  %755 = vmatpush.msrb.mxu3 %v640_v2  ;;  %v780_v1 = vld [vmem:[%s1559_s7 + $0x18] sm:$0xff]  ;;  %v779_v2 = vld [vmem:[%s1559_s7 + $0x10] sm:$0xff] }
  0xd6   :  { %727 = vmatpush.msra.mxu1 %v552_v5  ;;  %813 = vmatpush.msrb.mxu0 %v792_v18  ;;  %v883_v5 = vld [vmem:[%s1561_s9 + $0xf0] sm:$0xff] }
  0xd7   :  { %737 = vmatpush.msrb.mxu2 %v604_v4  ;;  %756 = vmatpush.msrb.mxu3 %v638_v43  ;;  %v777_v4 = vld [vmem:[%s1559_s7] sm:$0xff]  ;;  %v884_v43 = vld [vmem:[%s1561_s9 + $0xf8] sm:$0xff] }
  0xd8   :  { %728 = vmatpush.msra.mxu1 %v550_v8  ;;  %814 = vmatpush.msrb.mxu0 %v791_v22  ;;  %v881_v8 = vld [vmem:[%s1561_s9 + $0xe0] sm:$0xff] }
  0xd9   :  { %738 = vmatpush.msrb.mxu2 %v602_v6  ;;  %757 = vmatpush.msrb.mxu3 %v636_v7  ;;  %v1380_v6 = vld [vmem:[%s1556_s4] sm:$0x3]  ;;  %v882_v7 = vld [vmem:[%s1561_s9 + $0xe8] sm:$0xff] }
  0xda   :  { %729 = vmatpush.msra.mxu1 %v548_v10  ;;  %815 = vmatpush.msrb.mxu0 %v790_v25  ;;  %v808_v25 = vld [vmem:[%s1559_s7 + $0xf8] sm:$0xff] }
  0xdb   :  { %739 = vmatpush.msrb.mxu2 %v600_v9  ;;  %758 = vmatpush.msrb.mxu3 %v634_v20  ;;  %v358_v9 = vperm.slane %v1380_v6, 0  ;;  %v880_v20 = vld [vmem:[%s1561_s9 + $0xd8] sm:$0xff] }
  0xdc   :  { %730 = vmatpush.msra.mxu1 %v546_v13  ;;  %816 = vmatpush.msrb.mxu0 %v789_v28  ;;  %v878_v13 = vld [vmem:[%s1561_s9 + $0xc8] sm:$0xff]  ;;  %v872_v28 = vld [vmem:[%s1561_s9 + $0x98] sm:$0xff] }
  0xdd   :  { %740 = vmatpush.msrb.mxu2 %v598_v11  ;;  %759 = vmatpush.msrb.mxu3 %v632_v12  ;;  %v879_v11 = vld [vmem:[%s1561_s9 + $0xd0] sm:$0xff] }
  0xde   :  { %731 = vmatmul.f32.vlgmr.msra.gmra.mxu1 %v649_v59  ;;  %817 = vmatpush.msrb.mxu0 %v788_v51  ;;  %v784_v59 = vld [vmem:[%s1559_s7 + $0x38] sm:$0xff] }
  0xdf   :  { %741 = vmatpush.msrb.mxu2 %v596_v14  ;;  %760 = vmatpush.msrb.mxu3 %v630_v15 }
  0xe0   :  { %818 = vmatpush.msrb.mxu0 %v787_v53  ;;  %833 = vmatpush.msrb.mxu1 %v808_v25 }
  0xe1   :  { %742 = vmatpush.msrb.mxu2 %v594_v16  ;;  %761 = vmatpush.msrb.mxu3 %v628_v17  ;;  %v877_v17 = vld [vmem:[%s1561_s9 + $0xc0] sm:$0xff] }
  0xe2   :  { %819 = vmatpush.msrb.mxu0 %v786_v55 }
  0xe3   :  { %743 = vmatpush.msrb.mxu2 %v592_v19  ;;  %762 = vmatpush.msrb.mxu3 %v626_v21  ;;  %v876_v21 = vld [vmem:[%s1561_s9 + $0xb8] sm:$0xff] }
  0xe4   :  { %820 = vmatpush.msrb.mxu0 %v785_v57  ;;  %v794_v57 = vld [vmem:[%s1559_s7 + $0x88] sm:$0xff] }
  0xe5   :  { %744 = vmatpush.msrb.mxu2 %v590_v23  ;;  %763 = vmatpush.msrb.mxu3 %v624_v24  ;;  %v875_v23 = vld [vmem:[%s1561_s9 + $0xb0] sm:$0xff]  ;;  %v874_v24 = vld [vmem:[%s1561_s9 + $0xa8] sm:$0xff] }
  0xe6   :  { %821 = vmatpush.msrb.mxu0 %v784_v59  ;;  %v793_v59 = vld [vmem:[%s1559_s7 + $0x80] sm:$0xff] }
  0xe7   :  { %745 = vmatpush.msrb.mxu2 %v588_v26  ;;  %764 = vmatpush.msrb.mxu3 %v622_v27  ;;  %v873_v26 = vld [vmem:[%s1561_s9 + $0xa0] sm:$0xff]  ;;  %v807_v27 = vld [vmem:[%s1559_s7 + $0xf0] sm:$0xff] }
  0xe8   :  { %822 = vmatpush.msrb.mxu0 %v783_v61  ;;  %834 = vmatpush.msrb.mxu1 %v807_v27 }
  0xe9   :  { %746 = vmatpush.msrb.mxu2 %v586_v29  ;;  %765 = vmatpush.msrb.mxu3 %v620_v30  ;;  %v806_v29 = vld [vmem:[%s1559_s7 + $0xe8] sm:$0xff]  ;;  %v871_v30 = vld [vmem:[%s1561_s9 + $0x90] sm:$0xff] }
  0xea   :  { %835 = vmatpush.msrb.mxu1 %v806_v29  ;;  %v970_v29 = vld [vmem:[%s1564_s12 + $0x18] sm:$0xff] }
  0xeb   :  { %747 = vmatpush.msrb.mxu2 %v584_v31  ;;  %766 = vmatpush.msrb.mxu3 %v618_v32  ;;  %v805_v31 = vld [vmem:[%s1559_s7 + $0xe0] sm:$0xff]  ;;  %v870_v32 = vld [vmem:[%s1561_s9 + $0x88] sm:$0xff] }
  0xec   :  { %836 = vmatpush.msrb.mxu1 %v805_v31  ;;  %v968_v31 = vld [vmem:[%s1564_s12 + $0x8] sm:$0xff] }
  0xed   :  { %748 = vmatpush.msrb.mxu2 %v582_v33  ;;  %767 = vmatpush.msrb.mxu3 %v616_v34  ;;  %v804_v33 = vld [vmem:[%s1559_s7 + $0xd8] sm:$0xff]  ;;  %v869_v34 = vld [vmem:[%s1561_s9 + $0x80] sm:$0xff] }
  0xee   :  { %837 = vmatpush.msrb.mxu1 %v804_v33 }
  0xef   :  { %749 = vmatpush.msrb.mxu2 %v580_v35  ;;  %768 = vmatpush.msrb.mxu3 %v614_v36  ;;  %v803_v35 = vld [vmem:[%s1559_s7 + $0xd0] sm:$0xff]  ;;  %v802_v36 = vld [vmem:[%s1559_s7 + $0xc8] sm:$0xff] }
  0xf0   :  { %838 = vmatpush.msrb.mxu1 %v803_v35 }
  0xf1   :  { %750 = vmatpush.msrb.mxu2 %v578_v37  ;;  %769 = vmatpush.msrb.mxu3 %v612_v38  ;;  %v801_v37 = vld [vmem:[%s1559_s7 + $0xc0] sm:$0xff]  ;;  %v800_v38 = vld [vmem:[%s1559_s7 + $0xb8] sm:$0xff] }
  0xf2   :  { %751 = vmatmul.f32.vlgmr.msrb.gmra.mxu2 %v1267_v63  ;;  %v782_v63 = vld [vmem:[%s1559_s7 + $0x28] sm:$0xff]  ;;  %839 = vmatpush.msrb.mxu1 %v802_v36  ;;  %v1035_v36 = vld [vmem:[%s1563_s11] ss:$0 sm:$0xff] }
  0xf3   :  { %770 = vmatpush.msrb.mxu3 %v610_v39  ;;  %823 = vmatpush.msrb.mxu0 %v782_v63  ;;  %v799_v39 = vld [vmem:[%s1559_s7 + $0xb0] sm:$0xff] }
  0xf4   :  { %771 = vmatmul.f32.vlgmr.msrb.gmra.mxu3 %v1269_v0  ;;  %v781_v0 = vld [vmem:[%s1559_s7 + $0x20] sm:$0xff]  ;;  %840 = vmatpush.msrb.mxu1 %v801_v37 }
  0xf5   :  { %921 = vmatpush.msra.mxu3 %v868_v40  ;;  %824 = vmatpush.msrb.mxu0 %v781_v0 }
  0xf6   :  { %841 = vmatpush.msrb.mxu1 %v800_v38 }
  0xf7   :  { %922 = vmatpush.msra.mxu3 %v867_v41  ;;  %825 = vmatpush.msrb.mxu0 %v780_v1  ;;  %v798_v41 = vld [vmem:[%s1559_s7 + $0xa8] sm:$0xff] }
  0xf8   :  { %842 = vmatpush.msrb.mxu1 %v799_v39 }
  0xf9   :  { %923 = vmatpush.msra.mxu3 %v866_v42  ;;  %826 = vmatpush.msrb.mxu0 %v779_v2 }
  0xfa   :  { %843 = vmatpush.msrb.mxu1 %v798_v41  ;;  %v1036_v41 = vld [vmem:[%s1565_s13] ss:$0 sm:$0xff] }
  0xfb   :  { %924 = vmatpush.msra.mxu3 %v865_v44  ;;  %827 = vmatpush.msrb.mxu0 %v778_v3 }
  0xfd   :  { %925 = vmatpush.msra.mxu3 %v864_v45  ;;  %828 = vmatpush.msrb.mxu0 %v777_v4  ;;  %v641_v45 = vld [vmem:[%s1558_s6] sm:$0x3] }
  0xfe   :  { %v644_v1 = vperm.slane %v641_v45, 1 }
  0xff   :  { %926 = vmatpush.msra.mxu3 %v863_v46  ;;  %941 = vmatpush.msra.mxu0 %v884_v43  ;;  %v797_v46 = vld [vmem:[%s1559_s7 + $0xa0] sm:$0xff] }
 0x100   :  { %844 = vmatpush.msrb.mxu1 %v797_v46 }
 0x101   :  { %927 = vmatpush.msra.mxu3 %v862_v47  ;;  %942 = vmatpush.msra.mxu0 %v883_v5  ;;  %v643_v47 = vperm.slane %v641_v45, 0  ;;  %v1037_v45 = vld [vmem:[%s1566_s14] ss:$0 sm:$0xff] }
 0x103   :  { %928 = vmatpush.msra.mxu3 %v861_v48  ;;  %943 = vmatpush.msra.mxu0 %v882_v7  ;;  %v359_v48 = vperm.slane %v1380_v6, 1 }
 0x105   :  { %929 = vmatpush.msra.mxu3 %v860_v49  ;;  %944 = vmatpush.msra.mxu0 %v881_v8  ;;  %v796_v49 = vld [vmem:[%s1559_s7 + $0x98] sm:$0xff] }
 0x106   :  { %845 = vmatpush.msrb.mxu1 %v796_v49  ;;  %v900_v8 = vld [vmem:[%s1562_s10 + $0x78] sm:$0xff]  ;;  %v1038_v49 = vld [vmem:[#allocation2] ss:$0 sm:$0xff] }
 0x107   :  { %930 = vmatpush.msra.mxu3 %v859_v50  ;;  %945 = vmatpush.msra.mxu0 %v880_v20  ;;  %v898_v20 = vld [vmem:[%s1562_s10 + $0x68] sm:$0xff] }
 0x108   :  { %901 = vmatpush.msra.mxu2 %v900_v8 }
 0x109   :  { %931 = vmatpush.msra.mxu3 %v858_v52  ;;  %946 = vmatpush.msra.mxu0 %v879_v11  ;;  %v795_v52 = vld [vmem:[%s1559_s7 + $0x90] sm:$0xff]  ;;  %v896_v11 = vld [vmem:[%s1562_s10 + $0x58] sm:$0xff] }
 0x10a   :  { %846 = vmatpush.msrb.mxu1 %v795_v52 }
 0x10b   :  { %932 = vmatpush.msra.mxu3 %v857_v54  ;;  %947 = vmatpush.msra.mxu0 %v878_v13  ;;  %v894_v13 = vld [vmem:[%s1562_s10 + $0x48] sm:$0xff] }
 0x10c   :  { %847 = vmatpush.msrb.mxu1 %v794_v57 }
 0x10d   :  { %933 = vmatpush.msra.mxu3 %v856_v56  ;;  %948 = vmatpush.msra.mxu0 %v877_v17  ;;  %v890_v17 = vld [vmem:[%s1562_s10 + $0x28] sm:$0xff] }
 0x10e   :  { %848 = vmatpush.msrb.mxu1 %v793_v59 }
 0x10f   :  { %934 = vmatpush.msra.mxu3 %v855_v58  ;;  %949 = vmatpush.msra.mxu0 %v876_v21  ;;  %v887_v21 = vld [vmem:[%s1562_s10 + $0x10] sm:$0xff] }
 0x110   :  { %991 = vmatpush.msra.mxu1 %v970_v29 }
 0x111   :  { %935 = vmatpush.msra.mxu3 %v854_v60  ;;  %950 = vmatpush.msra.mxu0 %v875_v23  ;;  %v885_v23 = vld [vmem:[%s1562_s10] sm:$0xff] }
 0x113   :  { %936 = vmatpush.msra.mxu3 %v853_v62  ;;  %951 = vmatpush.msra.mxu0 %v874_v24  ;;  %v1034_v24 = vld [vmem:[%s1560_s8] ss:$0 sm:$0xff] }
 0x115   :  { %952 = vmatpush.msra.mxu0 %v873_v26 }
 0x117   :  { %953 = vmatpush.msra.mxu0 %v872_v28 }
 0x119   :  { %954 = vmatpush.msra.mxu0 %v871_v30  ;;  %v969_v30 = vld [vmem:[%s1564_s12 + $0x10] sm:$0xff] }
 0x11a   :  { %992 = vmatpush.msra.mxu1 %v969_v30 }
 0x11b   :  { %955 = vmatpush.msra.mxu0 %v870_v32  ;;  %v967_v32 = vld [vmem:[%s1564_s12] sm:$0xff] }
 0x11c   :  { %993 = vmatpush.msra.mxu1 %v968_v31 }
 0x11d   :  { %956 = vmatpush.msra.mxu0 %v869_v34 }
 0x11e   :  { %994 = vmatpush.msra.mxu1 %v967_v32 }
 0x12e   :  { %v401_v10 = vpop.f32.mrf.mxu0  ;;  %v421_v14 = vpop.f32.mrf.mxu1 }
 0x12f   :  { %v402_v12 = vadd.f32 %v401_v10, %v358_v9  ;;  %v899_v9 = vld [vmem:[%s1562_s10 + $0x70] sm:$0xff]  ;;  %v897_v10 = vld [vmem:[%s1562_s10 + $0x60] sm:$0xff] }
 0x130   :  { %902 = vmatpush.msra.mxu2 %v899_v9 }
 0x131   :  { %v422_v15 = vadd.f32 %v421_v14, %v402_v12  ;;  %v895_v12 = vld [vmem:[%s1562_s10 + $0x50] sm:$0xff]  ;;  %v893_v14 = vld [vmem:[%s1562_s10 + $0x40] sm:$0xff] }
 0x132   :  { %903 = vmatpush.msra.mxu2 %v898_v20 }
 0x134   :  { %904 = vmatpush.msra.mxu2 %v897_v10 }
 0x135   :  { %v441_v16 = vpop.f32.mrf.mxu2 }
 0x136   :  { %v442_v18 = vadd.f32 %v441_v16, %v422_v15  ;;  %v461_v19 = vpop.f32.mrf.mxu3  ;;  %v501_v42 = vpop.f32.mrf.mxu0  ;;  %905 = vmatpush.msra.mxu2 %v896_v11  ;;  %v892_v15 = vld [vmem:[%s1562_s10 + $0x38] sm:$0xff]  ;;  %v891_v16 = vld [vmem:[%s1562_s10 + $0x30] sm:$0xff] }
 0x137   :  { %v521_v62 = vpop.f32.mrf.mxu1 }
 0x138   :  { %v462_v22 = vadd.f32 %v461_v19, %v442_v18  ;;  %906 = vmatpush.msra.mxu2 %v895_v12  ;;  %v889_v18 = vld [vmem:[%s1562_s10 + $0x20] sm:$0xff]  ;;  %v888_v19 = vld [vmem:[%s1562_s10 + $0x18] sm:$0xff] }
 0x13a   :  { %937 = vmatmul.f32.vlgmr.msra.gmra.mxu3 %v462_v22  ;;  %907 = vmatpush.msra.mxu2 %v894_v13  ;;  %v886_v22 = vld [vmem:[%s1562_s10 + $0x8] sm:$0xff] }
 0x13c   :  { %908 = vmatpush.msra.mxu2 %v893_v14 }
 0x13d   :  { %v541_v40 = vpop.f32.mrf.mxu2 }
 0x13e   :  { %909 = vmatpush.msra.mxu2 %v892_v15 }
 0x13f   :  { %v481_v44 = vpop.f32.mrf.mxu3 }
 0x140   :  { %v482_v55 = vadd.f32 %v481_v44, %v359_v48  ;;  %910 = vmatpush.msra.mxu2 %v891_v16 }
 0x142   :  { %v502_v60 = vadd.f32 %v501_v42, %v482_v55  ;;  %911 = vmatpush.msra.mxu2 %v890_v17 }
 0x144   :  { %v522_v63 = vadd.f32 %v521_v62, %v502_v60  ;;  %912 = vmatpush.msra.mxu2 %v889_v18 }
 0x146   :  { %v542_v0 = vadd.f32 %v541_v40, %v522_v63  ;;  %913 = vmatpush.msra.mxu2 %v888_v19 }
 0x148   :  { %914 = vmatpush.msra.mxu2 %v887_v21 }
 0x14a   :  { %915 = vmatpush.msra.mxu2 %v886_v22 }
 0x14c   :  { %916 = vmatpush.msra.mxu2 %v885_v23 }
 0x151   :  { %v712_v54 = vpop.f32.mrf.mxu0 }
 0x155   :  { %v672_v50 = vpop.f32.mrf.mxu2 }
 0x156   :  { %v673_v51 = vadd.f32 %v672_v50, %v643_v47 }
 0x157   :  { %v692_v53 = vpop.f32.mrf.mxu3 }
 0x158   :  { %v693_v56 = vadd.f32 %v692_v53, %v673_v51 }
 0x15a   :  { %v713_v58 = vadd.f32 %v712_v54, %v693_v56 }
 0x15b   :  { %v732_v2 = vpop.f32.mrf.mxu1 }
 0x15c   :  { %v775_v61 = vmax.f32 %v713_v58, 0.0  ;;  %v733_v3 = vadd.f32 %v732_v2, %v644_v1 }
 0x15e   :  { %829 = vmatmul.f32.vlgmr.msrb.gmra.mxu0 %v775_v61 }
 0x166   :  { %957 = vmatmul.f32.vlgmr.msra.gmra.mxu0 %v542_v0 }
 0x175   :  { %v752_v4 = vpop.f32.mrf.mxu2 }
 0x176   :  { %v753_v43 = vadd.f32 %v752_v4, %v733_v3 }
 0x177   :  { %v772_v5 = vpop.f32.mrf.mxu3 }
 0x178   :  { %v773_v6 = vadd.f32 %v772_v5, %v753_v43 }
 0x17a   :  { %v776_v7 = vmax.f32 %v773_v6, 0.0 }
 0x17c   :  { %849 = vmatmul.f32.vlgmr.msrb.gmra.mxu1 %v776_v7 }
 0x1bd   :  { %v938_v33 = vpop.f32.mrf.mxu3 }
 0x1db   :  { %v830_v25 = vpop.f32.mrf.mxu0 }
 0x1dc   :  { %v831_v26 = vadd.f32 %v1034_v24, %v830_v25 }
 0x1e3   :  { %v958_v37 = vpop.f32.mrf.mxu0 }
 0x1f9   :  { %v850_v27 = vpop.f32.mrf.mxu1 }
 0x1fa   :  { %v851_v28 = vadd.f32 %v850_v27, %v831_v26 }
 0x1fc   :  { %917 = vmatmul.f32.vlgmr.msra.gmra.mxu2 %v851_v28 }
 0x27f   :  { %v918_v34 = vpop.f32.mrf.mxu2 }
 0x280   :  { %v939_v35 = vadd.f32 %v938_v33, %v918_v34 }
 0x282   :  { %v959_v38 = vadd.f32 %v958_v37, %v939_v35 }
 0x284   :  { %v965_v39 = vadd.f32 %v1035_v36, %v959_v38 }
 0x286   :  { %v966_v40 = vmax.f32 %v965_v39, 0.0 }
 0x288   :  { %1024 = vmatmul.msk.f32.vlgmr.msra.gmra.mxu1 %vm975_vm3, %v966_v40 }
 0x305   :  { %v996_v42 = vpop.f32.mrf.mxu1 }
 0x306   :  { %v997_v44 = vadd.f32 %v1036_v41, %v996_v42 }
 0x308   :  { %v999_v46 = vmax.f32 %v997_v44, 0.0 }
 0x30a   :  { %v1004_v47 = vmul.f32 %v1037_v45, %v999_v46 }
 0x30c   :  { %v1006_v48 = vsel %vm1005_vm4, %v1004_v47, 0.0 }
 0x30d   :  { %1007 = vadd.xlane.f32.xlu2 %v1006_v48 }
 0x380   :  { %v1008_v50 = vpop.xlane.xlu2 %1007 }
 0x381   :  { %v1013_v51 = vadd.f32 %v1038_v49, %v1008_v50 }
 0x383   :  { %1015 = vst.msk [vmem:[%s1568_s16] sm:$0x3] %vm1014_vm5, %v1013_v51 }
 0x384   :  { %1020 = vsyncpa [#allocation4], 1 }
 0x385   :  { %1021 = vsyncpa [#allocation6], 1 }

</bundles_post_ra>
